<compile_context>
chip_gen: v5e
topology: v5e:2x2
jax: 0.10.0
libtpu: 0.0.40
codegen_flags: <defaults>
</compile_context>

<pallas_src>
import functools

import jax
import jax.numpy as jnp
from jax.experimental import pallas as pl
from jax.experimental.pallas import tpu as pltpu

# logical channel sizes (stand-in B5-style block) and the lane-dense padded width
CIN, C1, CMID, CSE, CHEAD, NUM_CLASSES = 3, 16, 64, 4, 64, 5
P = 128                 # every channel axis is zero-padded to one full lane tile
KSTEM = 16 * CIN        # 2x2 s2d-block neighbourhood * 4 phases * CIN = 48 (stem K)

# exact sigmoid (approx=False) kept available for validation runs
_APPROX_RECIP = True


# ---------------------------------------------------------------------------
# in-kernel activation helpers (EUP-friendly sigmoid, f32)
# ---------------------------------------------------------------------------
def _sigmoid(y):
    return pl.reciprocal(1.0 + jnp.exp(-y), approx=_APPROX_RECIP)


def _silu(y):
    return y * _sigmoid(y)


# ---------------------------------------------------------------------------
# Fully fused forward kernel: one grid step == one batch block, all in VMEM.
# ---------------------------------------------------------------------------
def _fused_kernel(x_ref, tmask_ref,
                  stem_w_ref, stem_b_ref,
                  exp_w_ref, exp_b_ref,
                  dw_w_ref, dw_b_ref,
                  se1_w_ref, se1_b_ref,
                  se2_w_ref, se2_b_ref,
                  proj_w_ref, proj_b_ref,
                  head_w_ref, head_b_ref,
                  cls_w_ref, cls_b_ref,
                  o_ref, *, Bb, Ho, Wo):
    f32 = jnp.float32
    bf16 = jnp.bfloat16
    Mi = Ho * Wo
    M = Bb * Mi

    # --- stem: 3x3/stride-2 conv folded into ONE (M,48)x(48,128) matmul --------------
    patches = x_ref[...]                                            # (M, 48) bf16
    h = _silu(jnp.dot(patches, stem_w_ref[...],
                      preferred_element_type=f32) + stem_b_ref[...])
    h = h.astype(bf16)          # long-lived (residual) + expand operand; halves VMEM

    # --- MBConv expand 1x1 (folded-BN bias) + SiLU ------------------------------------
    e = _silu(jnp.dot(h, exp_w_ref[...],
                      preferred_element_type=f32) + exp_b_ref[...])      # (M,128) f32

    # --- depthwise 3x3, stride 1, SAME: 9 taps = sublane rolls + boundary masks -------
    # flattened row index m = b*Ho*Wo + hh*Wo + ww, so a (dr,dc) spatial shift is ONE
    # rotation by dr*Wo+dc; wrapped / cross-image rows are exactly the masked rows.
    tmask = tmask_ref[...]                                          # (M, 9) f32 0/1
    dw_w = dw_w_ref[...]                                            # (9, 128) f32
    dacc = jnp.zeros((M, P), f32)
    for dr in (-1, 0, 1):
        for dc in (-1, 0, 1):
            k = (dr + 1) * 3 + (dc + 1)
            s = dr * Wo + dc
            src = e if s == 0 else pltpu.roll(e, (-s) % M, axis=0)
            if k != 4:                                  # center tap needs no mask
                src = src * tmask[:, k:k + 1]
            dacc = dacc + src * dw_w[k:k + 1, :]
    d = _silu(dacc + dw_b_ref[...])                                 # (M,128) f32

    # --- squeeze-excite: per-image global pool + two tiny FCs (kept in f32) -----------
    d3 = d.reshape(Bb, Mi, P)
    s_pool = jnp.mean(d3, axis=1)                                   # (Bb, 128) f32
    s1 = _silu(jnp.dot(s_pool, se1_w_ref[...],
                       preferred_element_type=f32) + se1_b_ref[...])
    gate = _sigmoid(jnp.dot(s1, se2_w_ref[...],
                            preferred_element_type=f32) + se2_b_ref[...])   # (Bb,128)
    dg = (d3 * gate[:, None, :]).reshape(M, P)                      # per-channel gate

    # --- project 1x1 + residual (identity activation, as in MBConv) -------------------
    p = (jnp.dot(dg.astype(bf16), proj_w_ref[...],
                 preferred_element_type=f32)
         + proj_b_ref[...] + h.astype(f32))

    # --- head 1x1 + SiLU, per-image global average pool, classifier (->5, lane-padded)-
    hd = _silu(jnp.dot(p.astype(bf16), head_w_ref[...],
                       preferred_element_type=f32) + head_b_ref[...])
    pooled = jnp.mean(hd.reshape(Bb, Mi, P), axis=1)                # (Bb, 128) f32
    logits = (jnp.dot(pooled, cls_w_ref[...],
                      preferred_element_type=f32) + cls_b_ref[...])
    o_ref[...] = logits                                             # lane-dense store


# ---------------------------------------------------------------------------
# Parameters: deterministic init, BatchNorm folded to bias, channels zero-padded
# to 128 lanes, 3x3/s2 stem folded to a (48, 128) matmul weight.
# NOTE: padded rows/cols beyond the real channel counts MUST stay exactly zero
# (the padded-lane-zero invariant); re-pad when loading real timm weights.
# ---------------------------------------------------------------------------
def _pad_mat(w2d, rows, cols, dtype=jnp.float32):
    out = jnp.zeros((rows, cols), jnp.float32)
    out = out.at[:w2d.shape[0], :w2d.shape[1]].set(w2d)
    return out.astype(dtype)


def _pad_bias(b1d, cols):
    return jnp.zeros((1, cols), jnp.float32).at[0, :b1d.shape[0]].set(b1d)


def _fold_stem(w_hwio):
    """Fold the 3x3/stride-2 stem weight (HWIO) into a (48, 128) matmul weight.

    Row index = tap*(4*CIN) + pu*(2*CIN) + pv*CIN + cin with tap = ei*2+ej, matching
    the wrapper's 2x2 space-to-depth neighbourhood layout.
    """
    emap = [(0, 1), (1, 0), (1, 1)]      # conv tap offset d -> (2x2 block offset, phase)
    w = jnp.zeros((2, 2, 2, 2, CIN, P), jnp.float32)   # (ei, ej, pu, pv, cin, cout)
    for di in range(3):
        ei, pu = emap[di]
        for dj in range(3):
            ej, pv = emap[dj]
            w = w.at[ei, ej, pu, pv, :, :C1].set(w_hwio[di, dj])
    return w.reshape(KSTEM, P)


def init_params(key):
    ks = jax.random.split(key, 16)
    bf16 = jnp.bfloat16

    def w(k, shape, fan_in):
        return jax.random.normal(k, shape, jnp.float32) / jnp.sqrt(float(fan_in))

    stem_hwio = jnp.transpose(w(ks[0], (C1, CIN, 3, 3), CIN * 9), (2, 3, 1, 0))
    dw = w(ks[4], (3, 3, CMID), 9).reshape(9, CMID)

    return {
        "stem_w": _fold_stem(stem_hwio).astype(bf16),                       # (48, 128)
        "stem_b": _pad_bias(0.01 * jax.random.normal(ks[1], (C1,)), P),
        "exp_w": _pad_mat(w(ks[2], (C1, CMID), C1), P, P, bf16),
        "exp_b": _pad_bias(0.01 * jax.random.normal(ks[3], (CMID,)), P),
        "dw_w": _pad_mat(dw, 9, P),                                         # (9, 128)
        "dw_b": _pad_bias(0.01 * jax.random.normal(ks[5], (CMID,)), P),
        "se1_w": _pad_mat(w(ks[6], (CMID, CSE), CMID), P, P),
        "se1_b": _pad_bias(0.01 * jax.random.normal(ks[7], (CSE,)), P),
        "se2_w": _pad_mat(w(ks[8], (CSE, CMID), CSE), P, P),
        "se2_b": _pad_bias(0.01 * jax.random.normal(ks[9], (CMID,)), P),
        "proj_w": _pad_mat(w(ks[10], (CMID, C1), CMID), P, P, bf16),
        "proj_b": _pad_bias(0.01 * jax.random.normal(ks[11], (C1,)), P),
        "head_w": _pad_mat(w(ks[12], (C1, CHEAD), C1), P, P, bf16),
        "head_b": _pad_bias(0.01 * jax.random.normal(ks[13], (CHEAD,)), P),
        "cls_w": _pad_mat(w(ks[14], (CHEAD, NUM_CLASSES), CHEAD), P, P),
        "cls_b": jnp.zeros((1, P), jnp.float32),
    }


# ---------------------------------------------------------------------------
# Forward wrapper: NCHW -> NHWC, s2d neighbourhood gather, one fused pallas_call.
# ---------------------------------------------------------------------------
_WEIGHT_ORDER = ("stem_w", "stem_b", "exp_w", "exp_b", "dw_w", "dw_b",
                 "se1_w", "se1_b", "se2_w", "se2_b", "proj_w", "proj_b",
                 "head_w", "head_b", "cls_w", "cls_b")


def _pick_vmem_limit_bytes():
    mib = 1024 * 1024
    try:
        phys = int(pltpu.get_tpu_info().vmem_capacity_bytes)
    except Exception:
        return 64 * mib
    if phys >= 112 * mib:                       # v5e / v6e class (128 MiB physical)
        return 96 * mib
    return max(32 * mib, min(52 * mib, phys - 8 * mib))   # v7x class (64 MiB physical)


def _const_spec(arr):
    # constant block index across the grid -> single-buffered (frees VMEM headroom,
    # no per-step re-DMA / pipeline bookkeeping for data that never changes)
    zeros = (0,) * arr.ndim
    return pl.BlockSpec(arr.shape, lambda n, _z=zeros: _z,
                        pipeline_mode=pl.Buffered(1))


def _depthwise_tap_masks(Bb, Ho, Wo):
    """(Bb*Ho*Wo, 9) f32 validity mask per 3x3 tap (precomputed, tiny)."""
    h_idx = jnp.arange(Ho)
    w_idx = jnp.arange(Wo)
    h_ok = {-1: h_idx >= 1, 0: h_idx >= 0, 1: h_idx < Ho - 1}
    w_ok = {-1: w_idx >= 1, 0: w_idx >= 0, 1: w_idx < Wo - 1}
    cols = []
    for dr in (-1, 0, 1):
        for dc in (-1, 0, 1):
            cols.append((h_ok[dr][:, None] & w_ok[dc][None, :]).reshape(Ho * Wo))
    mask = jnp.stack(cols, axis=-1).astype(jnp.float32)             # (Ho*Wo, 9)
    return jnp.tile(mask, (Bb, 1))                                  # (Bb*Ho*Wo, 9)


def efficientnet_forward(x_nchw, params):
    x = jnp.transpose(x_nchw, (0, 2, 3, 1)).astype(jnp.float32)     # NCHW -> NHWC
    Nb, H, W, Cin = x.shape
    assert H % 2 == 0 and W % 2 == 0 and Cin == CIN
    Ho, Wo = H // 2, W // 2
    Mi = Ho * Wo

    # space-to-depth (stride-2 phases -> channels), one zero block row/col on top/left,
    # then gather the 2x2 block neighbourhood so the stem is a single K=48 matmul
    # inside the kernel (wrapper-side layout plumbing; ~4x a tiny input, lane-friendly).
    xs = (x.reshape(Nb, Ho, 2, Wo, 2, Cin)
           .transpose(0, 1, 3, 2, 4, 5)
           .reshape(Nb, Ho, Wo, 4 * Cin))
    xp = jnp.pad(xs, ((0, 0), (1, 0), (1, 0), (0, 0)))
    patches = jnp.concatenate(
        [xp[:, ei:ei + Ho, ej:ej + Wo, :] for ei in (0, 1) for ej in (0, 1)],
        axis=-1)                                                    # (N, Ho, Wo, 48)
    patches = patches.reshape(Nb * Mi, KSTEM).astype(jnp.bfloat16)

    # batch blocking: amortize per-grid-step overhead, fill the MXU with >=128 rows
    if Nb <= 8:
        Bb = Nb
    else:
        assert Nb % 8 == 0, "batch > 8 must be a multiple of 8"
        Bb = 8
    grid = (Nb // Bb,)

    tap_mask = _depthwise_tap_masks(Bb, Ho, Wo)                     # (Bb*Mi, 9)
    w_args = [params[k] for k in _WEIGHT_ORDER]

    in_specs = ([pl.BlockSpec((Bb * Mi, KSTEM), lambda n: (n, 0)),
                 _const_spec(tap_mask)]
                + [_const_spec(a) for a in w_args])

    logits = pl.pallas_call(
        functools.partial(_fused_kernel, Bb=Bb, Ho=Ho, Wo=Wo),
        out_shape=jax.ShapeDtypeStruct((Nb, P), jnp.float32),
        grid=grid,
        in_specs=in_specs,
        out_specs=pl.BlockSpec((Bb, P), lambda n: (n, 0)),
        compiler_params=pltpu.CompilerParams(
            dimension_semantics=("parallel",),
            vmem_limit_bytes=_pick_vmem_limit_bytes()),
    )(patches, tap_mask, *w_args)

    return logits[:, :NUM_CLASSES]                                  # [N, 5]


if __name__ == "__main__":
    key = jax.random.PRNGKey(0)
    k_x, k_p = jax.random.split(key)
    x = jax.random.normal(k_x, (2, 3, 16, 16), dtype=jnp.float32)   # NCHW like PyTorch
    params = init_params(k_p)

    logits = jax.jit(efficientnet_forward)(x, params)
    jax.block_until_ready(logits)
    assert logits.shape == (2, NUM_CLASSES)
    assert logits.dtype == jnp.float32
    print("KERNEL_OK")
</pallas_src>

<mosaic_0001>
module attributes {stable_mosaic.version = 11 : i64} {
  func.func @_fused_kernel(%arg0: i32, %arg1: memref<128x48xbf16, #tpu.memory_space<vmem>>, %arg2: memref<128x9xf32, #tpu.memory_space<vmem>>, %arg3: memref<48x128xbf16, #tpu.memory_space<vmem>>, %arg4: memref<1x128xf32, #tpu.memory_space<vmem>>, %arg5: memref<128x128xbf16, #tpu.memory_space<vmem>>, %arg6: memref<1x128xf32, #tpu.memory_space<vmem>>, %arg7: memref<9x128xf32, #tpu.memory_space<vmem>>, %arg8: memref<1x128xf32, #tpu.memory_space<vmem>>, %arg9: memref<128x128xf32, #tpu.memory_space<vmem>>, %arg10: memref<1x128xf32, #tpu.memory_space<vmem>>, %arg11: memref<128x128xf32, #tpu.memory_space<vmem>>, %arg12: memref<1x128xf32, #tpu.memory_space<vmem>>, %arg13: memref<128x128xbf16, #tpu.memory_space<vmem>>, %arg14: memref<1x128xf32, #tpu.memory_space<vmem>>, %arg15: memref<128x128xbf16, #tpu.memory_space<vmem>>, %arg16: memref<1x128xf32, #tpu.memory_space<vmem>>, %arg17: memref<128x128xf32, #tpu.memory_space<vmem>>, %arg18: memref<1x128xf32, #tpu.memory_space<vmem>>, %arg19: memref<2x128xf32, #tpu.memory_space<vmem>>) attributes {dimension_semantics = [#tpu.dimension_semantics<parallel>], iteration_bounds = array<i64: 1>, scalar_prefetch = 0 : i64, scratch_operands = 0 : i64, tpu.core_type = #tpu.core_type<tc>, window_params = [{transform_indices = @transform_0, window_bounds = array<i64: 128, 48>}, {pipeline_mode = #tpu.pipeline_mode<synchronous>, transform_indices = @transform_1, window_bounds = array<i64: 128, 9>}, {pipeline_mode = #tpu.pipeline_mode<synchronous>, transform_indices = @transform_2, window_bounds = array<i64: 48, 128>}, {pipeline_mode = #tpu.pipeline_mode<synchronous>, transform_indices = @transform_3, window_bounds = array<i64: 1, 128>}, {pipeline_mode = #tpu.pipeline_mode<synchronous>, transform_indices = @transform_4, window_bounds = array<i64: 128, 128>}, {pipeline_mode = #tpu.pipeline_mode<synchronous>, transform_indices = @transform_5, window_bounds = array<i64: 1, 128>}, {pipeline_mode = #tpu.pipeline_mode<synchronous>, transform_indices = @transform_6, window_bounds = array<i64: 9, 128>}, {pipeline_mode = #tpu.pipeline_mode<synchronous>, transform_indices = @transform_7, window_bounds = array<i64: 1, 128>}, {pipeline_mode = #tpu.pipeline_mode<synchronous>, transform_indices = @transform_8, window_bounds = array<i64: 128, 128>}, {pipeline_mode = #tpu.pipeline_mode<synchronous>, transform_indices = @transform_9, window_bounds = array<i64: 1, 128>}, {pipeline_mode = #tpu.pipeline_mode<synchronous>, transform_indices = @transform_10, window_bounds = array<i64: 128, 128>}, {pipeline_mode = #tpu.pipeline_mode<synchronous>, transform_indices = @transform_11, window_bounds = array<i64: 1, 128>}, {pipeline_mode = #tpu.pipeline_mode<synchronous>, transform_indices = @transform_12, window_bounds = array<i64: 128, 128>}, {pipeline_mode = #tpu.pipeline_mode<synchronous>, transform_indices = @transform_13, window_bounds = array<i64: 1, 128>}, {pipeline_mode = #tpu.pipeline_mode<synchronous>, transform_indices = @transform_14, window_bounds = array<i64: 128, 128>}, {pipeline_mode = #tpu.pipeline_mode<synchronous>, transform_indices = @transform_15, window_bounds = array<i64: 1, 128>}, {pipeline_mode = #tpu.pipeline_mode<synchronous>, transform_indices = @transform_16, window_bounds = array<i64: 128, 128>}, {pipeline_mode = #tpu.pipeline_mode<synchronous>, transform_indices = @transform_17, window_bounds = array<i64: 1, 128>}, {transform_indices = @transform_18, window_bounds = array<i64: 2, 128>}]} {
    %c0 = arith.constant 0 : index
    %c0_0 = arith.constant 0 : index
    %0 = vector.load %arg1[%c0, %c0_0] : memref<128x48xbf16, #tpu.memory_space<vmem>>, vector<128x48xbf16>
    %c0_1 = arith.constant 0 : index
    %c0_2 = arith.constant 0 : index
    %1 = vector.load %arg3[%c0_1, %c0_2] : memref<48x128xbf16, #tpu.memory_space<vmem>>, vector<48x128xbf16>
    %cst = arith.constant dense<0.000000e+00> : vector<128x128xf32>
    %2 = tpu.matmul %0, %1, %cst {dimension_numbers = #tpu.dot_dimension_numbers<[1], [0], [0], [1], [0, 0, 1, 1], [], []>} : vector<128x48xbf16>, vector<48x128xbf16>, vector<128x128xf32> -> vector<128x128xf32>
    %c0_3 = arith.constant 0 : index
    %c0_4 = arith.constant 0 : index
    %3 = vector.load %arg4[%c0_3, %c0_4] : memref<1x128xf32, #tpu.memory_space<vmem>>, vector<1x128xf32>
    %4 = vector.broadcast %3 : vector<1x128xf32> to vector<128x128xf32>
    %5 = arith.addf %2, %4 : vector<128x128xf32>
    %cst_5 = arith.constant 0.000000e+00 : f32
    %6 = vector.broadcast %cst_5 : f32 to vector<128x128xf32>
    %7 = arith.subf %6, %5 : vector<128x128xf32>
    %8 = math.exp %7 : vector<128x128xf32>
    %cst_6 = arith.constant 1.000000e+00 : f32
    %9 = vector.broadcast %cst_6 : f32 to vector<128x128xf32>
    %10 = arith.addf %9, %8 : vector<128x128xf32>
    %11 = tpu.reciprocal %10 {approx = true} : vector<128x128xf32> -> vector<128x128xf32>
    %12 = arith.mulf %5, %11 : vector<128x128xf32>
    %13 = arith.truncf %12 : vector<128x128xf32> to vector<128x128xbf16>
    %c0_7 = arith.constant 0 : index
    %c0_8 = arith.constant 0 : index
    %14 = vector.load %arg5[%c0_7, %c0_8] : memref<128x128xbf16, #tpu.memory_space<vmem>>, vector<128x128xbf16>
    %cst_9 = arith.constant dense<0.000000e+00> : vector<128x128xf32>
    %15 = tpu.matmul %13, %14, %cst_9 {dimension_numbers = #tpu.dot_dimension_numbers<[1], [0], [0], [1], [0, 0, 1, 1], [], []>} : vector<128x128xbf16>, vector<128x128xbf16>, vector<128x128xf32> -> vector<128x128xf32>
    %c0_10 = arith.constant 0 : index
    %c0_11 = arith.constant 0 : index
    %16 = vector.load %arg6[%c0_10, %c0_11] : memref<1x128xf32, #tpu.memory_space<vmem>>, vector<1x128xf32>
    %17 = vector.broadcast %16 : vector<1x128xf32> to vector<128x128xf32>
    %18 = arith.addf %15, %17 : vector<128x128xf32>
    %cst_12 = arith.constant 0.000000e+00 : f32
    %19 = vector.broadcast %cst_12 : f32 to vector<128x128xf32>
    %20 = arith.subf %19, %18 : vector<128x128xf32>
    %21 = math.exp %20 : vector<128x128xf32>
    %cst_13 = arith.constant 1.000000e+00 : f32
    %22 = vector.broadcast %cst_13 : f32 to vector<128x128xf32>
    %23 = arith.addf %22, %21 : vector<128x128xf32>
    %24 = tpu.reciprocal %23 {approx = true} : vector<128x128xf32> -> vector<128x128xf32>
    %25 = arith.mulf %18, %24 : vector<128x128xf32>
    %c0_14 = arith.constant 0 : index
    %c0_15 = arith.constant 0 : index
    %26 = vector.load %arg2[%c0_14, %c0_15] : memref<128x9xf32, #tpu.memory_space<vmem>>, vector<128x9xf32>
    %c0_16 = arith.constant 0 : index
    %c0_17 = arith.constant 0 : index
    %27 = vector.load %arg7[%c0_16, %c0_17] : memref<9x128xf32, #tpu.memory_space<vmem>>, vector<9x128xf32>
    %cst_18 = arith.constant 0.000000e+00 : f32
    %28 = vector.broadcast %cst_18 : f32 to vector<128x128xf32>
    %c9_i32 = arith.constant 9 : i32
    %29 = tpu.dynamic_rotate %25 by %c9_i32 dim 0 : vector<128x128xf32>, i32 -> vector<128x128xf32>
    %30 = vector.extract_strided_slice %26 {offsets = [0, 0], sizes = [128, 1], strides = [1, 1]} : vector<128x9xf32> to vector<128x1xf32>
    %31 = vector.broadcast %30 : vector<128x1xf32> to vector<128x128xf32>
    %32 = arith.mulf %29, %31 : vector<128x128xf32>
    %33 = vector.extract_strided_slice %27 {offsets = [0, 0], sizes = [1, 128], strides = [1, 1]} : vector<9x128xf32> to vector<1x128xf32>
    %34 = vector.broadcast %33 : vector<1x128xf32> to vector<128x128xf32>
    %35 = arith.mulf %32, %34 : vector<128x128xf32>
    %36 = arith.addf %28, %35 : vector<128x128xf32>
    %c8_i32 = arith.constant 8 : i32
    %37 = tpu.dynamic_rotate %25 by %c8_i32 dim 0 : vector<128x128xf32>, i32 -> vector<128x128xf32>
    %38 = vector.extract_strided_slice %26 {offsets = [0, 1], sizes = [128, 1], strides = [1, 1]} : vector<128x9xf32> to vector<128x1xf32>
    %39 = vector.broadcast %38 : vector<128x1xf32> to vector<128x128xf32>
    %40 = arith.mulf %37, %39 : vector<128x128xf32>
    %41 = vector.extract_strided_slice %27 {offsets = [1, 0], sizes = [1, 128], strides = [1, 1]} : vector<9x128xf32> to vector<1x128xf32>
    %42 = vector.broadcast %41 : vector<1x128xf32> to vector<128x128xf32>
    %43 = arith.mulf %40, %42 : vector<128x128xf32>
    %44 = arith.addf %36, %43 : vector<128x128xf32>
    %c7_i32 = arith.constant 7 : i32
    %45 = tpu.dynamic_rotate %25 by %c7_i32 dim 0 : vector<128x128xf32>, i32 -> vector<128x128xf32>
    %46 = vector.extract_strided_slice %26 {offsets = [0, 2], sizes = [128, 1], strides = [1, 1]} : vector<128x9xf32> to vector<128x1xf32>
    %47 = vector.broadcast %46 : vector<128x1xf32> to vector<128x128xf32>
    %48 = arith.mulf %45, %47 : vector<128x128xf32>
    %49 = vector.extract_strided_slice %27 {offsets = [2, 0], sizes = [1, 128], strides = [1, 1]} : vector<9x128xf32> to vector<1x128xf32>
    %50 = vector.broadcast %49 : vector<1x128xf32> to vector<128x128xf32>
    %51 = arith.mulf %48, %50 : vector<128x128xf32>
    %52 = arith.addf %44, %51 : vector<128x128xf32>
    %c1_i32 = arith.constant 1 : i32
    %53 = tpu.dynamic_rotate %25 by %c1_i32 dim 0 : vector<128x128xf32>, i32 -> vector<128x128xf32>
    %54 = vector.extract_strided_slice %26 {offsets = [0, 3], sizes = [128, 1], strides = [1, 1]} : vector<128x9xf32> to vector<128x1xf32>
    %55 = vector.broadcast %54 : vector<128x1xf32> to vector<128x128xf32>
    %56 = arith.mulf %53, %55 : vector<128x128xf32>
    %57 = vector.extract_strided_slice %27 {offsets = [3, 0], sizes = [1, 128], strides = [1, 1]} : vector<9x128xf32> to vector<1x128xf32>
    %58 = vector.broadcast %57 : vector<1x128xf32> to vector<128x128xf32>
    %59 = arith.mulf %56, %58 : vector<128x128xf32>
    %60 = arith.addf %52, %59 : vector<128x128xf32>
    %61 = vector.extract_strided_slice %27 {offsets = [4, 0], sizes = [1, 128], strides = [1, 1]} : vector<9x128xf32> to vector<1x128xf32>
    %62 = vector.broadcast %61 : vector<1x128xf32> to vector<128x128xf32>
    %63 = arith.mulf %25, %62 : vector<128x128xf32>
    %64 = arith.addf %60, %63 : vector<128x128xf32>
    %c127_i32 = arith.constant 127 : i32
    %65 = tpu.dynamic_rotate %25 by %c127_i32 dim 0 : vector<128x128xf32>, i32 -> vector<128x128xf32>
    %66 = vector.extract_strided_slice %26 {offsets = [0, 5], sizes = [128, 1], strides = [1, 1]} : vector<128x9xf32> to vector<128x1xf32>
    %67 = vector.broadcast %66 : vector<128x1xf32> to vector<128x128xf32>
    %68 = arith.mulf %65, %67 : vector<128x128xf32>
    %69 = vector.extract_strided_slice %27 {offsets = [5, 0], sizes = [1, 128], strides = [1, 1]} : vector<9x128xf32> to vector<1x128xf32>
    %70 = vector.broadcast %69 : vector<1x128xf32> to vector<128x128xf32>
    %71 = arith.mulf %68, %70 : vector<128x128xf32>
    %72 = arith.addf %64, %71 : vector<128x128xf32>
    %c121_i32 = arith.constant 121 : i32
    %73 = tpu.dynamic_rotate %25 by %c121_i32 dim 0 : vector<128x128xf32>, i32 -> vector<128x128xf32>
    %74 = vector.extract_strided_slice %26 {offsets = [0, 6], sizes = [128, 1], strides = [1, 1]} : vector<128x9xf32> to vector<128x1xf32>
    %75 = vector.broadcast %74 : vector<128x1xf32> to vector<128x128xf32>
    %76 = arith.mulf %73, %75 : vector<128x128xf32>
    %77 = vector.extract_strided_slice %27 {offsets = [6, 0], sizes = [1, 128], strides = [1, 1]} : vector<9x128xf32> to vector<1x128xf32>
    %78 = vector.broadcast %77 : vector<1x128xf32> to vector<128x128xf32>
    %79 = arith.mulf %76, %78 : vector<128x128xf32>
    %80 = arith.addf %72, %79 : vector<128x128xf32>
    %c120_i32 = arith.constant 120 : i32
    %81 = tpu.dynamic_rotate %25 by %c120_i32 dim 0 : vector<128x128xf32>, i32 -> vector<128x128xf32>
    %82 = vector.extract_strided_slice %26 {offsets = [0, 7], sizes = [128, 1], strides = [1, 1]} : vector<128x9xf32> to vector<128x1xf32>
    %83 = vector.broadcast %82 : vector<128x1xf32> to vector<128x128xf32>
    %84 = arith.mulf %81, %83 : vector<128x128xf32>
    %85 = vector.extract_strided_slice %27 {offsets = [7, 0], sizes = [1, 128], strides = [1, 1]} : vector<9x128xf32> to vector<1x128xf32>
    %86 = vector.broadcast %85 : vector<1x128xf32> to vector<128x128xf32>
    %87 = arith.mulf %84, %86 : vector<128x128xf32>
    %88 = arith.addf %80, %87 : vector<128x128xf32>
    %c119_i32 = arith.constant 119 : i32
    %89 = tpu.dynamic_rotate %25 by %c119_i32 dim 0 : vector<128x128xf32>, i32 -> vector<128x128xf32>
    %90 = vector.extract_strided_slice %26 {offsets = [0, 8], sizes = [128, 1], strides = [1, 1]} : vector<128x9xf32> to vector<128x1xf32>
    %91 = vector.broadcast %90 : vector<128x1xf32> to vector<128x128xf32>
    %92 = arith.mulf %89, %91 : vector<128x128xf32>
    %93 = vector.extract_strided_slice %27 {offsets = [8, 0], sizes = [1, 128], strides = [1, 1]} : vector<9x128xf32> to vector<1x128xf32>
    %94 = vector.broadcast %93 : vector<1x128xf32> to vector<128x128xf32>
    %95 = arith.mulf %92, %94 : vector<128x128xf32>
    %96 = arith.addf %88, %95 : vector<128x128xf32>
    %c0_19 = arith.constant 0 : index
    %c0_20 = arith.constant 0 : index
    %97 = vector.load %arg8[%c0_19, %c0_20] : memref<1x128xf32, #tpu.memory_space<vmem>>, vector<1x128xf32>
    %98 = vector.broadcast %97 : vector<1x128xf32> to vector<128x128xf32>
    %99 = arith.addf %96, %98 : vector<128x128xf32>
    %cst_21 = arith.constant 0.000000e+00 : f32
    %100 = vector.broadcast %cst_21 : f32 to vector<128x128xf32>
    %101 = arith.subf %100, %99 : vector<128x128xf32>
    %102 = math.exp %101 : vector<128x128xf32>
    %cst_22 = arith.constant 1.000000e+00 : f32
    %103 = vector.broadcast %cst_22 : f32 to vector<128x128xf32>
    %104 = arith.addf %103, %102 : vector<128x128xf32>
    %105 = tpu.reciprocal %104 {approx = true} : vector<128x128xf32> -> vector<128x128xf32>
    %106 = arith.mulf %99, %105 : vector<128x128xf32>
    %107 = vector.shape_cast %106 : vector<128x128xf32> to vector<2x64x128xf32>
    %cst_23 = arith.constant dense<0.000000e+00> : vector<2x128xf32>
    %108 = vector.multi_reduction <add>, %107, %cst_23 [1] : vector<2x64x128xf32> to vector<2x128xf32>
    %cst_24 = arith.constant 6.400000e+01 : f32
    %109 = vector.broadcast %cst_24 : f32 to vector<2x128xf32>
    %110 = arith.divf %108, %109 : vector<2x128xf32>
    %c0_25 = arith.constant 0 : index
    %c0_26 = arith.constant 0 : index
    %111 = vector.load %arg9[%c0_25, %c0_26] : memref<128x128xf32, #tpu.memory_space<vmem>>, vector<128x128xf32>
    %cst_27 = arith.constant dense<0.000000e+00> : vector<2x128xf32>
    %112 = tpu.matmul %110, %111, %cst_27 {dimension_numbers = #tpu.dot_dimension_numbers<[1], [0], [0], [1], [0, 0, 1, 1], [], []>} : vector<2x128xf32>, vector<128x128xf32>, vector<2x128xf32> -> vector<2x128xf32>
    %c0_28 = arith.constant 0 : index
    %c0_29 = arith.constant 0 : index
    %113 = vector.load %arg10[%c0_28, %c0_29] : memref<1x128xf32, #tpu.memory_space<vmem>>, vector<1x128xf32>
    %114 = vector.broadcast %113 : vector<1x128xf32> to vector<2x128xf32>
    %115 = arith.addf %112, %114 : vector<2x128xf32>
    %cst_30 = arith.constant 0.000000e+00 : f32
    %116 = vector.broadcast %cst_30 : f32 to vector<2x128xf32>
    %117 = arith.subf %116, %115 : vector<2x128xf32>
    %118 = math.exp %117 : vector<2x128xf32>
    %cst_31 = arith.constant 1.000000e+00 : f32
    %119 = vector.broadcast %cst_31 : f32 to vector<2x128xf32>
    %120 = arith.addf %119, %118 : vector<2x128xf32>
    %121 = tpu.reciprocal %120 {approx = true} : vector<2x128xf32> -> vector<2x128xf32>
    %122 = arith.mulf %115, %121 : vector<2x128xf32>
    %c0_32 = arith.constant 0 : index
    %c0_33 = arith.constant 0 : index
    %123 = vector.load %arg11[%c0_32, %c0_33] : memref<128x128xf32, #tpu.memory_space<vmem>>, vector<128x128xf32>
    %cst_34 = arith.constant dense<0.000000e+00> : vector<2x128xf32>
    %124 = tpu.matmul %122, %123, %cst_34 {dimension_numbers = #tpu.dot_dimension_numbers<[1], [0], [0], [1], [0, 0, 1, 1], [], []>} : vector<2x128xf32>, vector<128x128xf32>, vector<2x128xf32> -> vector<2x128xf32>
    %c0_35 = arith.constant 0 : index
    %c0_36 = arith.constant 0 : index
    %125 = vector.load %arg12[%c0_35, %c0_36] : memref<1x128xf32, #tpu.memory_space<vmem>>, vector<1x128xf32>
    %126 = vector.broadcast %125 : vector<1x128xf32> to vector<2x128xf32>
    %127 = arith.addf %124, %126 : vector<2x128xf32>
    %cst_37 = arith.constant 0.000000e+00 : f32
    %128 = vector.broadcast %cst_37 : f32 to vector<2x128xf32>
    %129 = arith.subf %128, %127 : vector<2x128xf32>
    %130 = math.exp %129 : vector<2x128xf32>
    %cst_38 = arith.constant 1.000000e+00 : f32
    %131 = vector.broadcast %cst_38 : f32 to vector<2x128xf32>
    %132 = arith.addf %131, %130 : vector<2x128xf32>
    %133 = tpu.reciprocal %132 {approx = true} : vector<2x128xf32> -> vector<2x128xf32>
    %134 = vector.shape_cast %133 : vector<2x128xf32> to vector<2x1x128xf32>
    %135 = vector.broadcast %134 : vector<2x1x128xf32> to vector<2x64x128xf32>
    %136 = arith.mulf %107, %135 : vector<2x64x128xf32>
    %137 = vector.shape_cast %136 : vector<2x64x128xf32> to vector<128x128xf32>
    %138 = arith.truncf %137 : vector<128x128xf32> to vector<128x128xbf16>
    %c0_39 = arith.constant 0 : index
    %c0_40 = arith.constant 0 : index
    %139 = vector.load %arg13[%c0_39, %c0_40] : memref<128x128xbf16, #tpu.memory_space<vmem>>, vector<128x128xbf16>
    %cst_41 = arith.constant dense<0.000000e+00> : vector<128x128xf32>
    %140 = tpu.matmul %138, %139, %cst_41 {dimension_numbers = #tpu.dot_dimension_numbers<[1], [0], [0], [1], [0, 0, 1, 1], [], []>} : vector<128x128xbf16>, vector<128x128xbf16>, vector<128x128xf32> -> vector<128x128xf32>
    %c0_42 = arith.constant 0 : index
    %c0_43 = arith.constant 0 : index
    %141 = vector.load %arg14[%c0_42, %c0_43] : memref<1x128xf32, #tpu.memory_space<vmem>>, vector<1x128xf32>
    %142 = vector.broadcast %141 : vector<1x128xf32> to vector<128x128xf32>
    %143 = arith.addf %140, %142 : vector<128x128xf32>
    %144 = arith.extf %13 : vector<128x128xbf16> to vector<128x128xf32>
    %145 = arith.addf %143, %144 : vector<128x128xf32>
    %146 = arith.truncf %145 : vector<128x128xf32> to vector<128x128xbf16>
    %c0_44 = arith.constant 0 : index
    %c0_45 = arith.constant 0 : index
    %147 = vector.load %arg15[%c0_44, %c0_45] : memref<128x128xbf16, #tpu.memory_space<vmem>>, vector<128x128xbf16>
    %cst_46 = arith.constant dense<0.000000e+00> : vector<128x128xf32>
    %148 = tpu.matmul %146, %147, %cst_46 {dimension_numbers = #tpu.dot_dimension_numbers<[1], [0], [0], [1], [0, 0, 1, 1], [], []>} : vector<128x128xbf16>, vector<128x128xbf16>, vector<128x128xf32> -> vector<128x128xf32>
    %c0_47 = arith.constant 0 : index
    %c0_48 = arith.constant 0 : index
    %149 = vector.load %arg16[%c0_47, %c0_48] : memref<1x128xf32, #tpu.memory_space<vmem>>, vector<1x128xf32>
    %150 = vector.broadcast %149 : vector<1x128xf32> to vector<128x128xf32>
    %151 = arith.addf %148, %150 : vector<128x128xf32>
    %cst_49 = arith.constant 0.000000e+00 : f32
    %152 = vector.broadcast %cst_49 : f32 to vector<128x128xf32>
    %153 = arith.subf %152, %151 : vector<128x128xf32>
    %154 = math.exp %153 : vector<128x128xf32>
    %cst_50 = arith.constant 1.000000e+00 : f32
    %155 = vector.broadcast %cst_50 : f32 to vector<128x128xf32>
    %156 = arith.addf %155, %154 : vector<128x128xf32>
    %157 = tpu.reciprocal %156 {approx = true} : vector<128x128xf32> -> vector<128x128xf32>
    %158 = arith.mulf %151, %157 : vector<128x128xf32>
    %159 = vector.shape_cast %158 : vector<128x128xf32> to vector<2x64x128xf32>
    %cst_51 = arith.constant dense<0.000000e+00> : vector<2x128xf32>
    %160 = vector.multi_reduction <add>, %159, %cst_51 [1] : vector<2x64x128xf32> to vector<2x128xf32>
    %cst_52 = arith.constant 6.400000e+01 : f32
    %161 = vector.broadcast %cst_52 : f32 to vector<2x128xf32>
    %162 = arith.divf %160, %161 : vector<2x128xf32>
    %c0_53 = arith.constant 0 : index
    %c0_54 = arith.constant 0 : index
    %163 = vector.load %arg17[%c0_53, %c0_54] : memref<128x128xf32, #tpu.memory_space<vmem>>, vector<128x128xf32>
    %cst_55 = arith.constant dense<0.000000e+00> : vector<2x128xf32>
    %164 = tpu.matmul %162, %163, %cst_55 {dimension_numbers = #tpu.dot_dimension_numbers<[1], [0], [0], [1], [0, 0, 1, 1], [], []>} : vector<2x128xf32>, vector<128x128xf32>, vector<2x128xf32> -> vector<2x128xf32>
    %c0_56 = arith.constant 0 : index
    %c0_57 = arith.constant 0 : index
    %165 = vector.load %arg18[%c0_56, %c0_57] : memref<1x128xf32, #tpu.memory_space<vmem>>, vector<1x128xf32>
    %166 = vector.broadcast %165 : vector<1x128xf32> to vector<2x128xf32>
    %167 = arith.addf %164, %166 : vector<2x128xf32>
    %c0_58 = arith.constant 0 : index
    %c0_59 = arith.constant 0 : index
    %168 = vector.load %arg19[%c0_58, %c0_59] : memref<2x128xf32, #tpu.memory_space<vmem>>, vector<2x128xf32>
    tpu.vector_store %arg19[%c0_58, %c0_59], %167 {strides = array<i32>} : memref<2x128xf32, #tpu.memory_space<vmem>>, vector<2x128xf32>,
    return
  }
  func.func @transform_0(%arg0: i32) -> (i32, i32) {
    %c0_i32 = arith.constant 0 : i32
    %c0_i32_0 = arith.constant 0 : i32
    return %arg0, %c0_i32 : i32, i32
  }
  func.func @transform_1(%arg0: i32) -> (i32, i32) {
    %c0_i32 = arith.constant 0 : i32
    %c0_i32_0 = arith.constant 0 : i32
    %c0_i32_1 = arith.constant 0 : i32
    return %c0_i32, %c0_i32_0 : i32, i32
  }
  func.func @transform_2(%arg0: i32) -> (i32, i32) {
    %c0_i32 = arith.constant 0 : i32
    %c0_i32_0 = arith.constant 0 : i32
    %c0_i32_1 = arith.constant 0 : i32
    return %c0_i32, %c0_i32_0 : i32, i32
  }
  func.func @transform_3(%arg0: i32) -> (i32, i32) {
    %c0_i32 = arith.constant 0 : i32
    %c0_i32_0 = arith.constant 0 : i32
    %c0_i32_1 = arith.constant 0 : i32
    return %c0_i32, %c0_i32_0 : i32, i32
  }
  func.func @transform_4(%arg0: i32) -> (i32, i32) {
    %c0_i32 = arith.constant 0 : i32
    %c0_i32_0 = arith.constant 0 : i32
    %c0_i32_1 = arith.constant 0 : i32
    return %c0_i32, %c0_i32_0 : i32, i32
  }
  func.func @transform_5(%arg0: i32) -> (i32, i32) {
    %c0_i32 = arith.constant 0 : i32
    %c0_i32_0 = arith.constant 0 : i32
    %c0_i32_1 = arith.constant 0 : i32
    return %c0_i32, %c0_i32_0 : i32, i32
  }
  func.func @transform_6(%arg0: i32) -> (i32, i32) {
    %c0_i32 = arith.constant 0 : i32
    %c0_i32_0 = arith.constant 0 : i32
    %c0_i32_1 = arith.constant 0 : i32
    return %c0_i32, %c0_i32_0 : i32, i32
  }
  func.func @transform_7(%arg0: i32) -> (i32, i32) {
    %c0_i32 = arith.constant 0 : i32
    %c0_i32_0 = arith.constant 0 : i32
    %c0_i32_1 = arith.constant 0 : i32
    return %c0_i32, %c0_i32_0 : i32, i32
  }
  func.func @transform_8(%arg0: i32) -> (i32, i32) {
    %c0_i32 = arith.constant 0 : i32
    %c0_i32_0 = arith.constant 0 : i32
    %c0_i32_1 = arith.constant 0 : i32
    return %c0_i32, %c0_i32_0 : i32, i32
  }
  func.func @transform_9(%arg0: i32) -> (i32, i32) {
    %c0_i32 = arith.constant 0 : i32
    %c0_i32_0 = arith.constant 0 : i32
    %c0_i32_1 = arith.constant 0 : i32
    return %c0_i32, %c0_i32_0 : i32, i32
  }
  func.func @transform_10(%arg0: i32) -> (i32, i32) {
    %c0_i32 = arith.constant 0 : i32
    %c0_i32_0 = arith.constant 0 : i32
    %c0_i32_1 = arith.constant 0 : i32
    return %c0_i32, %c0_i32_0 : i32, i32
  }
  func.func @transform_11(%arg0: i32) -> (i32, i32) {
    %c0_i32 = arith.constant 0 : i32
    %c0_i32_0 = arith.constant 0 : i32
    %c0_i32_1 = arith.constant 0 : i32
    return %c0_i32, %c0_i32_0 : i32, i32
  }
  func.func @transform_12(%arg0: i32) -> (i32, i32) {
    %c0_i32 = arith.constant 0 : i32
    %c0_i32_0 = arith.constant 0 : i32
    %c0_i32_1 = arith.constant 0 : i32
    return %c0_i32, %c0_i32_0 : i32, i32
  }
  func.func @transform_13(%arg0: i32) -> (i32, i32) {
    %c0_i32 = arith.constant 0 : i32
    %c0_i32_0 = arith.constant 0 : i32
    %c0_i32_1 = arith.constant 0 : i32
    return %c0_i32, %c0_i32_0 : i32, i32
  }
  func.func @transform_14(%arg0: i32) -> (i32, i32) {
    %c0_i32 = arith.constant 0 : i32
    %c0_i32_0 = arith.constant 0 : i32
    %c0_i32_1 = arith.constant 0 : i32
    return %c0_i32, %c0_i32_0 : i32, i32
  }
  func.func @transform_15(%arg0: i32) -> (i32, i32) {
    %c0_i32 = arith.constant 0 : i32
    %c0_i32_0 = arith.constant 0 : i32
    %c0_i32_1 = arith.constant 0 : i32
    return %c0_i32, %c0_i32_0 : i32, i32
  }
  func.func @transform_16(%arg0: i32) -> (i32, i32) {
    %c0_i32 = arith.constant 0 : i32
    %c0_i32_0 = arith.constant 0 : i32
    %c0_i32_1 = arith.constant 0 : i32
    return %c0_i32, %c0_i32_0 : i32, i32
  }
  func.func @transform_17(%arg0: i32) -> (i32, i32) {
    %c0_i32 = arith.constant 0 : i32
    %c0_i32_0 = arith.constant 0 : i32
    %c0_i32_1 = arith.constant 0 : i32
    return %c0_i32, %c0_i32_0 : i32, i32
  }
  func.func @transform_18(%arg0: i32) -> (i32, i32) {
    %c0_i32 = arith.constant 0 : i32
    %c0_i32_0 = arith.constant 0 : i32
    return %arg0, %c0_i32 : i32, i32
  }
}

</mosaic_0001>

<bundles_post_ra>
// kernel: efficientnet_forward.1
= control target key start
LH: loop header
LB: loop body
LE: loop exit
PB: predicated region body
PF: predicated region fallthrough
CT: control target
= control target key end

     0   :  { %s5025_s0 = inlined_call_operand.vmem [shape: bf16[128,48], index: 0, kind: input, shape index: {}]   ;;  %s5026_s1 = inlined_call_operand.vmem [shape: f32[128,9], index: 1, kind: input, shape index: {}]   ;;  %s5027_s2 = inlined_call_operand.vmem [shape: bf16[48,128], index: 2, kind: input, shape index: {}]   ;;  %s5028_s3 = inlined_call_operand.vmem [shape: f32[1,128], index: 3, kind: input, shape index: {}]   ;;  %s5029_s4 = inlined_call_operand.vmem [shape: bf16[128,128], index: 4, kind: input, shape index: {}]   ;;  %s5030_s5 = inlined_call_operand.vmem [shape: f32[1,128], index: 5, kind: input, shape index: {}]   ;;  %s5031_s6 = inlined_call_operand.vmem [shape: f32[9,128], index: 6, kind: input, shape index: {}]   ;;  %s5032_s7 = inlined_call_operand.vmem [shape: f32[1,128], index: 7, kind: input, shape index: {}]   ;;  %s5033_s8 = inlined_call_operand.vmem [shape: f32[128,128], index: 8, kind: input, shape index: {}]   ;;  %s5034_s9 = inlined_call_operand.vmem [shape: f32[1,128], index: 9, kind: input, shape index: {}]   ;;  %s5035_s10 = inlined_call_operand.vmem [shape: f32[128,128], index: 10, kind: input, shape index: {}]   ;;  %s5036_s11 = inlined_call_operand.vmem [shape: f32[1,128], index: 11, kind: input, shape index: {}]   ;;  %s5037_s12 = inlined_call_operand.vmem [shape: bf16[128,128], index: 12, kind: input, shape index: {}]   ;;  %s5038_s13 = inlined_call_operand.vmem [shape: f32[1,128], index: 13, kind: input, shape index: {}]   ;;  %s5039_s14 = inlined_call_operand.vmem [shape: bf16[128,128], index: 14, kind: input, shape index: {}]   ;;  %s5040_s15 = inlined_call_operand.vmem [shape: f32[1,128], index: 15, kind: input, shape index: {}]   ;;  %s5041_s16 = inlined_call_operand.vmem [shape: f32[128,128], index: 16, kind: input, shape index: {}]   ;;  %s5042_s17 = inlined_call_operand.vmem [shape: f32[1,128], index: 17, kind: input, shape index: {}]   ;;  %s5043_s18 = inlined_call_operand.hbm [shape: f32[2,128], index: 18, kind: output, shape index: {}]  }
   0x1   :  { %5113 = sst [smem:[#allocation91_spill]] %s5025_s0 }
   0x2   :  { %5114 = sst [smem:[#allocation92_spill]] %s5026_s1 }
   0x3   :  { %5115 = sst [smem:[#allocation93_spill]] %s5027_s2 }
   0x4   :  { %s5116_s29 = sld [smem:[#allocation92_spill]]  ;;  %v5055_v3 = vmov 1   ;;  %v5057_v4 = vmov 0  }
   0x5   :  { %s5117_s20 = sld [smem:[#allocation93_spill]]  ;;  %2562 = vset.pattern.permute.xlu2 %v5055_v3  ;;  %2561 = vset.pattern.permute.xlu1 %v5057_v4 }
   0x6   :  { %2560 = vset.pattern.permute.xlu0 %v5057_v4 }
   0xa   :  { %v3081_v0 = vld [vmem:[%s5116_s29 + $0x40] sm:$0xff] }
   0xb   :  { %v3086_v1 = vld [vmem:[%s5116_s29] sm:$0xff]  ;;  %v2525_v2 = vld [vmem:[%s5117_s20 + $0x10] sm:$0xff]  ;;  %687 = vperm.xlu1 %2561, %v3081_v0   ;;  %v2524_v5 = vld [vmem:[%s5117_s20 + $0x8] sm:$0xff] }
   0xc   :  { %775 = vperm.xlu2 %2562, %v3086_v1   ;;  %175 = vmatpush.bf16.msra.mxu0 %v2525_v2 }
   0xd   :  { %647 = vperm.xlu0 %2560, %v3086_v1  }
   0xe   :  { %23 = vsyncpa [#allocation3], 0  ;;  %v3103_v6 = vld [vmem:[%s5116_s29 + $0x48] sm:$0xff]  ;;  %v2523_v8 = vld [vmem:[%s5117_s20] sm:$0xff]  ;;  %s5118_s0 = sld [smem:[#allocation91_spill]]  ;;  %vm145_vm0 = vcmask 392192  }
   0xf   :  { %v3108_v7 = vld [vmem:[%s5116_s29 + $0x8] sm:$0xff]  ;;  %v3123_v10 = vld [vmem:[%s5116_s29 + $0x10] sm:$0xff]  ;;  %v5053_v13 = vmov 2   ;;  %v3152_v15 = vld [vmem:[%s5116_s29 + $0x18] sm:$0xff]  ;;  %v5051_v19 = vmov 3   ;;  %v5047_v51 = vmov 5  }
  0x10   :  { %176 = vmatpush.bf16.msra.mxu0 %v2524_v5  ;;  %v3132_v11 = vld [vmem:[%s5116_s29 + $0x50] sm:$0xff]  ;;  %v3161_v16 = vld [vmem:[%s5116_s29 + $0x58] sm:$0xff]  ;;  %v3173_v18 = vld [vmem:[%s5116_s29 + $0x28] sm:$0xff]  ;;  %v5049_v60 = vmov 6   ;;  %vm1804_vm4 = vcmask 1041409  }
  0x11   :  { %v3195_v21 = vld [vmem:[%s5116_s29 + $0x20] sm:$0xff]  ;;  %v3222_v25 = vld [vmem:[%s5116_s29 + $0x70] sm:$0xff]  ;;  %v3244_v29 = vld [vmem:[%s5116_s29 + $0x68] sm:$0xff] }
  0x12   :  { %v3204_v22 = vld [vmem:[%s5116_s29 + $0x60] sm:$0xff]  ;;  %v2533_v30 = vld [vmem:[%s5029_s4 + $0x38] sm:$0xff]  ;;  %v2532_v32 = vld [vmem:[%s5029_s4 + $0x30] sm:$0xff] }
  0x13   :  { %692 = vperm.xlu1 %2561, %v3103_v6   ;;  %447 = vmatpush.bf16.msra.mxu1 %v2533_v30  ;;  %v2531_v34 = vld [vmem:[%s5029_s4 + $0x28] sm:$0xff]  ;;  %v2530_v37 = vld [vmem:[%s5029_s4 + $0x20] sm:$0xff]  ;;  %v3279_v38 = vld [vmem:[%s5116_s29 + $0x30] sm:$0xff] }
  0x14   :  { %779 = vperm.xlu2 %2562, %v3108_v7   ;;  %v2515_v9 = vld [vmem:[%s5118_s0] sm:$0xff]  ;;  %177 = vmatpush.bf16.msra.mxu0 %v2523_v8  ;;  %v2516_v12 = vld [vmem:[%s5118_s0 + $0x8] sm:$0xff]  ;;  %v2517_v14 = vld [vmem:[%s5118_s0 + $0x10] sm:$0xff] }
  0x15   :  { %652 = vperm.xlu0 %2560, %v3108_v7   ;;  %v2518_v17 = vld [vmem:[%s5118_s0 + $0x18] sm:$0xff]  ;;  %v2519_v20 = vld [vmem:[%s5118_s0 + $0x20] sm:$0xff]  ;;  %v2520_v23 = vld [vmem:[%s5118_s0 + $0x28] sm:$0xff] }
  0x16   :  { %v2521_v27 = vld [vmem:[%s5118_s0 + $0x30] sm:$0xff]  ;;  %v2522_v35 = vld [vmem:[%s5118_s0 + $0x38] sm:$0xff]  ;;  %v3301_v43 = vld [vmem:[%s5028_s3] ss:$0 sm:$0xff]  ;;  %s2358_s3 = sshll.u32 %s5043_s18, 4  ;;  %s2359_s3 = int_to_ptr.hbm [resolvable:$true] %s2358_s3 }
  0x17   :  { %2411 = vmatmul.msk.bf16.vlgmr.msra.gmra.mxu0 %vm145_vm0, %v2515_v9  ;;  %448 = vmatpush.bf16.msra.mxu1 %v2532_v32  ;;  %v2529_v40 = vld [vmem:[%s5029_s4 + $0x18] sm:$0xff]  ;;  %v2528_v42 = vld [vmem:[%s5029_s4 + $0x10] sm:$0xff]  ;;  %v2527_v45 = vld [vmem:[%s5029_s4 + $0x8] sm:$0xff] }
  0x18   :  { %v2526_v48 = vld [vmem:[%s5029_s4] sm:$0xff] }
  0x1b   :  { %2563 = vset.pattern.permute.xlu1 %v5055_v3  ;;  %449 = vmatpush.bf16.msra.mxu1 %v2531_v34 }
  0x1c   :  { %2564 = vset.pattern.permute.xlu2 %v5057_v4  ;;  %811 = vperm.xlu1 %2563, %v3103_v6  }
  0x1d   :  { %657 = vperm.xlu2 %2564, %v3123_v10   ;;  %672 = vperm.xlu0 %2560, %v3173_v18  }
  0x1f   :  { %450 = vmatpush.bf16.msra.mxu1 %v2530_v37 }
  0x23   :  { %451 = vmatpush.bf16.msra.mxu1 %v2529_v40 }
  0x24   :  { %2565 = vset.pattern.permute.xlu1 %v5057_v4 }
  0x25   :  { %2566 = vset.pattern.permute.xlu2 %v5055_v3  ;;  %697 = vperm.xlu1 %2565, %v3132_v11  }
  0x26   :  { %783 = vperm.xlu2 %2566, %v3123_v10   ;;  %2583 = vset.pattern.permute.xlu0 %v5055_v3 }
  0x27   :  { %2412 = vmatmul.msk.bf16.gmra.mxu0 %vm145_vm0, %v2516_v12  ;;  %807 = vperm.xlu0 %2583, %v3081_v0  }
  0x28   :  { %452 = vmatpush.bf16.msra.mxu1 %v2528_v42 }
  0x2c   :  { %453 = vmatpush.bf16.msra.mxu1 %v2527_v45 }
  0x2d   :  { %2567 = vset.pattern.permute.xlu1 %v5053_v13 }
  0x2e   :  { %2568 = vset.pattern.permute.xlu2 %v5053_v13  ;;  %921 = vperm.xlu1 %2567, %v3086_v1  }
  0x2f   :  { %925 = vperm.xlu2 %2568, %v3108_v7   ;;  %815 = vperm.xlu0 %2583, %v3132_v11  }
  0x30   :  { %454 = vmatpush.bf16.msra.mxu1 %v2526_v48 }
  0x36   :  { %957 = vperm.xlu1 %2567, %v3103_v6  }
  0x37   :  { %2569 = vset.pattern.permute.xlu2 %v5057_v4  ;;  %2413 = vmatmul.msk.bf16.gmra.mxu0 %vm145_vm0, %v2517_v14 }
  0x38   :  { %662 = vperm.xlu2 %2569, %v3152_v15   ;;  %819 = vperm.xlu0 %2583, %v3161_v16  }
  0x3e   :  { %2570 = vset.pattern.permute.xlu1 %v5057_v4 }
  0x3f   :  { %702 = vperm.xlu1 %2570, %v3161_v16  }
  0x40   :  { %2571 = vset.pattern.permute.xlu2 %v5055_v3  ;;  %823 = vperm.xlu0 %2583, %v3204_v22  }
  0x41   :  { %787 = vperm.xlu2 %2571, %v3152_v15  }
  0x47   :  { %2572 = vset.pattern.permute.xlu1 %v5053_v13  ;;  %2414 = vmatmul.msk.bf16.gmra.mxu0 %vm145_vm0, %v2518_v17 }
  0x48   :  { %929 = vperm.xlu1 %2572, %v3123_v10   ;;  %831 = vperm.xlu0 %2583, %v3222_v25  }
  0x49   :  { %2573 = vset.pattern.permute.xlu2 %v5053_v13 }
  0x4a   :  { %961 = vperm.xlu2 %2573, %v3132_v11  }
  0x50   :  { %2574 = vset.pattern.permute.xlu1 %v5051_v19  ;;  %2595 = vset.pattern.permute.xlu0 %v5053_v13 }
  0x51   :  { %1034 = vperm.xlu1 %2574, %v3086_v1   ;;  %953 = vperm.xlu0 %2595, %v3081_v0  }
  0x52   :  { %2575 = vset.pattern.permute.xlu2 %v5051_v19 }
  0x53   :  { %1038 = vperm.xlu2 %2575, %v3108_v7  }
  0x57   :  { %2415 = vmatmul.msk.bf16.gmra.mxu0 %vm145_vm0, %v2519_v20 }
  0x59   :  { %1070 = vperm.xlu1 %2574, %v3103_v6   ;;  %969 = vperm.xlu0 %2595, %v3204_v22  }
  0x5b   :  { %2576 = vset.pattern.permute.xlu2 %v5057_v4 }
  0x5c   :  { %667 = vperm.xlu2 %2576, %v3195_v21  }
  0x61   :  { %2577 = vset.pattern.permute.xlu1 %v5057_v4  ;;  %945 = vperm.xlu0 %2595, %v3279_v38  }
  0x62   :  { %707 = vperm.xlu1 %2577, %v3204_v22  }
  0x64   :  { %2578 = vset.pattern.permute.xlu2 %v5055_v3 }
  0x65   :  { %791 = vperm.xlu2 %2578, %v3195_v21  }
  0x66   :  { %v3213_v24 = vpop.permute.xlu2 %775 }
  0x67   :  { %5119 = vst [vmem:[#allocation5_spill] sm:$0xff] %v3213_v24  ;;  %2416 = vmatmul.msk.bf16.gmra.mxu0 %vm145_vm0, %v2520_v23 }
  0x69   :  { %2607 = vset.pattern.permute.xlu0 %v5051_v19 }
  0x6a   :  { %2579 = vset.pattern.permute.xlu1 %v5053_v13  ;;  %1066 = vperm.xlu0 %2607, %v3081_v0  }
  0x6b   :  { %933 = vperm.xlu1 %2579, %v3152_v15  }
  0x6d   :  { %2580 = vset.pattern.permute.xlu2 %v5053_v13 }
  0x6e   :  { %965 = vperm.xlu2 %2580, %v3161_v16   ;;  %v3226_v26 = vpop.permute.xlu2 %779 }
  0x6f   :  { %5120 = vst [vmem:[#allocation6_spill] sm:$0xff] %v3226_v26 }
  0x72   :  { %1090 = vperm.xlu0 %2607, %v3222_v25  }
  0x73   :  { %2581 = vset.pattern.permute.xlu1 %v5051_v19 }
  0x74   :  { %1042 = vperm.xlu1 %2581, %v3123_v10  }
  0x76   :  { %2582 = vset.pattern.permute.xlu2 %v5051_v19 }
  0x77   :  { %1074 = vperm.xlu2 %2582, %v3132_v11   ;;  %v3236_v28 = vpop.permute.xlu2 %657  ;;  %2417 = vmatmul.msk.bf16.gmra.mxu0 %vm145_vm0, %v2521_v27 }
  0x7a   :  { %2619 = vset.pattern.permute.xlu0 %v5049_v60 }
  0x7b   :  { %1329 = vperm.xlu0 %2619, %v3103_v6  }
  0x7c   :  { %2584 = vset.pattern.permute.xlu1 %v5057_v4 }
  0x7d   :  { %v3250_v31 = vpop.permute.xlu1 %687  ;;  %712 = vperm.xlu1 %2584, %v3244_v29  }
  0x7f   :  { %2585 = vset.pattern.permute.xlu2 %v5055_v3  ;;  %v3343_v32 = vpop.permute.xlu0 %647 }
  0x80   :  { %795 = vperm.xlu2 %2585, %v3173_v18   ;;  %v3258_v33 = vpop.permute.xlu2 %783  ;;  %5129 = vst [vmem:[#allocation15_spill] sm:$0xff] %v3343_v32 }
  0x83   :  { %1309 = vperm.xlu0 %2619, %v3195_v21  }
  0x85   :  { %v3267_v36 = vpop.permute.xlu1 %692  ;;  %2586 = vset.pattern.permute.xlu1 %v5055_v3 }
  0x86   :  { %5121 = vst [vmem:[#allocation7_spill] sm:$0xff] %v3267_v36  ;;  %827 = vperm.xlu1 %2586, %v3244_v29  }
  0x87   :  { %2418 = vmatmul.msk.bf16.gmra.mxu0 %vm145_vm0, %v2522_v35 }
  0x88   :  { %2587 = vset.pattern.permute.xlu2 %v5053_v13 }
  0x89   :  { %937 = vperm.xlu2 %2587, %v3195_v21   ;;  %v3282_v39 = vpop.permute.xlu2 %925 }
  0x8a   :  { %5122 = vst [vmem:[#allocation8_spill] sm:$0xff] %v3282_v39  ;;  %v5069_v39 = vmov 8  }
  0x8b   :  { %2631 = vset.pattern.permute.xlu0 %v5047_v51 }
  0x8c   :  { %1212 = vperm.xlu0 %2631, %v3081_v0  }
  0x8e   :  { %v3288_v41 = vpop.permute.xlu1 %811  ;;  %2588 = vset.pattern.permute.xlu1 %v5051_v19 }
  0x8f   :  { %5123 = vst [vmem:[#allocation9_spill] sm:$0xff] %v3288_v41  ;;  %1046 = vperm.xlu1 %2588, %v3152_v15  }
  0x91   :  { %2589 = vset.pattern.permute.xlu2 %v5051_v19 }
  0x92   :  { %1078 = vperm.xlu2 %2589, %v3161_v16   ;;  %v3303_v44 = vpop.permute.xlu2 %662 }
  0x94   :  { %v179_v46 = vpop.f32.mrf.mxu0  ;;  %1188 = vperm.xlu0 %2631, %v3123_v10  }
  0x95   :  { %v180_v47 = vadd.f32 %v3301_v43, %v179_v46 }
  0x97   :  { %v219_v49 = vsub.f32 0.0, %v180_v47  ;;  %v3313_v50 = vpop.permute.xlu1 %697  ;;  %2590 = vset.pattern.permute.xlu1 %v5047_v51 }
  0x98   :  { %5124 = vst [vmem:[#allocation10_spill] sm:$0xff] %v3313_v50  ;;  %1180 = vperm.xlu1 %2590, %v3086_v1  }
  0x99   :  { %v235_v52 = vmul.f32 1.442695, %v219_v49 }
  0x9a   :  { %2591 = vset.pattern.permute.xlu2 %v5047_v51 }
  0x9b   :  { %1184 = vperm.xlu2 %2591, %v3108_v7   ;;  %v3320_v53 = vpop.permute.xlu2 %787  ;;  %2669 = vpow2.f32 %v235_v52 }
  0x9c   :  { %v181_v54 = vpop.f32.mrf.mxu0  ;;  %1224 = vperm.xlu0 %2631, %v3161_v16  }
  0x9d   :  { %v182_v55 = vadd.f32 %v3301_v43, %v181_v54 }
  0x9f   :  { %v220_v56 = vsub.f32 0.0, %v182_v55 }
  0xa0   :  { %1216 = vperm.xlu1 %2590, %v3103_v6   ;;  %v3324_v57 = vpop.permute.xlu1 %921 }
  0xa1   :  { %5125 = vst [vmem:[#allocation11_spill] sm:$0xff] %v3324_v57  ;;  %v2670_v58 = vpop.eup %2669  ;;  %v237_v59 = vmul.f32 1.442695, %v220_v56 }
  0xa2   :  { %v267_v61 = vadd.f32 1.0, %v2670_v58  ;;  %v3361_v58 = vpop.permute.xlu0 %652 }
  0xa3   :  { %2592 = vset.pattern.permute.xlu2 %v5057_v4  ;;  %2671 = vpow2.f32 %v237_v59  ;;  %5133 = vst [vmem:[#allocation19_spill] sm:$0xff] %v3361_v58  ;;  %v5164_v58 = vmov 7  }
  0xa4   :  { %677 = vperm.xlu2 %2592, %v3279_v38   ;;  %v3330_v62 = vpop.permute.xlu2 %961  ;;  %2673 = vrcp.f32 %v267_v61  ;;  %v184_v63 = vpop.f32.mrf.mxu0 }
  0xa5   :  { %5126 = vst [vmem:[#allocation12_spill] sm:$0xff] %v3330_v62  ;;  %v185_v2 = vadd.f32 %v3301_v43, %v184_v63  ;;  %v5151_v62 = vmov 2  }
  0xa7   :  { %v221_v5 = vsub.f32 0.0, %v185_v2 }
  0xa8   :  { %2593 = vset.pattern.permute.xlu1 %v5057_v4  ;;  %v3334_v8 = vpop.permute.xlu1 %957 }
  0xa9   :  { %5127 = vst [vmem:[#allocation13_spill] sm:$0xff] %v3334_v8  ;;  %v2672_v9 = vpop.eup %2671  ;;  %v239_v12 = vmul.f32 1.442695, %v221_v5  ;;  %717 = vperm.xlu1 %2593, %v3222_v25  }
  0xaa   :  { %v2674_v14 = vpop.eup %2673  ;;  %v268_v17 = vadd.f32 1.0, %v2672_v9 }
  0xab   :  { %2675 = vpow2.f32 %v239_v12  ;;  %v299_v27 = vmul.f32 %v2674_v14, %v180_v47 }
  0xac   :  { %2594 = vset.pattern.permute.xlu2 %v5055_v3  ;;  %2677 = vrcp.f32 %v268_v17  ;;  %v186_v20 = vpop.f32.mrf.mxu0  ;;  %v5059_v3 = vmov 7  }
  0xad   :  { %799 = vperm.xlu2 %2594, %v3279_v38   ;;  %v3340_v23 = vpop.permute.xlu2 %1038  ;;  %v187_v30 = vadd.f32 %v3301_v43, %v186_v20  ;;  %v3345_v37 = vpack.c.bf16 %v299_v27, %v299_v27 }
  0xae   :  { %5128 = vst [vmem:[#allocation14_spill] sm:$0xff] %v3340_v23 }
  0xaf   :  { %v222_v34 = vsub.f32 0.0, %v187_v30  ;;  %5130 = vst [vmem:[#allocation16_spill] sm:$0xff] %v3345_v37  ;;  %v367_v54 = vunpack.c.l.b16 %v3345_v37 }
  0xb1   :  { %v2676_v35 = vpop.eup %2675  ;;  %v241_v40 = vmul.f32 1.442695, %v222_v34  ;;  %2596 = vset.pattern.permute.xlu1 %v5053_v13  ;;  %v3348_v42 = vpop.permute.xlu1 %702 }
  0xb2   :  { %5131 = vst [vmem:[#allocation17_spill] sm:$0xff] %v3348_v42  ;;  %v2678_v45 = vpop.eup %2677  ;;  %v269_v46 = vadd.f32 1.0, %v2676_v35  ;;  %941 = vperm.xlu1 %2596, %v3173_v18   ;;  %v3374_v35 = vpop.permute.xlu0 %672 }
  0xb3   :  { %v300_v47 = vmul.f32 %v2678_v45, %v182_v55  ;;  %2679 = vpow2.f32 %v241_v40 }
  0xb4   :  { %2681 = vrcp.f32 %v269_v46  ;;  %v189_v48 = vpop.f32.mrf.mxu0 }
  0xb5   :  { %2597 = vset.pattern.permute.xlu2 %v5053_v13  ;;  %v3354_v49 = vpack.c.bf16 %v300_v47, %v300_v47  ;;  %v190_v52 = vadd.f32 %v3301_v43, %v189_v48 }
  0xb6   :  { %973 = vperm.xlu2 %2597, %v3244_v29   ;;  %v3359_v56 = vpop.permute.xlu2 %667 }
  0xb7   :  { %5132 = vst [vmem:[#allocation18_spill] sm:$0xff] %v3354_v49  ;;  %v223_v55 = vsub.f32 0.0, %v190_v52  ;;  %v368_v59 = vunpack.c.l.b16 %v3354_v49 }
  0xb9   :  { %v2680_v61 = vpop.eup %2679  ;;  %v243_v63 = vmul.f32 1.442695, %v223_v55  ;;  %v383_v5 = vpack.c.b16 %v368_v59, %v367_v54 }
  0xba   :  { %v2682_v9 = vpop.eup %2681  ;;  %v270_v12 = vadd.f32 1.0, %v2680_v61  ;;  %2598 = vset.pattern.permute.xlu1 %v5051_v19  ;;  %v3365_v14 = vpop.permute.xlu1 %929 }
  0xbb   :  { %2683 = vpow2.f32 %v243_v63  ;;  %1050 = vperm.xlu1 %2598, %v3195_v21   ;;  %455 = vmatmul.bf16.vlgmr.msra.gmra.mxu1 %v383_v5  ;;  %v301_v20 = vmul.f32 %v2682_v9, %v185_v2 }
  0xbc   :  { %2685 = vrcp.f32 %v270_v12  ;;  %v191_v17 = vpop.f32.mrf.mxu0 }
  0xbd   :  { %v192_v27 = vadd.f32 %v3301_v43, %v191_v17  ;;  %v3376_v46 = vpack.c.bf16 %v301_v20, %v301_v20 }
  0xbe   :  { %2599 = vset.pattern.permute.xlu2 %v5051_v19 }
  0xbf   :  { %1082 = vperm.xlu2 %2599, %v3204_v22   ;;  %v3372_v34 = vpop.permute.xlu2 %791  ;;  %v224_v40 = vsub.f32 0.0, %v192_v27  ;;  %5134 = vst [vmem:[#allocation20_spill] sm:$0xff] %v3376_v46  ;;  %v369_v5 = vunpack.c.l.b16 %v3376_v46 }
  0xc1   :  { %v2684_v45 = vpop.eup %2683  ;;  %v245_v47 = vmul.f32 1.442695, %v224_v40 }
  0xc2   :  { %v2686_v48 = vpop.eup %2685  ;;  %v271_v54 = vadd.f32 1.0, %v2684_v45 }
  0xc3   :  { %v302_v55 = vmul.f32 %v2686_v48, %v187_v30  ;;  %2687 = vpow2.f32 %v245_v47  ;;  %2600 = vset.pattern.permute.xlu1 %v5047_v51  ;;  %v3379_v2 = vpop.permute.xlu1 %1034  ;;  %v3388_v30 = vpop.permute.xlu0 %807 }
  0xc4   :  { %5135 = vst [vmem:[#allocation21_spill] sm:$0xff] %v3379_v2  ;;  %2689 = vrcp.f32 %v271_v54  ;;  %1220 = vperm.xlu1 %2600, %v3132_v11   ;;  %v194_v59 = vpop.f32.mrf.mxu0 }
  0xc5   :  { %v3383_v61 = vpack.c.bf16 %v302_v55, %v302_v55  ;;  %v195_v63 = vadd.f32 %v3301_v43, %v194_v59  ;;  %v3399_v55 = vld [vmem:[%s5116_s29 + $0x78] sm:$0xff] }
  0xc6   :  { %1240 = vperm.xlu0 %2631, %v3399_v55  }
  0xc7   :  { %5136 = vst [vmem:[#allocation22_spill] sm:$0xff] %v3383_v61  ;;  %2601 = vset.pattern.permute.xlu2 %v5049_v60  ;;  %v225_v9 = vsub.f32 0.0, %v195_v63  ;;  %v370_v12 = vunpack.c.l.b16 %v3383_v61 }
  0xc8   :  { %1293 = vperm.xlu2 %2601, %v3086_v1   ;;  %v3392_v17 = vpop.permute.xlu2 %965 }
  0xc9   :  { %5137 = vst [vmem:[#allocation23_spill] sm:$0xff] %v3392_v17  ;;  %v2688_v20 = vpop.eup %2687  ;;  %v247_v40 = vmul.f32 1.442695, %v225_v9  ;;  %v384_v45 = vpack.c.b16 %v370_v12, %v369_v5 }
  0xca   :  { %v2690_v47 = vpop.eup %2689  ;;  %v272_v48 = vadd.f32 1.0, %v2688_v20 }
  0xcb   :  { %2691 = vpow2.f32 %v247_v40  ;;  %v3394_v54 = vpop.permute.xlu1 %1070  ;;  %460 = vmatmul.bf16.gmra.mxu1 %v384_v45  ;;  %v303_v51 = vmul.f32 %v2690_v47, %v190_v52  ;;  %v3405_v9 = vpop.permute.xlu0 %815  ;;  %v3415_v52 = vld [vmem:[%s5116_s29 + $0x38] sm:$0xff] }
  0xcc   :  { %5138 = vst [vmem:[#allocation24_spill] sm:$0xff] %v3394_v54  ;;  %2693 = vrcp.f32 %v272_v48  ;;  %2602 = vset.pattern.permute.xlu1 %v5049_v60  ;;  %v196_v59 = vpop.f32.mrf.mxu0 }
  0xcd   :  { %v197_v5 = vadd.f32 %v3301_v43, %v196_v59  ;;  %1297 = vperm.xlu1 %2602, %v3108_v7   ;;  %5139 = vst [vmem:[#allocation25_spill] sm:$0xff] %v3405_v9  ;;  %v3410_v45 = vpack.c.bf16 %v303_v51, %v303_v51 }
  0xce   :  { %2644 = vset.pattern.permute.xlu0 %v5059_v3 }
  0xcf   :  { %v226_v12 = vsub.f32 0.0, %v197_v5  ;;  %5141 = vst [vmem:[#allocation27_spill] sm:$0xff] %v3410_v45  ;;  %1438 = vperm.xlu0 %2644, %v3081_v0  }
  0xd0   :  { %1325 = vperm.xlu2 %2601, %v3081_v0  }
  0xd1   :  { %v3408_v20 = vpop.permute.xlu2 %1074  ;;  %v2692_v40 = vpop.eup %2691  ;;  %v249_v48 = vmul.f32 1.442695, %v226_v12  ;;  %v5144_v12 = vmov 0  }
  0xd2   :  { %5140 = vst [vmem:[#allocation26_spill] sm:$0xff] %v3408_v20  ;;  %v2694_v60 = vpop.eup %2693  ;;  %v273_v19 = vadd.f32 1.0, %v2692_v40 }
  0xd3   :  { %v304_v13 = vmul.f32 %v2694_v60, %v192_v27  ;;  %2695 = vpow2.f32 %v249_v48  ;;  %v371_v60 = vunpack.c.l.b16 %v3410_v45  ;;  %v3427_v27 = vpop.permute.xlu0 %819 }
  0xd4   :  { %2697 = vrcp.f32 %v273_v19  ;;  %v3417_v47 = vpop.permute.xlu1 %707  ;;  %v199_v59 = vpop.f32.mrf.mxu0  ;;  %5145 = vst [vmem:[#allocation30_spill] sm:$0xff] %v3427_v27 }
  0xd5   :  { %5142 = vst [vmem:[#allocation28_spill] sm:$0xff] %v3417_v47  ;;  %v3420_v4 = vpack.c.bf16 %v304_v13, %v304_v13  ;;  %v200_v51 = vadd.f32 %v3301_v43, %v199_v59  ;;  %2603 = vset.pattern.permute.xlu1 %v5144_v12 }
  0xd6   :  { %682 = vperm.xlu1 %2603, %v3415_v52  }
  0xd7   :  { %5143 = vst [vmem:[#allocation29_spill] sm:$0xff] %v3420_v4  ;;  %v227_v19 = vsub.f32 0.0, %v200_v51  ;;  %v372_v40 = vunpack.c.l.b16 %v3420_v4  ;;  %1414 = vperm.xlu0 %2644, %v3123_v10  }
  0xd8   :  { %2604 = vset.pattern.permute.xlu2 %v5144_v12  ;;  %v5146_v12 = vmov 1  }
  0xd9   :  { %722 = vperm.xlu2 %2604, %v3399_v55   ;;  %v2696_v13 = vpop.eup %2695  ;;  %v251_v48 = vmul.f32 1.442695, %v227_v19  ;;  %v385_v59 = vpack.c.b16 %v372_v40, %v371_v60 }
  0xda   :  { %v3432_v3 = vpop.permute.xlu2 %795  ;;  %v2698_v61 = vpop.eup %2697  ;;  %v274_v45 = vadd.f32 1.0, %v2696_v13 }
  0xdb   :  { %2699 = vpow2.f32 %v251_v48  ;;  %465 = vmatmul.bf16.gmra.mxu1 %v385_v59  ;;  %v305_v46 = vmul.f32 %v2698_v61, %v195_v63  ;;  %v3439_v4 = vpop.permute.xlu0 %823 }
  0xdc   :  { %2701 = vrcp.f32 %v274_v45  ;;  %v201_v0 = vpop.f32.mrf.mxu0  ;;  %5147 = vst [vmem:[#allocation31_spill] sm:$0xff] %v3439_v4 }
  0xdd   :  { %v202_v49 = vadd.f32 %v3301_v43, %v201_v0  ;;  %v3435_v37 = vpop.permute.xlu1 %933  ;;  %v3443_v40 = vpack.c.bf16 %v305_v46, %v305_v46 }
  0xde   :  { %2605 = vset.pattern.permute.xlu1 %v5146_v12 }
  0xdf   :  { %v228_v60 = vsub.f32 0.0, %v202_v49  ;;  %803 = vperm.xlu1 %2605, %v3415_v52   ;;  %5148 = vst [vmem:[#allocation32_spill] sm:$0xff] %v3443_v40  ;;  %1422 = vperm.xlu0 %2644, %v3195_v21  }
  0xe1   :  { %2606 = vset.pattern.permute.xlu2 %v5146_v12  ;;  %v2700_v19 = vpop.eup %2699  ;;  %v253_v45 = vmul.f32 1.442695, %v228_v60  ;;  %v373_v12 = vunpack.c.l.b16 %v3443_v40 }
  0xe2   :  { %835 = vperm.xlu2 %2606, %v3399_v55   ;;  %v2702_v61 = vpop.eup %2701  ;;  %v275_v63 = vadd.f32 1.0, %v2700_v19 }
  0xe3   :  { %v3446_v13 = vpop.permute.xlu2 %937  ;;  %v306_v48 = vmul.f32 %v2702_v61, %v197_v5  ;;  %2703 = vpow2.f32 %v253_v45  ;;  %v3457_v60 = vpop.permute.xlu0 %831 }
  0xe4   :  { %2705 = vrcp.f32 %v275_v63  ;;  %v204_v59 = vpop.f32.mrf.mxu0  ;;  %5150 = vst [vmem:[#allocation34_spill] sm:$0xff] %v3457_v60  ;;  %v5152_v63 = vmov 3  }
  0xe5   :  { %v3448_v0 = vpack.c.bf16 %v306_v48, %v306_v48  ;;  %v3451_v20 = vadd.f32 %v3301_v43, %v204_v59 }
  0xe6   :  { %v3455_v46 = vpop.permute.xlu1 %1042 }
  0xe7   :  { %5149 = vst [vmem:[#allocation33_spill] sm:$0xff] %v3448_v0  ;;  %v229_v19 = vsub.f32 0.0, %v3451_v20  ;;  %2608 = vset.pattern.permute.xlu1 %v5151_v62  ;;  %v374_v5 = vunpack.c.l.b16 %v3448_v0  ;;  %1462 = vperm.xlu0 %2644, %v3222_v25  }
  0xe8   :  { %977 = vperm.xlu1 %2608, %v3222_v25  }
  0xe9   :  { %v2704_v45 = vpop.eup %2703  ;;  %v255_v61 = vmul.f32 1.442695, %v229_v19  ;;  %v386_v48 = vpack.c.b16 %v374_v5, %v373_v12 }
  0xea   :  { %2609 = vset.pattern.permute.xlu2 %v5152_v63  ;;  %v2706_v59 = vpop.eup %2705  ;;  %v276_v40 = vadd.f32 1.0, %v2704_v45 }
  0xeb   :  { %1054 = vperm.xlu2 %2609, %v3173_v18   ;;  %2707 = vpow2.f32 %v255_v61  ;;  %470 = vmatmul.bf16.gmra.mxu1 %v386_v48  ;;  %v307_v50 = vmul.f32 %v2706_v59, %v200_v51  ;;  %v3469_v23 = vpop.permute.xlu0 %953  ;;  %v5157_v51 = vmov 5  }
  0xec   :  { %v3465_v60 = vpop.permute.xlu2 %1078  ;;  %2709 = vrcp.f32 %v276_v40  ;;  %v206_v9 = vpop.f32.mrf.mxu0  ;;  %5154 = vst [vmem:[#allocation36_spill] sm:$0xff] %v3469_v23 }
  0xed   :  { %5153 = vst [vmem:[#allocation35_spill] sm:$0xff] %v3465_v60  ;;  %v207_v0 = vadd.f32 %v3301_v43, %v206_v9  ;;  %v3474_v5 = vpack.c.bf16 %v307_v50, %v307_v50 }
  0xef   :  { %v230_v19 = vsub.f32 0.0, %v207_v0  ;;  %v3471_v2 = vpop.permute.xlu1 %712  ;;  %5156 = vst [vmem:[#allocation38_spill] sm:$0xff] %v3474_v5  ;;  %2653 = vset.pattern.permute.xlu0 %v5069_v39 }
  0xf0   :  { %5155 = vst [vmem:[#allocation37_spill] sm:$0xff] %v3471_v2  ;;  %2610 = vset.pattern.permute.xlu1 %v5152_v63  ;;  %1555 = vperm.xlu0 %2653, %v3103_v6  }
  0xf1   :  { %v2708_v12 = vpop.eup %2707  ;;  %v257_v45 = vmul.f32 1.442695, %v230_v19  ;;  %1086 = vperm.xlu1 %2610, %v3244_v29   ;;  %v375_v19 = vunpack.c.l.b16 %v3474_v5 }
  0xf2   :  { %v2710_v40 = vpop.eup %2709  ;;  %v277_v61 = vadd.f32 1.0, %v2708_v12 }
  0xf3   :  { %2611 = vset.pattern.permute.xlu2 %v5157_v51  ;;  %v308_v9 = vmul.f32 %v2710_v40, %v202_v49  ;;  %2711 = vpow2.f32 %v257_v45  ;;  %v3487_v12 = vpop.permute.xlu0 %969 }
  0xf4   :  { %1192 = vperm.xlu2 %2611, %v3152_v15   ;;  %2713 = vrcp.f32 %v277_v61  ;;  %v209_v25 = vpop.f32.mrf.mxu0  ;;  %5160 = vst [vmem:[#allocation41_spill] sm:$0xff] %v3487_v12 }
  0xf5   :  { %v3479_v48 = vpop.permute.xlu2 %1184  ;;  %v3481_v59 = vpack.c.bf16 %v308_v9, %v308_v9  ;;  %v210_v50 = vadd.f32 %v3301_v43, %v209_v25  ;;  %v5162_v9 = vmov 6  }
  0xf6   :  { %5158 = vst [vmem:[#allocation39_spill] sm:$0xff] %v3479_v48 }
  0xf7   :  { %5159 = vst [vmem:[#allocation40_spill] sm:$0xff] %v3481_v59  ;;  %v231_v49 = vsub.f32 0.0, %v210_v50  ;;  %v376_v45 = vunpack.c.l.b16 %v3481_v59 }
  0xf8   :  { %v3490_v40 = vpop.permute.xlu1 %827  ;;  %1559 = vperm.xlu0 %2653, %v3132_v11  }
  0xf9   :  { %5161 = vst [vmem:[#allocation42_spill] sm:$0xff] %v3490_v40  ;;  %v2712_v61 = vpop.eup %2711  ;;  %v259_v48 = vmul.f32 1.442695, %v231_v49  ;;  %2612 = vset.pattern.permute.xlu1 %v5162_v9  ;;  %v387_v57 = vpack.c.b16 %v376_v45, %v375_v19  ;;  %v2937_v40 = vld [vmem:[%s5116_s29 + $0x10] sm:$0xff] }
  0xfa   :  { %v2714_v25 = vpop.eup %2713  ;;  %v278_v26 = vadd.f32 1.0, %v2712_v61  ;;  %1301 = vperm.xlu1 %2612, %v3123_v10  }
  0xfb   :  { %2715 = vpow2.f32 %v259_v48  ;;  %475 = vmatmul.bf16.gmra.mxu1 %v387_v57  ;;  %v309_v59 = vmul.f32 %v2714_v25, %v3451_v20  ;;  %v3501_v19 = vpop.permute.xlu0 %945 }
  0xfc   :  { %2613 = vset.pattern.permute.xlu2 %v5162_v9  ;;  %2717 = vrcp.f32 %v278_v26  ;;  %v211_v39 = vpop.f32.mrf.mxu0 }
  0xfd   :  { %1333 = vperm.xlu2 %2613, %v3132_v11   ;;  %v212_v5 = vadd.f32 %v3301_v43, %v211_v39  ;;  %v3503_v48 = vpack.c.bf16 %v309_v59, %v309_v59 }
  0xfe   :  { %v3498_v49 = vpop.permute.xlu2 %677 }
  0xff   :  { %v232_v45 = vsub.f32 0.0, %v212_v5  ;;  %5163 = vst [vmem:[#allocation43_spill] sm:$0xff] %v3503_v48 }
 0x100   :  { %1535 = vperm.xlu0 %2653, %v3195_v21  }
 0x101   :  { %v2716_v10 = vpop.eup %2715  ;;  %v261_v61 = vmul.f32 1.442695, %v232_v45  ;;  %v3505_v57 = vpop.permute.xlu1 %1046  ;;  %v377_v45 = vunpack.c.l.b16 %v3503_v48 }
 0x102   :  { %v2718_v26 = vpop.eup %2717  ;;  %v279_v24 = vadd.f32 1.0, %v2716_v10  ;;  %2614 = vset.pattern.permute.xlu1 %v5164_v58 }
 0x103   :  { %v310_v20 = vmul.f32 %v2718_v26, %v207_v0  ;;  %2719 = vpow2.f32 %v261_v61  ;;  %1406 = vperm.xlu1 %2614, %v3086_v1   ;;  %v3518_v0 = vpop.permute.xlu0 %1066 }
 0x104   :  { %2721 = vrcp.f32 %v279_v24  ;;  %v214_v39 = vpop.f32.mrf.mxu0  ;;  %5166 = vst [vmem:[#allocation45_spill] sm:$0xff] %v3518_v0 }
 0x105   :  { %2615 = vset.pattern.permute.xlu2 %v5164_v58  ;;  %v3510_v25 = vpack.c.bf16 %v310_v20, %v310_v20  ;;  %v215_v59 = vadd.f32 %v3301_v43, %v214_v39 }
 0x106   :  { %1410 = vperm.xlu2 %2615, %v3108_v7  }
 0x107   :  { %5165 = vst [vmem:[#allocation44_spill] sm:$0xff] %v3510_v25  ;;  %v3515_v32 = vpop.permute.xlu2 %799  ;;  %v233_v10 = vsub.f32 0.0, %v215_v59  ;;  %v378_v24 = vunpack.c.l.b16 %v3510_v25 }
 0x108   :  { %1543 = vperm.xlu0 %2653, %v3279_v38  }
 0x109   :  { %v2720_v61 = vpop.eup %2719  ;;  %v263_v26 = vmul.f32 1.442695, %v233_v10  ;;  %v388_v12 = vpack.c.b16 %v378_v24, %v377_v45 }
 0x10a   :  { %v2722_v20 = vpop.eup %2721  ;;  %v280_v4 = vadd.f32 1.0, %v2720_v61  ;;  %v3521_v47 = vpop.permute.xlu1 %1180 }
 0x10b   :  { %5167 = vst [vmem:[#allocation46_spill] sm:$0xff] %v3521_v47  ;;  %2723 = vpow2.f32 %v263_v26  ;;  %1442 = vperm.xlu1 %2614, %v3103_v6   ;;  %480 = vmatmul.bf16.gmra.mxu1 %v388_v12  ;;  %v311_v48 = vmul.f32 %v2722_v20, %v210_v50  ;;  %v3527_v25 = vpop.permute.xlu0 %1090 }
 0x10c   :  { %2725 = vrcp.f32 %v280_v4  ;;  %v216_v39 = vpop.f32.mrf.mxu0  ;;  %5168 = vst [vmem:[#allocation47_spill] sm:$0xff] %v3527_v25 }
 0x10d   :  { %v217_v54 = vadd.f32 %v3301_v43, %v216_v39  ;;  %v3532_v61 = vpack.c.bf16 %v311_v48, %v311_v48 }
 0x10e   :  { %2616 = vset.pattern.permute.xlu2 %v5151_v62 }
 0x10f   :  { %949 = vperm.xlu2 %2616, %v3415_v52   ;;  %v234_v45 = vsub.f32 0.0, %v217_v54  ;;  %5170 = vst [vmem:[#allocation49_spill] sm:$0xff] %v3532_v61  ;;  %v379_v20 = vunpack.c.l.b16 %v3532_v61 }
 0x110   :  { %v3530_v10 = vpop.permute.xlu2 %973 }
 0x111   :  { %5169 = vst [vmem:[#allocation48_spill] sm:$0xff] %v3530_v10  ;;  %v2724_v24 = vpop.eup %2723  ;;  %v265_v6 = vmul.f32 1.442695, %v234_v45 }
 0x112   :  { %v2726_v4 = vpop.eup %2725  ;;  %v281_v12 = vadd.f32 1.0, %v2724_v24  ;;  %v3534_v50 = vpop.permute.xlu1 %1216 }
 0x113   :  { %5171 = vst [vmem:[#allocation50_spill] sm:$0xff] %v3534_v50  ;;  %v312_v43 = vmul.f32 %v2726_v4, %v212_v5  ;;  %2727 = vpow2.f32 %v265_v6  ;;  %2617 = vset.pattern.permute.xlu1 %v5151_v62  ;;  %v3544_v39 = vpop.permute.xlu0 %1329 }
 0x114   :  { %2729 = vrcp.f32 %v281_v12  ;;  %981 = vperm.xlu1 %2617, %v3399_v55   ;;  %5173 = vst [vmem:[#allocation52_spill] sm:$0xff] %v3544_v39  ;;  %v626_v39 = vlaneseq }
 0x115   :  { %v3538_v26 = vpack.c.bf16 %v312_v43, %v312_v43 }
 0x117   :  { %5172 = vst [vmem:[#allocation51_spill] sm:$0xff] %v3538_v26  ;;  %2618 = vset.pattern.permute.xlu2 %v5152_v63  ;;  %v380_v48 = vunpack.c.l.b16 %v3538_v26 }
 0x118   :  { %1058 = vperm.xlu2 %2618, %v3279_v38  }
 0x119   :  { %v3546_v45 = vpop.permute.xlu2 %1082  ;;  %v2728_v5 = vpop.eup %2727  ;;  %v389_v24 = vpack.c.b16 %v380_v48, %v379_v20 }
 0x11a   :  { %5174 = vst [vmem:[#allocation53_spill] sm:$0xff] %v3546_v45  ;;  %v2730_v62 = vpop.eup %2729  ;;  %v282_v6 = vadd.f32 1.0, %v2728_v5 }
 0x11b   :  { %v3548_v4 = vpop.permute.xlu1 %717  ;;  %485 = vmatmul.bf16.gmra.mxu1 %v389_v24  ;;  %v313_v12 = vmul.f32 %v2730_v62, %v215_v59  ;;  %v3558_v20 = vpop.permute.xlu0 %1309 }
 0x11c   :  { %5175 = vst [vmem:[#allocation54_spill] sm:$0xff] %v3548_v4  ;;  %2731 = vrcp.f32 %v282_v6  ;;  %2620 = vset.pattern.permute.xlu1 %v5157_v51 }
 0x11d   :  { %1196 = vperm.xlu1 %2620, %v3195_v21   ;;  %v3554_v43 = vpack.c.bf16 %v313_v12, %v313_v12  ;;  %5178 = vst [vmem:[#allocation57_spill] sm:$0xff] %v3558_v20 }
 0x11f   :  { %5176 = vst [vmem:[#allocation55_spill] sm:$0xff] %v3554_v43  ;;  %v381_v21 = vunpack.c.l.b16 %v3554_v43 }
 0x120   :  { %2621 = vset.pattern.permute.xlu2 %v5157_v51 }
 0x121   :  { %1228 = vperm.xlu2 %2621, %v3204_v22  }
 0x122   :  { %v3556_v26 = vpop.permute.xlu2 %1293  ;;  %v2732_v48 = vpop.eup %2731 }
 0x123   :  { %5177 = vst [vmem:[#allocation56_spill] sm:$0xff] %v3556_v26  ;;  %v314_v5 = vmul.f32 %v2732_v48, %v217_v54  ;;  %v3572_v54 = vpop.permute.xlu0 %1212  ;;  %v5182_v48 = vmov 8  }
 0x124   :  { %v3560_v61 = vpop.permute.xlu1 %941  ;;  %5181 = vst [vmem:[#allocation60_spill] sm:$0xff] %v3572_v54 }
 0x125   :  { %v3562_v24 = vpack.c.bf16 %v314_v5, %v314_v5  ;;  %2622 = vset.pattern.permute.xlu1 %v5162_v9 }
 0x126   :  { %1305 = vperm.xlu1 %2622, %v3152_v15  }
 0x127   :  { %5179 = vst [vmem:[#allocation58_spill] sm:$0xff] %v3562_v24  ;;  %v382_v59 = vunpack.c.l.b16 %v3562_v24 }
 0x129   :  { %2623 = vset.pattern.permute.xlu2 %v5162_v9  ;;  %v390_v62 = vpack.c.b16 %v382_v59, %v381_v21 }
 0x12a   :  { %1337 = vperm.xlu2 %2623, %v3161_v16   ;;  %v3570_v6 = vpop.permute.xlu2 %1325  ;;  %v3585_v16 = vld [vmem:[%s5030_s5] ss:$0 sm:$0xff] }
 0x12b   :  { %5180 = vst [vmem:[#allocation59_spill] sm:$0xff] %v3570_v6  ;;  %490 = vmatmul.bf16.gmra.mxu1 %v390_v62  ;;  %v3587_v21 = vpop.permute.xlu0 %1188 }
 0x12d   :  { %v3574_v12 = vpop.permute.xlu1 %1050 }
 0x12e   :  { %2624 = vset.pattern.permute.xlu1 %v5164_v58 }
 0x12f   :  { %1446 = vperm.xlu1 %2624, %v3132_v11  }
 0x132   :  { %2625 = vset.pattern.permute.xlu2 %v5182_v48 }
 0x133   :  { %1519 = vperm.xlu2 %2625, %v3086_v1   ;;  %v3580_v5 = vpop.permute.xlu2 %722  ;;  %v2935_v1 = vld [vmem:[%s5116_s29 + $0x40] sm:$0xff] }
 0x134   :  { %5183 = vst [vmem:[#allocation61_spill] sm:$0xff] %v3580_v5 }
 0x136   :  { %v3589_v59 = vpop.permute.xlu1 %1220 }
 0x137   :  { %5184 = vst [vmem:[#allocation62_spill] sm:$0xff] %v3589_v59  ;;  %2626 = vset.pattern.permute.xlu1 %v5182_v48  ;;  %v3601_v59 = vpop.permute.xlu0 %1224 }
 0x138   :  { %1523 = vperm.xlu1 %2626, %v3108_v7   ;;  %v456_v11 = vpop.f32.mrf.mxu1  ;;  %5186 = vst [vmem:[#allocation64_spill] sm:$0xff] %v3601_v59 }
 0x139   :  { %v457_v62 = vadd.f32 %v3585_v16, %v456_v11 }
 0x13b   :  { %1551 = vperm.xlu2 %2625, %v2935_v1   ;;  %v496_v24 = vsub.f32 0.0, %v457_v62 }
 0x13c   :  { %v3597_v43 = vpop.permute.xlu2 %835 }
 0x13d   :  { %5185 = vst [vmem:[#allocation63_spill] sm:$0xff] %v3597_v43  ;;  %v512_v25 = vmul.f32 1.442695, %v496_v24 }
 0x13f   :  { %2733 = vpow2.f32 %v512_v25  ;;  %v3599_v4 = vpop.permute.xlu1 %1297 }
 0x140   :  { %2627 = vset.pattern.permute.xlu1 %v5152_v63  ;;  %v458_v7 = vpop.f32.mrf.mxu1 }
 0x141   :  { %v459_v26 = vadd.f32 %v3585_v16, %v458_v7  ;;  %1062 = vperm.xlu1 %2627, %v3415_v52   ;;  %v3614_v7 = vpop.permute.xlu0 %1240 }
 0x142   :  { %5187 = vst [vmem:[#allocation65_spill] sm:$0xff] %v3614_v7 }
 0x143   :  { %2628 = vset.pattern.permute.xlu2 %v5152_v63  ;;  %v497_v11 = vsub.f32 0.0, %v459_v26 }
 0x144   :  { %1094 = vperm.xlu2 %2628, %v3399_v55  }
 0x145   :  { %v3608_v1 = vpop.permute.xlu2 %1054  ;;  %v2734_v24 = vpop.eup %2733  ;;  %v514_v25 = vmul.f32 1.442695, %v497_v11 }
 0x146   :  { %v544_v47 = vadd.f32 1.0, %v2734_v24 }
 0x147   :  { %2735 = vpow2.f32 %v514_v25 }
 0x148   :  { %v3610_v45 = vpop.permute.xlu1 %682  ;;  %v461_v6 = vpop.f32.mrf.mxu1  ;;  %2737 = vrcp.f32 %v544_v47 }
 0x149   :  { %v462_v54 = vadd.f32 %v3585_v16, %v461_v6  ;;  %2629 = vset.pattern.permute.xlu1 %v5157_v51 }
 0x14a   :  { %1200 = vperm.xlu1 %2629, %v3173_v18  }
 0x14b   :  { %v498_v63 = vsub.f32 0.0, %v462_v54 }
 0x14c   :  { %2630 = vset.pattern.permute.xlu2 %v5157_v51 }
 0x14d   :  { %1232 = vperm.xlu2 %2630, %v3244_v29   ;;  %v2736_v55 = vpop.eup %2735  ;;  %v516_v11 = vmul.f32 1.442695, %v498_v63  ;;  %v3629_v29 = vpop.permute.xlu0 %1438  ;;  %v3632_v63 = vshrl.u32 %v626_v39, 7 }
 0x14e   :  { %v3619_v24 = vpop.permute.xlu2 %1192  ;;  %v545_v25 = vadd.f32 1.0, %v2736_v55  ;;  %v2738_v18 = vpop.eup %2737  ;;  %5188 = vst [vmem:[#allocation66_spill] sm:$0xff] %v3629_v29 }
 0x14f   :  { %2739 = vpow2.f32 %v516_v11  ;;  %v3634_v11 = vmul.f32 %v2738_v18, %v457_v62  ;;  %vm628_vm1 = vcmp.lt.s32.totalorder %v3632_v63, 1  ;;  %vm903_vm2 = vcmp.lt.s32.totalorder %v3632_v63, 7 }
 0x150   :  { %2741 = vrcp.f32 %v545_v25  ;;  %v463_v6 = vpop.f32.mrf.mxu1 }
 0x151   :  { %v3622_v50 = vadd.f32 %v3585_v16, %v463_v6  ;;  %v3624_v7 = vpop.permute.xlu1 %803  ;;  %5189 = vst [vmem:[#allocation67_spill] sm:$0xff] %v3634_v11  ;;  %v5079_v59 = vrot.slane %v3634_v11, 7 }
 0x152   :  { %2632 = vset.pattern.permute.xlu1 %v5162_v9 }
 0x153   :  { %v499_v47 = vsub.f32 0.0, %v3622_v50  ;;  %1341 = vperm.xlu1 %2632, %v3204_v22  }
 0x155   :  { %2633 = vset.pattern.permute.xlu2 %v5164_v58  ;;  %v2740_v55 = vpop.eup %2739  ;;  %v518_v25 = vmul.f32 1.442695, %v499_v47 }
 0x156   :  { %1418 = vperm.xlu2 %2633, %v3152_v15   ;;  %v2742_v6 = vpop.eup %2741  ;;  %v546_v43 = vadd.f32 1.0, %v2740_v55  ;;  %v3650_v15 = vld [vmem:[%s5031_s6] sm:$0xff] }
 0x157   :  { %v3637_v5 = vpop.permute.xlu2 %1333  ;;  %v3640_v10 = vmul.f32 %v2742_v6, %v459_v26  ;;  %2743 = vpow2.f32 %v518_v25  ;;  %v3655_v26 = vperm.slane %v3650_v15, 0  ;;  %v3670_v25 = vld [vmem:[%s5116_s29 + $0x58] sm:$0xff]  ;;  %v3674_v6 = vperm.slane %v3650_v15, 1 }
 0x158   :  { %5190 = vst [vmem:[#allocation68_spill] sm:$0xff] %v3637_v5  ;;  %2745 = vrcp.f32 %v546_v43  ;;  %v466_v22 = vpop.f32.mrf.mxu1  ;;  %v3679_v5 = vpop.permute.xlu0 %1414 }
 0x159   :  { %5191 = vst [vmem:[#allocation69_spill] sm:$0xff] %v3640_v10  ;;  %v611_v39 = vrot.slane %v3640_v10, 7  ;;  %v3645_v62 = vadd.f32 %v3585_v16, %v466_v22  ;;  %v840_v43 = vmul.f32 %v3258_v33, %v3640_v10  ;;  %v5082_v17 = vrot.slane %v3640_v10, 1 }
 0x15a   :  { %v3652_v18 = vpop.permute.xlu1 %977 }
 0x15b   :  { %5192 = vst [vmem:[#allocation70_spill] sm:$0xff] %v3652_v18  ;;  %v500_v47 = vsub.f32 0.0, %v3645_v62  ;;  %2634 = vset.pattern.permute.xlu1 %v5164_v58  ;;  %v3665_v55 = vsel %vm628_vm1, %v5079_v59, %v611_v39  ;;  %v857_v8 = vmul.f32 %v3674_v6, %v840_v43 }
 0x15c   :  { %5193 = vst [vmem:[#allocation71_spill] sm:$0xff] %v3665_v55  ;;  %1450 = vperm.xlu1 %2634, %v3670_v25   ;;  %v727_v33 = vmul.f32 %v3236_v28, %v3665_v55 }
 0x15d   :  { %v2744_v22 = vpop.eup %2743  ;;  %v520_v18 = vmul.f32 1.442695, %v500_v47 }
 0x15e   :  { %2635 = vset.pattern.permute.xlu2 %v5182_v48  ;;  %v2746_v59 = vpop.eup %2745  ;;  %v547_v29 = vadd.f32 1.0, %v2744_v22  ;;  %v744_v60 = vmul.f32 %v3655_v26, %v727_v33 }
 0x15f   :  { %1527 = vperm.xlu2 %2635, %v2937_v40   ;;  %v578_v2 = vmul.f32 %v2746_v59, %v462_v54  ;;  %2747 = vpow2.f32 %v520_v18  ;;  %v3694_v40 = vperm.slane %v3650_v15, 2  ;;  %v3697_v54 = vperm.slane %v3650_v15, 4 }
 0x160   :  { %v1411_v28 = vpop.permute.xlu2 %1410  ;;  %2749 = vrcp.f32 %v547_v29  ;;  %v468_v47 = vpop.f32.mrf.mxu1  ;;  %v873_v55 = vadd.f32 %v857_v8, %v744_v60 }
 0x161   :  { %v3688_v27 = vadd.f32 %v3585_v16, %v468_v47  ;;  %v3690_v22 = vmul.f32 %v1411_v28, %v578_v2  ;;  %v612_v36 = vrot.slane %v578_v2, 7  ;;  %v889_v42 = vrot.slane %v578_v2, 1 }
 0x162   :  { %v841_v18 = vmul.f32 %v3320_v53, %v578_v2  ;;  %v3722_v53 = vperm.slane %v3650_v15, 3 }
 0x163   :  { %5194 = vst [vmem:[#allocation72_spill] sm:$0xff] %v3690_v22  ;;  %v501_v59 = vsub.f32 0.0, %v3688_v27  ;;  %v3700_v8 = vpop.permute.xlu1 %1086  ;;  %v642_v60 = vsel %vm628_vm1, %v611_v39, %v612_v36  ;;  %v3708_v29 = vsel %vm903_vm2, %v5082_v17, %v889_v42 }
 0x164   :  { %5195 = vst [vmem:[#allocation73_spill] sm:$0xff] %v3700_v8  ;;  %2636 = vset.pattern.permute.xlu1 %v5157_v51  ;;  %v728_v43 = vmul.f32 %v3303_v44, %v642_v60  ;;  %v1099_v33 = vmul.f32 %v3455_v46, %v642_v60  ;;  %v3715_v28 = vmul.f32 %v3599_v4, %v642_v60 }
 0x165   :  { %5196 = vst [vmem:[#allocation74_spill] sm:$0xff] %v3708_v29  ;;  %v986_v39 = vmul.f32 %v3365_v14, %v3708_v29  ;;  %v2748_v47 = vpop.eup %2747  ;;  %v522_v22 = vmul.f32 1.442695, %v501_v59  ;;  %1204 = vperm.xlu1 %2636, %v3279_v38   ;;  %v3731_v14 = vld [vmem:[%s5116_s29 + $0x70] sm:$0xff]  ;;  %v3734_v38 = vpop.permute.xlu0 %1422  ;;  %v1149_v59 = vmul.f32 %v3697_v54, %v578_v2 }
 0x166   :  { %5197 = vst [vmem:[#allocation75_spill] sm:$0xff] %v3715_v28  ;;  %v2750_v17 = vpop.eup %2749  ;;  %v548_v8 = vadd.f32 1.0, %v2748_v47  ;;  %v745_v4 = vmul.f32 %v3655_v26, %v728_v43 }
 0x167   :  { %2637 = vset.pattern.permute.xlu2 %v5157_v51  ;;  %v1003_v44 = vmul.f32 %v3694_v40, %v986_v39  ;;  %v3726_v46 = vmul.f32 %v2750_v17, %v3622_v50  ;;  %2751 = vpow2.f32 %v522_v22  ;;  %5198 = vst [vmem:[#allocation76_spill] sm:$0xff] %v3734_v38  ;;  %v1116_v50 = vmul.f32 %v3722_v53, %v1099_v33 }
 0x168   :  { %1236 = vperm.xlu2 %2637, %v3731_v14   ;;  %2753 = vrcp.f32 %v548_v8  ;;  %v471_v60 = vpop.f32.mrf.mxu1  ;;  %v858_v22 = vmul.f32 %v3674_v6, %v841_v18 }
 0x169   :  { %v3738_v39 = vpop.permute.xlu2 %949  ;;  %v1019_v17 = vadd.f32 %v1003_v44, %v873_v55  ;;  %v3743_v47 = vadd.f32 %v3585_v16, %v471_v60  ;;  %v613_v28 = vrot.slane %v3726_v46, 7  ;;  %v842_v41 = vmul.f32 %v3372_v34, %v3726_v46 }
 0x16a   :  { %v874_v0 = vadd.f32 %v858_v22, %v745_v4  ;;  %v890_v2 = vrot.slane %v3726_v46, 1  ;;  %v3751_v55 = vperm.slane %v3650_v15, 6  ;;  %v3757_v60 = vperm.slane %v3650_v15, 5 }
 0x16b   :  { %v1132_v43 = vadd.f32 %v1116_v50, %v1019_v17  ;;  %v502_v8 = vsub.f32 0.0, %v3743_v47  ;;  %v641_v18 = vsel %vm628_vm1, %v612_v36, %v613_v28  ;;  %v859_v29 = vmul.f32 %v3674_v6, %v842_v41 }
 0x16c   :  { %v1302_v33 = vpop.permute.xlu1 %1301  ;;  %v729_v44 = vmul.f32 %v3359_v56, %v641_v18  ;;  %v3761_v34 = vsel %vm903_vm2, %v889_v42, %v890_v2  ;;  %v1100_v42 = vmul.f32 %v3505_v57, %v641_v18 }
 0x16d   :  { %5199 = vst [vmem:[#allocation77_spill] sm:$0xff] %v3761_v34  ;;  %v1165_v4 = vadd.f32 %v1149_v59, %v1132_v43  ;;  %v2752_v17 = vpop.eup %2751  ;;  %v524_v50 = vmul.f32 1.442695, %v502_v8  ;;  %v1358_v22 = vmul.f32 %v1302_v33, %v641_v18  ;;  %2638 = vset.pattern.permute.xlu1 %v5162_v9  ;;  %v987_v23 = vmul.f32 %v3435_v37, %v3761_v34  ;;  %v3774_v59 = vld [vmem:[%s5116_s29 + $0x28] sm:$0xff] }
 0x16e   :  { %v1245_v36 = vmul.f32 %v3587_v21, %v3761_v34  ;;  %v2754_v56 = vpop.eup %2753  ;;  %v549_v38 = vadd.f32 1.0, %v2752_v17  ;;  %v746_v20 = vmul.f32 %v3655_v26, %v729_v44  ;;  %1313 = vperm.xlu1 %2638, %v3774_v59   ;;  %v3781_v21 = vperm.slane %v3650_v15, 7  ;;  %v3790_v8 = vld [vmem:[%s5116_s29 + $0x68] sm:$0xff] }
 0x16f   :  { %v3778_v37 = vmul.f32 %v2754_v56, %v3645_v62  ;;  %2755 = vpow2.f32 %v524_v50  ;;  %v1004_v41 = vmul.f32 %v3694_v40, %v987_v23  ;;  %v1471_v43 = vmul.f32 %v3679_v5, %v3726_v46  ;;  %5200 = vst [vmem:[#allocation78_spill] sm:$0xff] %v3790_v8 }
 0x170   :  { %2639 = vset.pattern.permute.xlu2 %v5162_v9  ;;  %2757 = vrcp.f32 %v549_v38  ;;  %v875_v57 = vadd.f32 %v859_v29, %v746_v20  ;;  %v473_v62 = vpop.f32.mrf.mxu1  ;;  %v1262_v15 = vmul.f32 %v3757_v60, %v1245_v36  ;;  %v1375_v18 = vmul.f32 %v3751_v55, %v1358_v22  ;;  %v3800_v20 = vpop.permute.xlu0 %1462 }
 0x171   :  { %1345 = vperm.xlu2 %2639, %v3790_v8   ;;  %v3796_v33 = vadd.f32 %v3585_v16, %v473_v62  ;;  %5201 = vst [vmem:[#allocation79_spill] sm:$0xff] %v3800_v20  ;;  %v891_v5 = vrot.slane %v3778_v37, 1  ;;  %v614_v29 = vrot.slane %v3778_v37, 7  ;;  %v1117_v38 = vmul.f32 %v3722_v53, %v1100_v42 }
 0x172   :  { %v3798_v23 = vpop.permute.xlu2 %1058  ;;  %v843_v44 = vmul.f32 %v3432_v3, %v3778_v37  ;;  %v1020_v17 = vadd.f32 %v1004_v41, %v874_v0  ;;  %v1278_v50 = vadd.f32 %v1262_v15, %v1165_v4  ;;  %v1150_v62 = vmul.f32 %v3697_v54, %v3726_v46 }
 0x173   :  { %v503_v22 = vsub.f32 0.0, %v3796_v33  ;;  %v3810_v36 = vsel %vm628_vm1, %v613_v28, %v614_v29  ;;  %v3814_v56 = vsel %vm903_vm2, %v890_v2, %v891_v5  ;;  %v1488_v28 = vmul.f32 %v3781_v21, %v1471_v43 }
 0x174   :  { %v730_v42 = vmul.f32 %v3374_v35, %v3810_v36  ;;  %v1101_v3 = vmul.f32 %v3574_v12, %v3810_v36  ;;  %v1133_v0 = vadd.f32 %v1117_v38, %v1020_v17  ;;  %v988_v4 = vmul.f32 %v3446_v13, %v3814_v56 }
 0x175   :  { %v2756_v41 = vpop.eup %2755  ;;  %v526_v15 = vmul.f32 1.442695, %v503_v22  ;;  %v1407_v20 = vpop.permute.xlu1 %1406  ;;  %v1246_v2 = vmul.f32 %v3619_v24, %v3814_v56  ;;  %v1391_v34 = vadd.f32 %v1375_v18, %v1278_v50  ;;  %v860_v13 = vmul.f32 %v3674_v6, %v843_v44  ;;  %v3839_v24 = vld [vmem:[%s5116_s29 + $0x60] sm:$0xff] }
 0x176   :  { %v2758_v46 = vpop.eup %2757  ;;  %v550_v8 = vadd.f32 1.0, %v2756_v41  ;;  %v3828_v35 = vmul.f32 %v1407_v20, %v3640_v10  ;;  %2640 = vset.pattern.permute.xlu1 %v5164_v58  ;;  %v747_v12 = vmul.f32 %v3655_v26, %v730_v42  ;;  %v1005_v43 = vmul.f32 %v3694_v40, %v988_v4 }
 0x177   :  { %v3834_v38 = vmul.f32 %v2758_v46, %v3688_v27  ;;  %2759 = vpow2.f32 %v526_v15  ;;  %1454 = vperm.xlu1 %2640, %v3839_v24   ;;  %v1166_v18 = vadd.f32 %v1150_v62, %v1133_v0  ;;  %v1151_v27 = vmul.f32 %v3697_v54, %v3778_v37 }
 0x178   :  { %5202 = vst [vmem:[#allocation80_spill] sm:$0xff] %v3828_v35  ;;  %2761 = vrcp.f32 %v550_v8  ;;  %v476_v20 = vpop.f32.mrf.mxu1  ;;  %v876_v17 = vadd.f32 %v860_v13, %v747_v12  ;;  %v1263_v44 = vmul.f32 %v3757_v60, %v1246_v2  ;;  %v2942_v8 = vld [vmem:[%s5116_s29 + $0x18] sm:$0xff]  ;;  %v1118_v62 = vmul.f32 %v3722_v53, %v1101_v3  ;;  %v3865_v46 = vpop.permute.xlu0 %1555 }
 0x179   :  { %2641 = vset.pattern.permute.xlu2 %v5182_v48  ;;  %v844_v50 = vmul.f32 %v3515_v32, %v3834_v38  ;;  %v615_v22 = vrot.slane %v3834_v38, 7  ;;  %v3851_v42 = vadd.f32 %v3585_v16, %v476_v20  ;;  %v892_v4 = vrot.slane %v3834_v38, 1  ;;  %5204 = vst [vmem:[#allocation82_spill] sm:$0xff] %v3865_v46 }
 0x17a   :  { %1531 = vperm.xlu2 %2641, %v2942_v8   ;;  %v1021_v41 = vadd.f32 %v1005_v43, %v875_v57  ;;  %v3860_v15 = vadd.f32 %v1263_v44, %v1166_v18  ;;  %v3862_v32 = vadd.f32 %v1488_v28, %v1391_v34  ;;  %v5088_v43 = vrot.slane %v3634_v11, 1 }
 0x17b   :  { %v3857_v0 = vpop.permute.xlu2 %1228  ;;  %v504_v2 = vsub.f32 0.0, %v3851_v42  ;;  %v3869_v12 = vsel %vm628_vm1, %v614_v29, %v615_v22  ;;  %v3873_v3 = vsel %vm903_vm2, %v891_v5, %v892_v4 }
 0x17c   :  { %5203 = vst [vmem:[#allocation81_spill] sm:$0xff] %v3857_v0  ;;  %v731_v13 = vmul.f32 %v3498_v49, %v3869_v12  ;;  %v1134_v57 = vadd.f32 %v1118_v62, %v1021_v41  ;;  %v989_v20 = vmul.f32 %v3560_v61, %v3873_v3  ;;  %v1102_v29 = vmul.f32 %v3608_v1, %v3869_v12 }
 0x17d   :  { %v2760_v34 = vpop.eup %2759  ;;  %v528_v28 = vmul.f32 1.442695, %v504_v2  ;;  %v3878_v18 = vpop.permute.xlu1 %1442  ;;  %v861_v49 = vmul.f32 %v3674_v6, %v844_v50 }
 0x17e   :  { %v2762_v44 = vpop.eup %2761  ;;  %v551_v8 = vadd.f32 1.0, %v2760_v34  ;;  %v3884_v5 = vadd.f32 %v1151_v27, %v1134_v57  ;;  %v748_v46 = vmul.f32 %v3655_v26, %v731_v13  ;;  %v1006_v41 = vmul.f32 %v3694_v40, %v989_v20 }
 0x17f   :  { %v3889_v62 = vmul.f32 %v2762_v44, %v3743_v47  ;;  %2763 = vpow2.f32 %v528_v28  ;;  %2642 = vset.pattern.permute.xlu1 %v5182_v48  ;;  %v5206_v27 = vrot.slane %v3640_v10, 1  ;;  %v1119_v28 = vmul.f32 %v3722_v53, %v1102_v29 }
 0x180   :  { %2765 = vrcp.f32 %v551_v8  ;;  %1563 = vperm.xlu1 %2642, %v3670_v25   ;;  %v478_v61 = vpop.f32.mrf.mxu1  ;;  %v877_v1 = vadd.f32 %v861_v49, %v748_v46  ;;  %v1022_v25 = vadd.f32 %v1006_v41, %v876_v17  ;;  %v3928_v44 = vpop.permute.xlu0 %1559 }
 0x181   :  { %5205 = vst [vmem:[#allocation83_spill] sm:$0xff] %v3889_v62  ;;  %v3900_v50 = vsel %vm903_vm2, %v5088_v43, %v5206_v27  ;;  %v616_v47 = vrot.slane %v3889_v62, 7  ;;  %v845_v2 = vmul.f32 %v3624_v7, %v3889_v62  ;;  %v893_v13 = vrot.slane %v3889_v62, 1 }
 0x182   :  { %5207 = vst [vmem:[#allocation84_spill] sm:$0xff] %v3900_v50  ;;  %2643 = vset.pattern.permute.xlu2 %v5157_v51  ;;  %v1152_v51 = vmul.f32 %v3697_v54, %v3834_v38 }
 0x183   :  { %1208 = vperm.xlu2 %2643, %v3415_v52   ;;  %v3910_v46 = vsel %vm628_vm1, %v615_v22, %v616_v47  ;;  %v3916_v34 = vsel %vm903_vm2, %v892_v4, %v893_v13  ;;  %v862_v20 = vmul.f32 %v3674_v6, %v845_v2  ;;  %5209 = vst [vmem:[#allocation86_spill] sm:$0xff] %v3928_v44 }
 0x184   :  { %5208 = vst [vmem:[#allocation85_spill] sm:$0xff] %v3910_v46  ;;  %v3912_v57 = vpop.permute.xlu2 %1337  ;;  %v732_v7 = vmul.f32 %v3610_v45, %v3910_v46  ;;  %v1103_v52 = vmul.f32 %v3798_v23, %v3910_v46  ;;  %v990_v17 = vmul.f32 %v3501_v19, %v3916_v34  ;;  %v1135_v4 = vadd.f32 %v1119_v28, %v1022_v25 }
 0x185   :  { %v2764_v22 = vpop.eup %2763  ;;  %v1153_v28 = vmul.f32 %v3697_v54, %v3889_v62 }
 0x186   :  { %v2766_v8 = vpop.eup %2765  ;;  %v749_v29 = vmul.f32 %v3655_v26, %v732_v7  ;;  %v1120_v49 = vmul.f32 %v3722_v53, %v1103_v52  ;;  %v552_v41 = vadd.f32 1.0, %v2764_v22  ;;  %v3932_v27 = vpop.permute.xlu1 %981  ;;  %v1007_v45 = vmul.f32 %v3694_v40, %v990_v17  ;;  %v3946_v7 = vld [vmem:[%s5116_s29 + $0x30] sm:$0xff] }
 0x187   :  { %v3936_v23 = vmul.f32 %v2766_v8, %v3796_v33  ;;  %v3938_v19 = vadd.f32 %v1152_v51, %v1135_v4 }
 0x188   :  { %v878_v43 = vadd.f32 %v862_v20, %v749_v29  ;;  %2767 = vrcp.f32 %v552_v41  ;;  %2645 = vset.pattern.permute.xlu1 %v5162_v9  ;;  %v481_v2 = vpop.f32.mrf.mxu1  ;;  %v1023_v25 = vadd.f32 %v1007_v45, %v877_v1  ;;  %v5214_v45 = vld [vmem:[#allocation57_spill] sm:$0xff]  ;;  %v1536_v62 = vpop.permute.xlu0 %1535 }
 0x189   :  { %5210 = vst [vmem:[#allocation87_spill] sm:$0xff] %v3936_v23  ;;  %1317 = vperm.xlu1 %2645, %v3946_v7   ;;  %v894_v33 = vrot.slane %v3936_v23, 1  ;;  %v617_v51 = vrot.slane %v3936_v23, 7  ;;  %v846_v52 = vmul.f32 %v3388_v30, %v3936_v23  ;;  %v3964_v20 = vadd.f32 %v3585_v16, %v481_v2 }
 0x18a   :  { %v1136_v1 = vadd.f32 %v1120_v49, %v1023_v25  ;;  %v3973_v49 = vadd.f32 %v3585_v16, %v478_v61  ;;  %v1360_v2 = vmul.f32 %v5214_v45, %v3869_v12 }
 0x18b   :  { %2646 = vset.pattern.permute.xlu2 %v5162_v9  ;;  %v3957_v17 = vsel %vm628_vm1, %v616_v47, %v617_v51  ;;  %v3961_v22 = vsel %vm903_vm2, %v893_v13, %v894_v33  ;;  %v5212_v47 = vld [vmem:[#allocation74_spill] sm:$0xff]  ;;  %v863_v44 = vmul.f32 %v3674_v6, %v846_v52 }
 0x18c   :  { %1349 = vperm.xlu2 %2646, %v3731_v14   ;;  %5211 = vst [vmem:[#allocation88_spill] sm:$0xff] %v3957_v17  ;;  %v733_v8 = vmul.f32 %v3250_v31, %v3957_v17  ;;  %v991_v30 = vmul.f32 %v3738_v39, %v3961_v22  ;;  %v3970_v29 = vadd.f32 %v1153_v28, %v1136_v1  ;;  %v5215_v39 = vld [vmem:[#allocation76_spill] sm:$0xff] }
 0x18d   :  { %v1520_v4 = vpop.permute.xlu2 %1519  ;;  %v1473_v28 = vmul.f32 %v5215_v39, %v3834_v38  ;;  %v5219_v39 = vld [vmem:[#allocation36_spill] sm:$0xff] }
 0x18e   :  { %v3976_v41 = vmul.f32 %v1520_v4, %v5212_v47  ;;  %v2768_v13 = vpop.eup %2767  ;;  %v750_v25 = vmul.f32 %v3655_v26, %v733_v8  ;;  %v1008_v31 = vmul.f32 %v3694_v40, %v991_v30  ;;  %v506_v4 = vsub.f32 0.0, %v3964_v20 }
 0x18f   :  { %v3986_v1 = vmul.f32 %v2768_v13, %v3851_v42  ;;  %v1197_v61 = vpop.permute.xlu1 %1196  ;;  %v505_v8 = vsub.f32 0.0, %v3973_v49  ;;  %v1586_v13 = vmul.f32 %v1536_v62, %v3916_v34  ;;  %v5218_v62 = vld [vmem:[#allocation78_spill] sm:$0xff] }
 0x190   :  { %5213 = vst [vmem:[#allocation89_spill] sm:$0xff] %v3976_v41  ;;  %v1247_v41 = vmul.f32 %v1197_v61, %v3873_v3  ;;  %v483_v35 = vpop.f32.mrf.mxu1  ;;  %v879_v12 = vadd.f32 %v863_v44, %v750_v25  ;;  %v3990_v45 = vadd.f32 %v1008_v31, %v878_v43  ;;  %v1377_v43 = vmul.f32 %v3751_v55, %v1360_v2 }
 0x191   :  { %5216 = vst [vmem:[#allocation57_spill] sm:$0xff] %v3986_v1  ;;  %v5098_v52 = vrot.slane %v3986_v1, 7  ;;  %v3995_v30 = vadd.f32 %v3585_v16, %v483_v35  ;;  %2647 = vset.pattern.permute.xlu1 %v5164_v58  ;;  %v5090_v38 = vrot.slane %v3986_v1, 1  ;;  %v1490_v44 = vmul.f32 %v3781_v21, %v1473_v28 }
 0x192   :  { %v1264_v42 = vmul.f32 %v3757_v60, %v1247_v41  ;;  %1426 = vperm.xlu1 %2647, %v3774_v59   ;;  %v532_v31 = vmul.f32 1.442695, %v506_v4  ;;  %v4015_v41 = vld [vmem:[%s5031_s6 + $0x8] ss:$0 sm:$0xff]  ;;  %v530_v4 = vmul.f32 1.442695, %v505_v8 }
 0x193   :  { %v507_v25 = vsub.f32 0.0, %v3995_v30  ;;  %v4010_v35 = vsel %vm903_vm2, %v894_v33, %v5090_v38  ;;  %v4027_v33 = vsel %vm628_vm1, %v617_v51, %v5098_v52  ;;  %v5221_v38 = vld [vmem:[#allocation45_spill] sm:$0xff]  ;;  %v1603_v50 = vmul.f32 %v4015_v41, %v1586_v13 }
 0x194   :  { %2648 = vset.pattern.permute.xlu2 %v5164_v58  ;;  %5217 = vst [vmem:[#allocation76_spill] sm:$0xff] %v4010_v35  ;;  %v992_v28 = vmul.f32 %v5219_v39, %v4010_v35  ;;  %v1280_v61 = vadd.f32 %v1264_v42, %v3884_v5  ;;  %v1105_v10 = vmul.f32 %v5221_v38, %v4027_v33  ;;  %2769 = vpow2.f32 %v532_v31 }
 0x195   :  { %1458 = vperm.xlu2 %2648, %v5218_v62   ;;  %v4018_v2 = vpop.permute.xlu2 %1551  ;;  %5220 = vst [vmem:[#allocation78_spill] sm:$0xff] %v4027_v33  ;;  %v534_v47 = vmul.f32 1.442695, %v507_v25  ;;  %2771 = vpow2.f32 %v530_v4 }
 0x196   :  { %v1009_v0 = vmul.f32 %v3694_v40, %v992_v28  ;;  %v1393_v46 = vadd.f32 %v1377_v43, %v1280_v61  ;;  %v1122_v39 = vmul.f32 %v3722_v53, %v1105_v10  ;;  %v4065_v61 = vld [vmem:[%s5116_s29 + $0x78] sm:$0xff] }
 0x197   :  { %2773 = vpow2.f32 %v534_v47 }
 0x198   :  { %v1306_v5 = vpop.permute.xlu1 %1305  ;;  %v486_v42 = vpop.f32.mrf.mxu1  ;;  %v1506_v11 = vadd.f32 %v1490_v44, %v1393_v46  ;;  %v1025_v35 = vadd.f32 %v1009_v0, %v879_v12 }
 0x199   :  { %v1359_v51 = vmul.f32 %v1306_v5, %v3810_v36  ;;  %v4036_v8 = vadd.f32 %v3585_v16, %v486_v42  ;;  %v4050_v36 = vld [vmem:[%s5116_s29 + $0x38] sm:$0xff]  ;;  %s2982_s29 = smov [#allocation2]  }
 0x19a   :  { %2649 = vset.pattern.permute.xlu1 %v5182_v48  ;;  %v4039_v38 = vadd.f32 %v1603_v50, %v1506_v11  ;;  %v4042_v13 = vadd.f32 %v1122_v39, %v1025_v35  ;;  %v2770_v11 = vpop.eup %2769  ;;  %s2356_s27 = sshll.u32 %s2982_s29, 4  ;;  %s2357_s27 = int_to_ptr.vmem [resolvable:$true] %s2356_s27 }
 0x19b   :  { %1567 = vperm.xlu1 %2649, %v3839_v24   ;;  %v1376_v10 = vmul.f32 %v3751_v55, %v1359_v51  ;;  %v508_v46 = vsub.f32 0.0, %v4036_v8  ;;  %v2772_v24 = vpop.eup %2771  ;;  %v554_v44 = vadd.f32 1.0, %v2770_v11 }
 0x19c   :  { %5222 = vst [vmem:[#allocation36_spill] sm:$0xff] %v4039_v38  ;;  %v553_v35 = vadd.f32 1.0, %v2772_v24 }
 0x19d   :  { %2650 = vset.pattern.permute.xlu2 %v5162_v9  ;;  %v536_v50 = vmul.f32 1.442695, %v508_v46  ;;  %v1392_v47 = vadd.f32 %v1376_v10, %v3860_v15  ;;  %v2774_v12 = vpop.eup %2773 }
 0x19e   :  { %1321 = vperm.xlu2 %2650, %v4050_v36   ;;  %v4053_v0 = vpop.permute.xlu2 %1094  ;;  %v555_v28 = vadd.f32 1.0, %v2774_v12  ;;  %v5224_v12 = vld [vmem:[#allocation77_spill] sm:$0xff] }
 0x19f   :  { %2775 = vpow2.f32 %v536_v50 }
 0x1a0   :  { %v488_v43 = vpop.f32.mrf.mxu1  ;;  %2777 = vrcp.f32 %v554_v44 }
 0x1a1   :  { %v4056_v25 = vpop.permute.xlu1 %1446  ;;  %v4059_v31 = vadd.f32 %v3585_v16, %v488_v43  ;;  %2779 = vrcp.f32 %v553_v35 }
 0x1a2   :  { %5223 = vst [vmem:[#allocation45_spill] sm:$0xff] %v4056_v25  ;;  %2781 = vrcp.f32 %v555_v28 }
 0x1a3   :  { %2651 = vset.pattern.permute.xlu1 %v5162_v9  ;;  %v509_v15 = vsub.f32 0.0, %v4059_v31 }
 0x1a4   :  { %1353 = vperm.xlu1 %2651, %v4065_v61  }
 0x1a5   :  { %v538_v39 = vmul.f32 1.442695, %v509_v15  ;;  %v2776_v9 = vpop.eup %2775 }
 0x1a6   :  { %2652 = vset.pattern.permute.xlu2 %v5164_v58  ;;  %v556_v42 = vadd.f32 1.0, %v2776_v9  ;;  %v2778_v46 = vpop.eup %2777 }
 0x1a7   :  { %1430 = vperm.xlu2 %2652, %v3946_v7   ;;  %v4071_v4 = vpop.permute.xlu2 %1232  ;;  %2783 = vpow2.f32 %v538_v39  ;;  %v2780_v11 = vpop.eup %2779  ;;  %v4079_v7 = vmul.f32 %v2778_v46, %v3964_v20 }
 0x1a8   :  { %v491_v5 = vpop.f32.mrf.mxu1  ;;  %2785 = vrcp.f32 %v556_v42  ;;  %v2782_v50 = vpop.eup %2781  ;;  %v4088_v28 = vmul.f32 %v2780_v11, %v3973_v49 }
 0x1a9   :  { %v4074_v51 = vadd.f32 %v3585_v16, %v491_v5  ;;  %v4091_v15 = vmul.f32 %v2782_v50, %v3995_v30 }
 0x1aa   :  { %v1524_v10 = vpop.permute.xlu1 %1523  ;;  %v619_v30 = vrot.slane %v4088_v28, 7 }
 0x1ab   :  { %v510_v24 = vsub.f32 0.0, %v4074_v51  ;;  %v4084_v43 = vmul.f32 %v1524_v10, %v5224_v12  ;;  %v620_v10 = vrot.slane %v4079_v7, 7  ;;  %v5100_v11 = vrot.slane %v4091_v15, 1 }
 0x1ac   :  { %2654 = vset.pattern.permute.xlu1 %v5182_v48 }
 0x1ad   :  { %1539 = vperm.xlu1 %2654, %v3774_v59   ;;  %5225 = vst [vmem:[#allocation77_spill] sm:$0xff] %v4084_v43  ;;  %v2784_v35 = vpop.eup %2783  ;;  %v540_v59 = vmul.f32 1.442695, %v510_v24  ;;  %v4111_v12 = vsel %vm628_vm1, %v619_v30, %v620_v10 }
 0x1ae   :  { %v557_v9 = vadd.f32 1.0, %v2784_v35  ;;  %v2786_v42 = vpop.eup %2785 }
 0x1af   :  { %2655 = vset.pattern.permute.xlu2 %v5182_v48  ;;  %2787 = vpow2.f32 %v540_v59  ;;  %v4104_v50 = vmul.f32 %v2786_v42, %v4036_v8  ;;  %v1154_v8 = vmul.f32 %v3697_v54, %v3936_v23 }
 0x1b0   :  { %1571 = vperm.xlu2 %2655, %v5218_v62   ;;  %v1419_v44 = vpop.permute.xlu2 %1418  ;;  %v493_v39 = vpop.f32.mrf.mxu1  ;;  %2789 = vrcp.f32 %v557_v9 }
 0x1b1   :  { %v1472_v20 = vmul.f32 %v1419_v44, %v3778_v37  ;;  %v4095_v5 = vadd.f32 %v3585_v16, %v493_v39  ;;  %v5099_v44 = vrot.slane %v4079_v7, 1  ;;  %v622_v52 = vrot.slane %v4104_v50, 7 }
 0x1b3   :  { %v1489_v62 = vmul.f32 %v3781_v21, %v1472_v20  ;;  %v511_v49 = vsub.f32 0.0, %v4095_v5  ;;  %v1063_v46 = vpop.permute.xlu1 %1062  ;;  %v4126_v20 = vsel %vm903_vm2, %v5099_v44, %v5100_v11  ;;  %v621_v44 = vrot.slane %v4091_v15, 7 }
 0x1b4   :  { %v1104_v37 = vmul.f32 %v1063_v46, %v3957_v17  ;;  %5226 = vst [vmem:[#allocation90_spill] sm:$0xff] %v4126_v20 }
 0x1b5   :  { %v542_v16 = vmul.f32 1.442695, %v511_v49  ;;  %2656 = vset.pattern.permute.xlu1 %v5164_v58  ;;  %v4107_v24 = vadd.f32 %v1489_v62, %v1392_v47  ;;  %v2788_v59 = vpop.eup %2787  ;;  %v5228_v49 = vld [vmem:[#allocation17_spill] sm:$0xff]  ;;  %v5229_v47 = vld [vmem:[#allocation7_spill] sm:$0xff] }
 0x1b6   :  { %v1121_v35 = vmul.f32 %v3722_v53, %v1104_v37  ;;  %1434 = vperm.xlu1 %2656, %v4050_v36   ;;  %v2790_v62 = vpop.eup %2789  ;;  %v736_v46 = vmul.f32 %v5228_v49, %v4111_v12  ;;  %v558_v37 = vadd.f32 1.0, %v2788_v59  ;;  %v734_v25 = vmul.f32 %v5229_v47, %v4027_v33 }
 0x1b7   :  { %2791 = vpow2.f32 %v542_v16  ;;  %v1158_v33 = vmul.f32 %v3697_v54, %v4091_v15 }
 0x1b8   :  { %2657 = vset.pattern.permute.xlu2 %v5164_v58  ;;  %v1137_v9 = vadd.f32 %v1121_v35, %v3990_v45  ;;  %v5227_v58 = vld [vmem:[#allocation9_spill] sm:$0xff]  ;;  %v5230_v45 = vld [vmem:[#allocation30_spill] sm:$0xff]  ;;  %2793 = vrcp.f32 %v558_v37 }
 0x1b9   :  { %1466 = vperm.xlu2 %2657, %v4065_v61   ;;  %v1528_v39 = vpop.permute.xlu2 %1527  ;;  %v847_v42 = vmul.f32 %v5227_v58, %v3986_v1  ;;  %v849_v35 = vmul.f32 %v5230_v45, %v4079_v7  ;;  %v5231_v58 = vld [vmem:[#allocation23_spill] sm:$0xff] }
 0x1ba   :  { %v1584_v16 = vmul.f32 %v1528_v39, %v3814_v56  ;;  %v4137_v11 = vadd.f32 %v1154_v8, %v1137_v9  ;;  %v995_v38 = vmul.f32 %v5231_v58, %v4126_v20  ;;  %v4147_v56 = vmul.f32 %v2790_v62, %v4059_v31 }
 0x1bb   :  { %v864_v49 = vmul.f32 %v3674_v6, %v847_v42  ;;  %v5232_v8 = vrot.slane %v4088_v28, 1  ;;  %v5233_v9 = vrot.slane %v3986_v1, 1  ;;  %v4164_v31 = vsel %vm628_vm1, %v621_v44, %v622_v52 }
 0x1bc   :  { %v1601_v59 = vmul.f32 %v4015_v41, %v1584_v16  ;;  %v1201_v39 = vpop.permute.xlu1 %1200  ;;  %v753_v42 = vmul.f32 %v3655_v26, %v736_v46  ;;  %v899_v62 = vrot.slane %v4104_v50, 1  ;;  %v4170_v16 = vsel %vm628_vm1, %v620_v10, %v621_v44  ;;  %v5237_v10 = vld [vmem:[#allocation37_spill] sm:$0xff] }
 0x1bd   :  { %v4156_v47 = vsel %vm903_vm2, %v5233_v9, %v5232_v8  ;;  %v2792_v45 = vpop.eup %2791  ;;  %v1248_v37 = vmul.f32 %v1201_v39, %v3916_v34  ;;  %v5236_v34 = vrot.slane %v3986_v1, 7  ;;  %v1012_v46 = vmul.f32 %v3694_v40, %v995_v38 }
 0x1be   :  { %5234 = vst [vmem:[#allocation9_spill] sm:$0xff] %v4156_v47  ;;  %v4159_v58 = vadd.f32 %v1601_v59, %v3862_v32  ;;  %v559_v8 = vadd.f32 1.0, %v2792_v45  ;;  %2658 = vset.pattern.permute.xlu1 %v5182_v48  ;;  %v751_v32 = vmul.f32 %v3655_v26, %v734_v25  ;;  %v866_v59 = vmul.f32 %v3674_v6, %v849_v35  ;;  %v5238_v35 = vld [vmem:[#allocation13_spill] sm:$0xff] }
 0x1bf   :  { %v4179_v39 = vsel %vm628_vm1, %v5236_v34, %v619_v30  ;;  %v1265_v9 = vmul.f32 %v3757_v60, %v1248_v37  ;;  %1575 = vperm.xlu1 %2658, %v3731_v14   ;;  %v738_v25 = vmul.f32 %v5237_v10, %v4164_v31  ;;  %v900_v44 = vrot.slane %v4147_v56, 1  ;;  %v5239_v30 = vld [vmem:[#allocation35_spill] sm:$0xff] }
 0x1c0   :  { %5235 = vst [vmem:[#allocation17_spill] sm:$0xff] %v4159_v58  ;;  %2795 = vrcp.f32 %v559_v8  ;;  %v993_v45 = vmul.f32 %v5238_v35, %v4156_v47  ;;  %v2794_v58 = vpop.eup %2793  ;;  %v1108_v34 = vmul.f32 %v5239_v30, %v4170_v16  ;;  %v882_v37 = vadd.f32 %v866_v59, %v753_v42  ;;  %v5244_v30 = vld [vmem:[#allocation42_spill] sm:$0xff] }
 0x1c1   :  { %2659 = vset.pattern.permute.xlu2 %v5182_v48  ;;  %v4193_v38 = vadd.f32 %v1265_v9, %v3938_v19  ;;  %v623_v48 = vrot.slane %v4147_v56, 7  ;;  %v5242_v8 = vrot.slane %v4091_v15, 1  ;;  %v4206_v35 = vmul.f32 %v2794_v58, %v4074_v51 }
 0x1c2   :  { %1547 = vperm.xlu2 %2659, %v4050_v36   ;;  %v4196_v14 = vpop.permute.xlu2 %1236  ;;  %v851_v19 = vmul.f32 %v5244_v30, %v4104_v50  ;;  %v4212_v36 = vsel %vm903_vm2, %v899_v62, %v900_v44  ;;  %v1028_v9 = vadd.f32 %v1012_v46, %v882_v37  ;;  %v755_v23 = vmul.f32 %v3655_v26, %v738_v25  ;;  %v5249_v46 = vld [vmem:[#allocation24_spill] sm:$0xff] }
 0x1c3   :  { %5240 = vst [vmem:[#allocation7_spill] sm:$0xff] %v4193_v38  ;;  %v4203_v10 = vsel %vm903_vm2, %v5242_v8, %v899_v62  ;;  %v624_v59 = vrot.slane %v4206_v35, 7  ;;  %v880_v8 = vadd.f32 %v864_v49, %v751_v32  ;;  %v4222_v51 = vsel %vm628_vm1, %v622_v52, %v623_v48  ;;  %v5248_v62 = vld [vmem:[#allocation64_spill] sm:$0xff] }
 0x1c4   :  { %5241 = vst [vmem:[#allocation30_spill] sm:$0xff] %v4196_v14  ;;  %v5245_v14 = vld [vmem:[#allocation48_spill] sm:$0xff]  ;;  %v1125_v58 = vmul.f32 %v3722_v53, %v1108_v34  ;;  %v1254_v30 = vmul.f32 %v5248_v62, %v4203_v10  ;;  %v1106_v37 = vmul.f32 %v5249_v46, %v4179_v39  ;;  %v868_v49 = vmul.f32 %v3674_v6, %v851_v19  ;;  %v5250_v34 = vld [vmem:[#allocation61_spill] sm:$0xff]  ;;  %v5252_v19 = vld [vmem:[#allocation63_spill] sm:$0xff] }
 0x1c5   :  { %5243 = vst [vmem:[#allocation23_spill] sm:$0xff] %v4206_v35  ;;  %v997_v42 = vmul.f32 %v5245_v14, %v4212_v36  ;;  %v4218_v20 = vpop.permute.xlu1 %1341  ;;  %v4231_v17 = vsel %vm628_vm1, %v623_v48, %v624_v59  ;;  %v1010_v52 = vmul.f32 %v3694_v40, %v993_v45  ;;  %v5251_v48 = vld [vmem:[#allocation73_spill] sm:$0xff]  ;;  %v901_v45 = vrot.slane %v4206_v35, 1 }
 0x1c6   :  { %5246 = vst [vmem:[#allocation37_spill] sm:$0xff] %v4218_v20  ;;  %v2796_v14 = vpop.eup %2795  ;;  %v740_v62 = vmul.f32 %v5250_v34, %v4231_v17  ;;  %v1141_v46 = vadd.f32 %v1125_v58, %v1028_v9  ;;  %v1110_v43 = vmul.f32 %v5251_v48, %v4222_v51  ;;  %v884_v38 = vadd.f32 %v868_v49, %v755_v23 }
 0x1c7   :  { %5247 = vst [vmem:[#allocation13_spill] sm:$0xff] %v4222_v51  ;;  %v1014_v32 = vmul.f32 %v3694_v40, %v997_v42  ;;  %v4237_v25 = vmul.f32 %v2796_v14, %v4095_v5  ;;  %1579 = vperm.xlu1 %2658, %v4065_v61   ;;  %v853_v42 = vmul.f32 %v5252_v19, %v4206_v35  ;;  %v5253_v58 = vrot.slane %v4079_v7, 1 }
 0x1c8   :  { %v1156_v5 = vmul.f32 %v3697_v54, %v4088_v28  ;;  %v1271_v14 = vmul.f32 %v3757_v60, %v1254_v30  ;;  %v5254_v34 = vrot.slane %v4088_v28, 1  ;;  %v757_v49 = vmul.f32 %v3655_v26, %v740_v62 }
 0x1c9   :  { %v5110_v61 = vrot.slane %v4237_v25, 1  ;;  %v1030_v19 = vadd.f32 %v1014_v32, %v884_v38  ;;  %v1026_v20 = vadd.f32 %v1010_v52, %v880_v8  ;;  %v1174_v9 = vadd.f32 %v1158_v33, %v1141_v46  ;;  %v5256_v33 = vld [vmem:[#allocation50_spill] sm:$0xff] }
 0x1ca   :  { %v4260_v48 = vsel %vm903_vm2, %v5254_v34, %v5253_v58  ;;  %v1367_v35 = vmul.f32 %v3912_v57, %v4164_v31  ;;  %v5255_v51 = vrot.slane %v4237_v25, 7  ;;  %v1127_v8 = vmul.f32 %v3722_v53, %v1110_v43 }
 0x1cb   :  { %v1346_v23 = vpop.permute.xlu2 %1345  ;;  %v4267_v30 = vsel %vm903_vm2, %v901_v45, %v5110_v61  ;;  %v870_v32 = vmul.f32 %v3674_v6, %v853_v42  ;;  %v1123_v52 = vmul.f32 %v3722_v53, %v1106_v37  ;;  %v1252_v62 = vmul.f32 %v5256_v33, %v4260_v48 }
 0x1cc   :  { %v4275_v58 = vsel %vm628_vm1, %v624_v59, %v5255_v51  ;;  %v999_v38 = vmul.f32 %v3932_v27, %v4267_v30  ;;  %v1287_v46 = vadd.f32 %v1271_v14, %v1174_v9  ;;  %v4288_v59 = vsel %vm903_vm2, %v900_v44, %v901_v45  ;;  %v1797_v44 = vld [vmem:[%s5033_s8 + $0x78] sm:$0xff] }
 0x1cd   :  { %v1112_v57 = vmul.f32 %v4053_v0, %v4275_v58  ;;  %v886_v27 = vadd.f32 %v870_v32, %v757_v49  ;;  %v1369_v43 = vmul.f32 %v1346_v23, %v4231_v17  ;;  %v1143_v42 = vadd.f32 %v1127_v8, %v1030_v19  ;;  %1807 = vmatpush.msrb.mxu0 %v1797_v44 }
 0x1ce   :  { %v1016_v51 = vmul.f32 %v3694_v40, %v999_v38  ;;  %v1451_v34 = vpop.permute.xlu1 %1450  ;;  %v1384_v37 = vmul.f32 %v3751_v55, %v1367_v35  ;;  %v1160_v14 = vmul.f32 %v3697_v54, %v4147_v56  ;;  %v1139_v9 = vadd.f32 %v1123_v52, %v1026_v20  ;;  %v1796_v20 = vld [vmem:[%s5033_s8 + $0x70] sm:$0xff]  ;;  %v5257_v52 = vld [vmem:[#allocation52_spill] sm:$0xff] }
 0x1cf   :  { %v1480_v61 = vmul.f32 %v1451_v34, %v4104_v50  ;;  %v1129_v33 = vmul.f32 %v3722_v53, %v1112_v57  ;;  %v1256_v45 = vmul.f32 %v4071_v4, %v4288_v59  ;;  %v1269_v23 = vmul.f32 %v3757_v60, %v1252_v62  ;;  %1808 = vmatpush.msrb.mxu0 %v1796_v20 }
 0x1d0   :  { %v1032_v0 = vadd.f32 %v1016_v51, %v886_v27  ;;  %v1400_v49 = vadd.f32 %v1384_v37, %v1287_v46  ;;  %v1155_v19 = vmul.f32 %v3697_v54, %v3986_v1  ;;  %v1386_v38 = vmul.f32 %v3751_v55, %v1369_v43  ;;  %v5258_v27 = vld [vmem:[#allocation28_spill] sm:$0xff] }
 0x1d1   :  { %v1497_v35 = vmul.f32 %v3781_v21, %v1480_v61  ;;  %v1176_v32 = vadd.f32 %v1160_v14, %v1143_v42  ;;  %v1273_v4 = vmul.f32 %v3757_v60, %v1256_v45  ;;  %v1365_v62 = vmul.f32 %v5257_v52, %v4111_v12  ;;  %v5259_v42 = vld [vmem:[#allocation66_spill] sm:$0xff] }
 0x1d2   :  { %v4310_v8 = vadd.f32 %v1129_v33, %v1032_v0  ;;  %v1172_v57 = vadd.f32 %v1156_v5, %v1139_v9  ;;  %v1478_v51 = vmul.f32 %v3878_v18, %v4079_v7  ;;  %v737_v34 = vmul.f32 %v5258_v27, %v4170_v16  ;;  %v5260_v33 = vld [vmem:[#allocation60_spill] sm:$0xff] }
 0x1d3   :  { %v4315_v46 = vadd.f32 %v1497_v35, %v1400_v49  ;;  %v1289_v37 = vadd.f32 %v1273_v4, %v1176_v32  ;;  %v1477_v14 = vmul.f32 %v5259_v42, %v4088_v28  ;;  %v1171_v0 = vadd.f32 %v1155_v19, %v4042_v13  ;;  %v5262_v49 = vld [vmem:[#allocation59_spill] sm:$0xff]  ;;  %v5264_v32 = vld [vmem:[#allocation41_spill] sm:$0xff] }
 0x1d4   :  { %v1532_v61 = vpop.permute.xlu2 %1531  ;;  %v1251_v44 = vmul.f32 %v5260_v33, %v4156_v47  ;;  %v1285_v45 = vadd.f32 %v1269_v23, %v1172_v57  ;;  %v1590_v5 = vmul.f32 %v4018_v2, %v4260_v48  ;;  %v5263_v35 = vld [vmem:[#allocation31_spill] sm:$0xff]  ;;  %v996_v13 = vmul.f32 %v5264_v32, %v4203_v10 }
 0x1d5   :  { %v1585_v43 = vmul.f32 %v1532_v61, %v3873_v3  ;;  %v4330_v9 = vadd.f32 %v1386_v38, %v1289_v37  ;;  %v1364_v3 = vmul.f32 %v5262_v49, %v4179_v39  ;;  %v850_v20 = vmul.f32 %v5263_v35, %v4091_v15  ;;  %v5266_v49 = vld [vmem:[#allocation76_spill] sm:$0xff]  ;;  %v5267_v35 = vld [vmem:[#allocation67_spill] sm:$0xff] }
 0x1d6   :  { %v1268_v4 = vmul.f32 %v3757_v60, %v1251_v44  ;;  %v1382_v23 = vmul.f32 %v3751_v55, %v1365_v62  ;;  %v1495_v2 = vmul.f32 %v3781_v21, %v1478_v51  ;;  %v754_v52 = vmul.f32 %v3655_v26, %v737_v34  ;;  %v5285_v47 = vld [vmem:[#allocation71_spill] sm:$0xff] }
 0x1d7   :  { %v1602_v18 = vmul.f32 %v4015_v41, %v1585_v43  ;;  %5261 = vst [vmem:[#allocation35_spill] sm:$0xff] %v4330_v9  ;;  %v1205_v19 = vpop.permute.xlu1 %1204  ;;  %v1381_v27 = vmul.f32 %v3751_v55, %v1364_v3  ;;  %v1494_v37 = vmul.f32 %v3781_v21, %v1477_v14  ;;  %v1607_v42 = vmul.f32 %v4015_v41, %v1590_v5 }
 0x1d8   :  { %v1249_v61 = vmul.f32 %v1205_v19, %v3961_v22  ;;  %v1284_v57 = vadd.f32 %v1268_v4, %v1171_v0  ;;  %v1398_v43 = vadd.f32 %v1382_v23, %v1285_v45  ;;  %v867_v62 = vmul.f32 %v3674_v6, %v850_v20  ;;  %v5270_v23 = vld [vmem:[#allocation15_spill] sm:$0xff] }
 0x1d9   :  { %v4343_v38 = vadd.f32 %v1602_v18, %v4107_v24  ;;  %v1013_v51 = vmul.f32 %v3694_v40, %v996_v13  ;;  %v5265_v24 = vld [vmem:[#allocation53_spill] sm:$0xff]  ;;  %v5268_v32 = vrot.slane %v5267_v35, 7  ;;  %v5269_v20 = vrot.slane %v4237_v25, 7 }
 0x1da   :  { %v1266_v33 = vmul.f32 %v3757_v60, %v1249_v61  ;;  %v1397_v34 = vadd.f32 %v1381_v27, %v1284_v57  ;;  %v4352_v44 = vadd.f32 %v1495_v2, %v1398_v43  ;;  %v1109_v18 = vmul.f32 %v5265_v24, %v4164_v31  ;;  %v5271_v57 = vld [vmem:[#allocation85_spill] sm:$0xff] }
 0x1db   :  { %v883_v3 = vadd.f32 %v867_v62, %v754_v52  ;;  %v4366_v13 = vsel %vm628_vm1, %v5269_v20, %v5268_v32  ;;  %v725_v2 = vmul.f32 %v5270_v23, %v4275_v58  ;;  %v5272_v43 = vld [vmem:[#allocation81_spill] sm:$0xff]  ;;  %v5278_v20 = vld [vmem:[#allocation7_spill] sm:$0xff] }
 0x1dc   :  { %v4357_v0 = vadd.f32 %v1266_v33, %v3970_v29  ;;  %v1510_v5 = vadd.f32 %v1494_v37, %v1397_v34  ;;  %v1126_v52 = vmul.f32 %v3722_v53, %v1109_v18  ;;  %v1255_v37 = vmul.f32 %v5272_v43, %v4212_v36  ;;  %v5273_v33 = vld [vmem:[#allocation19_spill] sm:$0xff]  ;;  %v5275_v34 = vld [vmem:[#allocation6_spill] sm:$0xff] }
 0x1dd   :  { %v1209_v45 = vpop.permute.xlu2 %1208  ;;  %v1029_v4 = vadd.f32 %v1013_v51, %v883_v3  ;;  %v726_v62 = vmul.f32 %v5273_v33, %v4366_v13  ;;  %v839_v24 = vmul.f32 %v5275_v34, %v5267_v35  ;;  %v742_v32 = vmul.f32 %v3655_v26, %v725_v2  ;;  %v5281_v2 = vld [vmem:[#allocation11_spill] sm:$0xff]  ;;  %v5282_v34 = vld [vmem:[#allocation84_spill] sm:$0xff] }
 0x1de   :  { %v1250_v14 = vmul.f32 %v1209_v45, %v5266_v49  ;;  %v4369_v31 = vadd.f32 %v1607_v42, %v1510_v5  ;;  %v5274_v42 = vld [vmem:[#allocation5_spill] sm:$0xff]  ;;  %v1159_v5 = vmul.f32 %v3697_v54, %v4104_v50  ;;  %v1272_v23 = vmul.f32 %v3757_v60, %v1255_v37 }
 0x1df   :  { %v838_v51 = vmul.f32 %v5274_v42, %v4237_v25  ;;  %v5276_v45 = vld [vmem:[#allocation13_spill] sm:$0xff]  ;;  %v1142_v3 = vadd.f32 %v1126_v52, %v1029_v4  ;;  %v5279_v43 = vrot.slane %v5267_v35, 1  ;;  %v5280_v33 = vrot.slane %v4237_v25, 1 }
 0x1e0   :  { %v1267_v19 = vmul.f32 %v3757_v60, %v1250_v14  ;;  %v1314_v29 = vpop.permute.xlu1 %1313  ;;  %v5277_v14 = vld [vmem:[#allocation37_spill] sm:$0xff]  ;;  %v856_v37 = vmul.f32 %v3674_v6, %v839_v24 }
 0x1e1   :  { %v1361_v27 = vmul.f32 %v1314_v29, %v5271_v57  ;;  %v1368_v18 = vmul.f32 %v5277_v14, %v5276_v45  ;;  %v743_v57 = vmul.f32 %v3655_v26, %v726_v62  ;;  %v4405_v4 = vsel %vm903_vm2, %v5280_v33, %v5279_v43  ;;  %v5283_v62 = vld [vmem:[#allocation8_spill] sm:$0xff]  ;;  %v5287_v24 = vld [vmem:[#allocation65_spill] sm:$0xff] }
 0x1e2   :  { %v4375_v61 = vadd.f32 %v1267_v19, %v4137_v11  ;;  %v855_v50 = vmul.f32 %v3674_v6, %v838_v51  ;;  %v984_v52 = vmul.f32 %v5281_v2, %v4405_v4  ;;  %v1175_v42 = vadd.f32 %v1159_v5, %v1142_v3  ;;  %v5286_v51 = vld [vmem:[#allocation14_spill] sm:$0xff] }
 0x1e3   :  { %v1378_v11 = vmul.f32 %v3751_v55, %v1361_v27  ;;  %v1385_v27 = vmul.f32 %v3751_v55, %v1368_v18  ;;  %v985_v14 = vmul.f32 %v5283_v62, %v5282_v34  ;;  %v872_v33 = vadd.f32 %v856_v37, %v743_v57  ;;  %v5289_v37 = vld [vmem:[#allocation74_spill] sm:$0xff] }
 0x1e4   :  { %v1288_v43 = vadd.f32 %v1272_v23, %v1175_v42  ;;  %v1098_v9 = vmul.f32 %v5286_v51, %v5285_v47  ;;  %v1001_v18 = vmul.f32 %v3694_v40, %v984_v52  ;;  %v1258_v5 = vmul.f32 %v5287_v24, %v4405_v4 }
 0x1e5   :  { %v4393_v19 = vadd.f32 %v1378_v11, %v5278_v20  ;;  %v871_v11 = vadd.f32 %v855_v50, %v742_v32  ;;  %v5284_v20 = vld [vmem:[#allocation21_spill] sm:$0xff]  ;;  %v1002_v62 = vmul.f32 %v3694_v40, %v985_v14  ;;  %v5288_v32 = vld [vmem:[#allocation46_spill] sm:$0xff]  ;;  %v1162_v42 = vmul.f32 %v3697_v54, %v4237_v25 }
 0x1e6   :  { %v4395_v29 = vpop.permute.xlu2 %1349  ;;  %v1097_v1 = vmul.f32 %v5284_v20, %v4366_v13  ;;  %v1401_v3 = vadd.f32 %v1385_v27, %v1288_v43  ;;  %v1243_v50 = vmul.f32 %v5288_v32, %v5282_v34  ;;  %v1115_v43 = vmul.f32 %v3722_v53, %v1098_v9 }
 0x1e7   :  { %v1017_v57 = vadd.f32 %v1001_v18, %v871_v11  ;;  %v1018_v27 = vadd.f32 %v1002_v62, %v872_v33  ;;  %v1795_v18 = vld [vmem:[%s5033_s8 + $0x68] sm:$0xff]  ;;  %v1178_v32 = vadd.f32 %v1162_v42, %v4310_v8  ;;  %v1275_v33 = vmul.f32 %v3757_v60, %v1258_v5  ;;  %v5293_v42 = vld [vmem:[#allocation75_spill] sm:$0xff] }
 0x1e8   :  { %v1114_v23 = vmul.f32 %v3722_v53, %v1097_v1  ;;  %v5291_v1 = vld [vmem:[#allocation56_spill] sm:$0xff]  ;;  %v5292_v62 = vld [vmem:[#allocation69_spill] sm:$0xff]  ;;  %1809 = vmatpush.msrb.mxu0 %v1795_v18  ;;  %v1374_v5 = vmul.f32 %v3751_v55, %v5293_v42 }
 0x1e9   :  { %v1455_v63 = vpop.permute.xlu1 %1454  ;;  %v1356_v11 = vmul.f32 %v5291_v1, %v5285_v47  ;;  %v1131_v9 = vadd.f32 %v1115_v43, %v1018_v27  ;;  %v5294_v27 = vld [vmem:[#allocation10_spill] sm:$0xff] }
 0x1ea   :  { %v1481_v2 = vmul.f32 %v1455_v63, %v4147_v56  ;;  %v5290_v63 = vld [vmem:[#allocation39_spill] sm:$0xff]  ;;  %v1130_v24 = vadd.f32 %v1114_v23, %v1017_v57  ;;  %v1260_v23 = vmul.f32 %v3757_v60, %v1243_v50  ;;  %v735_v43 = vmul.f32 %v5294_v27, %v4179_v39  ;;  %v5301_v27 = vld [vmem:[#allocation78_spill] sm:$0xff] }
 0x1eb   :  { %v1244_v52 = vmul.f32 %v5290_v63, %v5289_v37  ;;  %v4449_v37 = vadd.f32 %v1275_v33, %v1178_v32  ;;  %v1373_v8 = vmul.f32 %v3751_v55, %v1356_v11  ;;  %v5297_v33 = vld [vmem:[#allocation25_spill] sm:$0xff] }
 0x1ec   :  { %v1498_v20 = vmul.f32 %v3781_v21, %v1481_v2  ;;  %v1147_v2 = vmul.f32 %v3697_v54, %v5267_v35  ;;  %v752_v39 = vmul.f32 %v3655_v26, %v735_v43 }
 0x1ed   :  { %v1261_v57 = vmul.f32 %v3757_v60, %v1244_v52  ;;  %v5296_v52 = vld [vmem:[#allocation72_spill] sm:$0xff] }
 0x1ee   :  { %v4434_v14 = vadd.f32 %v1498_v20, %v1401_v3  ;;  %v1148_v3 = vmul.f32 %v3697_v54, %v5292_v62  ;;  %v1163_v20 = vadd.f32 %v1147_v2, %v1130_v24  ;;  %v5295_v24 = vld [vmem:[#allocation80_spill] sm:$0xff]  ;;  %v1487_v32 = vmul.f32 %v3781_v21, %v5296_v52 }
 0x1ef   :  { %v4432_v51 = vpop.permute.xlu2 %1458  ;;  %v1486_v50 = vmul.f32 %v3781_v21, %v5295_v24  ;;  %v5298_v62 = vld [vmem:[#allocation12_spill] sm:$0xff] }
 0x1f0   :  { %v1164_v47 = vadd.f32 %v1148_v3, %v1131_v9  ;;  %v1276_v1 = vadd.f32 %v1260_v23, %v1163_v20  ;;  %v848_v9 = vmul.f32 %v5297_v33, %v4088_v28  ;;  %v994_v11 = vmul.f32 %v5298_v62, %v4260_v48  ;;  %v5299_v20 = vld [vmem:[#allocation89_spill] sm:$0xff] }
 0x1f1   :  { %v1599_v23 = vmul.f32 %v4015_v41, %v5299_v20  ;;  %v5303_v20 = vld [vmem:[#allocation88_spill] sm:$0xff] }
 0x1f2   :  { %v4451_v63 = vpop.permute.xlu1 %1563  ;;  %v1277_v18 = vadd.f32 %v1261_v57, %v1164_v47  ;;  %v1389_v2 = vadd.f32 %v1373_v8, %v1276_v1  ;;  %v5300_v57 = vld [vmem:[#allocation77_spill] sm:$0xff]  ;;  %v865_v28 = vmul.f32 %v3674_v6, %v848_v9  ;;  %v1011_v33 = vmul.f32 %v3694_v40, %v994_v11  ;;  %v5304_v11 = vld [vmem:[#allocation90_spill] sm:$0xff] }
 0x1f3   :  { %v1600_v47 = vmul.f32 %v4015_v41, %v5300_v57  ;;  %v1544_v57 = vpop.permute.xlu0 %1543 }
 0x1f4   :  { %v1390_v3 = vadd.f32 %v1374_v5, %v1277_v18  ;;  %v1502_v42 = vadd.f32 %v1486_v50, %v1389_v2  ;;  %v881_v18 = vadd.f32 %v865_v28, %v752_v39  ;;  %v5302_v50 = vld [vmem:[#allocation26_spill] sm:$0xff]  ;;  %v1794_v39 = vld [vmem:[%s5033_s8 + $0x60] sm:$0xff]  ;;  %v5306_v28 = vld [vmem:[#allocation87_spill] sm:$0xff] }
 0x1f5   :  { %v1107_v2 = vmul.f32 %v5302_v50, %v4111_v12  ;;  %v1793_v12 = vld [vmem:[%s5033_s8 + $0x58] sm:$0xff]  ;;  %1810 = vmatpush.msrb.mxu0 %v1794_v39 }
 0x1f6   :  { %v1503_v8 = vadd.f32 %v1487_v32, %v1390_v3  ;;  %v1615_v52 = vadd.f32 %v1599_v23, %v1502_v42  ;;  %v1027_v3 = vadd.f32 %v1011_v33, %v881_v18  ;;  %v5305_v42 = vld [vmem:[#allocation62_spill] sm:$0xff] }
 0x1f7   :  { %v1124_v9 = vmul.f32 %v3722_v53, %v1107_v2  ;;  %1811 = vmatpush.msrb.mxu0 %v1793_v12  ;;  %v5310_v12 = vld [vmem:[#allocation45_spill] sm:$0xff] }
 0x1f8   :  { %v1322_v1 = vpop.permute.xlu2 %1321  ;;  %v1616_v48 = vadd.f32 %v1600_v47, %v1503_v8  ;;  %v1253_v47 = vmul.f32 %v5305_v42, %v5304_v11 }
 0x1f9   :  { %v1363_v24 = vmul.f32 %v1322_v1, %v5301_v27  ;;  %v1140_v27 = vadd.f32 %v1124_v9, %v1027_v3 }
 0x1fa   :  { %v1270_v18 = vmul.f32 %v3757_v60, %v1253_v47 }
 0x1fb   :  { %v1380_v5 = vmul.f32 %v3751_v55, %v1363_v24  ;;  %v1318_v43 = vpop.permute.xlu1 %1317  ;;  %v1157_v24 = vmul.f32 %v3697_v54, %v4079_v7 }
 0x1fc   :  { %v1362_v32 = vmul.f32 %v1318_v43, %v5303_v20  ;;  %v5307_v43 = vld [vmem:[#allocation68_spill] sm:$0xff] }
 0x1fd   :  { %v4478_v62 = vadd.f32 %v1380_v5, %v4375_v61  ;;  %v1588_v61 = vmul.f32 %v1544_v57, %v5266_v49  ;;  %v4499_v5 = vld [vmem:[%s5032_s7] ss:$0 sm:$0xff]  ;;  %v1173_v2 = vadd.f32 %v1157_v24, %v1140_v27  ;;  %v1366_v20 = vmul.f32 %v5307_v43, %v4170_v16  ;;  %v5312_v27 = vld [vmem:[#allocation17_spill] sm:$0xff] }
 0x1fe   :  { %v1379_v23 = vmul.f32 %v3751_v55, %v1362_v32  ;;  %v5308_v32 = vld [vmem:[#allocation83_spill] sm:$0xff]  ;;  %v4524_v24 = vadd.f32 %v4499_v5, %v5312_v27  ;;  %v4537_v43 = vadd.f32 %v4499_v5, %v1615_v52 }
 0x1ff   :  { %v1286_v57 = vadd.f32 %v1270_v18, %v1173_v2  ;;  %v1383_v39 = vmul.f32 %v3751_v55, %v1366_v20  ;;  %v4540_v20 = vadd.f32 %v4499_v5, %v1616_v48  ;;  %v5314_v48 = vld [vmem:[#allocation54_spill] sm:$0xff] }
 0x200   :  { %v1395_v1 = vadd.f32 %v1379_v23, %v4357_v0  ;;  %v1605_v0 = vmul.f32 %v4015_v41, %v1588_v61  ;;  %v5309_v23 = vld [vmem:[#allocation36_spill] sm:$0xff]  ;;  %v1479_v61 = vmul.f32 %v5310_v12, %v4091_v15 }
 0x201   :  { %v1431_v8 = vpop.permute.xlu2 %1430  ;;  %v4509_v9 = vadd.f32 %v4499_v5, %v5309_v23  ;;  %v1399_v18 = vadd.f32 %v1383_v39, %v1286_v57  ;;  %v1651_v57 = vsub.f32 0.0, %v4537_v43  ;;  %v1652_v23 = vsub.f32 0.0, %v4540_v20  ;;  %v5313_v39 = vld [vmem:[#allocation82_spill] sm:$0xff] }
 0x202   :  { %v1475_v33 = vmul.f32 %v1431_v8, %v5306_v28  ;;  %v5311_v8 = vld [vmem:[#allocation86_spill] sm:$0xff]  ;;  %v1591_v12 = vmul.f32 %v5313_v39, %v5304_v11 }
 0x203   :  { %v1592_v16 = vmul.f32 %v5311_v8, %v4203_v10  ;;  %v1792_v28 = vld [vmem:[%s5033_s8 + $0x50] sm:$0xff]  ;;  %v1655_v15 = vsub.f32 0.0, %v4509_v9  ;;  %v1496_v10 = vmul.f32 %v3781_v21, %v1479_v61  ;;  %v739_v61 = vmul.f32 %v5314_v48, %v5276_v45 }
 0x204   :  { %v1492_v49 = vmul.f32 %v3781_v21, %v1475_v33  ;;  %v1427_v50 = vpop.permute.xlu1 %1426  ;;  %v1791_v33 = vld [vmem:[%s5033_s8 + $0x48] sm:$0xff]  ;;  %1812 = vmatpush.msrb.mxu0 %v1792_v28  ;;  %v1667_v8 = vmul.f32 1.442695, %v1651_v57  ;;  %v1669_v28 = vmul.f32 1.442695, %v1652_v23  ;;  %v1593_v45 = vmul.f32 %v4451_v63, %v4212_v36  ;;  %v5317_v36 = vld [vmem:[#allocation47_spill] sm:$0xff] }
 0x205   :  { %v1474_v3 = vmul.f32 %v1427_v50, %v5308_v32  ;;  %v1512_v50 = vadd.f32 %v1496_v10, %v1399_v18  ;;  %v1675_v2 = vmul.f32 1.442695, %v1655_v15  ;;  %v4558_v15 = vadd.f32 %v4499_v5, %v4343_v38  ;;  %v5316_v11 = vld [vmem:[#allocation70_spill] sm:$0xff]  ;;  %v1790_v38 = vld [vmem:[%s5033_s8 + $0x40] sm:$0xff]  ;;  %v5318_v48 = vld [vmem:[#allocation23_spill] sm:$0xff] }
 0x206   :  { %v1508_v7 = vadd.f32 %v1492_v49, %v1395_v1  ;;  %1813 = vmatpush.msrb.mxu0 %v1791_v33  ;;  %v998_v10 = vmul.f32 %v5316_v11, %v4288_v59  ;;  %v1111_v63 = vmul.f32 %v5317_v36, %v4231_v17 }
 0x207   :  { %v1491_v47 = vmul.f32 %v3781_v21, %v1474_v3  ;;  %2797 = vpow2.f32 %v1675_v2  ;;  %v1654_v57 = vsub.f32 0.0, %v4558_v15 }
 0x208   :  { %v4511_v42 = vadd.f32 %v1605_v0, %v1508_v7  ;;  %v1653_v0 = vsub.f32 0.0, %v4524_v24  ;;  %1814 = vmatpush.msrb.mxu0 %v1790_v38 }
 0x209   :  { %v4520_v1 = vadd.f32 %v1491_v47, %v4393_v19  ;;  %v1609_v19 = vmul.f32 %v4015_v41, %v1592_v16  ;;  %v5315_v16 = vld [vmem:[#allocation34_spill] sm:$0xff] }
 0x20a   :  { %v1671_v32 = vmul.f32 1.442695, %v1653_v0  ;;  %v1572_v3 = vpop.permute.xlu2 %1571  ;;  %v852_v27 = vmul.f32 %v5315_v16, %v4147_v56  ;;  %v756_v0 = vmul.f32 %v3655_v26, %v739_v61  ;;  %v1015_v26 = vmul.f32 %v3694_v40, %v998_v10 }
 0x20b   :  { %v1625_v7 = vadd.f32 %v1609_v19, %v1512_v50  ;;  %v1608_v19 = vmul.f32 %v4015_v41, %v1591_v12  ;;  %v1482_v61 = vmul.f32 %v4432_v51, %v5318_v48  ;;  %v4588_v51 = vadd.f32 %v4499_v5, %v4369_v31 }
 0x20c   :  { %2799 = vpow2.f32 %v1671_v32  ;;  %v869_v2 = vmul.f32 %v3674_v6, %v852_v27  ;;  %v5319_v27 = vld [vmem:[#allocation30_spill] sm:$0xff] }
 0x20d   :  { %v1568_v49 = vpop.permute.xlu1 %1567  ;;  %v4545_v47 = vadd.f32 %v4499_v5, %v1625_v7  ;;  %v2798_v33 = vpop.eup %2797  ;;  %2801 = vpow2.f32 %v1667_v8  ;;  %v1624_v6 = vadd.f32 %v1608_v19, %v4352_v44  ;;  %v1610_v8 = vmul.f32 %v4015_v41, %v1593_v45 }
 0x20e   :  { %v1703_v50 = vadd.f32 1.0, %v2798_v33  ;;  %2803 = vpow2.f32 %v1669_v28  ;;  %v1594_v23 = vmul.f32 %v1568_v49, %v4288_v59  ;;  %v885_v12 = vadd.f32 %v869_v2, %v756_v0 }
 0x20f   :  { %v1661_v18 = vsub.f32 0.0, %v4545_v47  ;;  %v1257_v40 = vmul.f32 %v5319_v27, %v4267_v30  ;;  %v1673_v28 = vmul.f32 1.442695, %v1654_v57  ;;  %v4591_v11 = vadd.f32 %v4499_v5, %v1624_v6 }
 0x210   :  { %2805 = vrcp.f32 %v1703_v50  ;;  %v1031_v17 = vadd.f32 %v1015_v26, %v885_v12  ;;  %v1611_v44 = vmul.f32 %v4015_v41, %v1594_v23  ;;  %v1626_v19 = vadd.f32 %v1610_v8, %v4315_v46  ;;  %v5320_v23 = vld [vmem:[#allocation35_spill] sm:$0xff]  ;;  %v5322_v8 = vld [vmem:[#allocation57_spill] sm:$0xff] }
 0x211   :  { %v1687_v32 = vmul.f32 1.442695, %v1661_v18  ;;  %v1128_v18 = vmul.f32 %v3722_v53, %v1111_v63  ;;  %v1595_v0 = vmul.f32 %v1572_v3, %v4267_v30  ;;  %v1274_v45 = vmul.f32 %v3757_v60, %v1257_v40  ;;  %v1789_v63 = vld [vmem:[%s5033_s8 + $0x38] sm:$0xff] }
 0x212   :  { %v2800_v56 = vpop.eup %2799  ;;  %v4600_v53 = vadd.f32 %v4499_v5, %v4511_v42  ;;  %v1627_v2 = vadd.f32 %v1611_v44, %v4434_v14  ;;  %v1659_v46 = vsub.f32 0.0, %v4588_v51  ;;  %v1660_v30 = vsub.f32 0.0, %v4591_v11  ;;  %1815 = vmatpush.msrb.mxu0 %v1789_v63 }
 0x213   :  { %v4567_v7 = vpop.permute.xlu2 %1466  ;;  %v1701_v39 = vadd.f32 1.0, %v2800_v56  ;;  %v2802_v49 = vpop.eup %2801  ;;  %2807 = vpow2.f32 %v1687_v32  ;;  %v1144_v50 = vadd.f32 %v1128_v18, %v1031_v17  ;;  %v1161_v42 = vmul.f32 %v3697_v54, %v5318_v48  ;;  %v5321_v48 = vld [vmem:[#allocation9_spill] sm:$0xff] }
 0x214   :  { %v2804_v33 = vpop.eup %2803  ;;  %v1699_v56 = vadd.f32 1.0, %v2802_v49  ;;  %v1370_v3 = vmul.f32 %v4395_v29, %v4275_v58  ;;  %v4618_v14 = vadd.f32 %v4499_v5, %v1626_v19  ;;  %v1612_v26 = vmul.f32 %v4015_v41, %v1595_v0 }
 0x215   :  { %2809 = vrcp.f32 %v1701_v39  ;;  %v1700_v38 = vadd.f32 1.0, %v2804_v33  ;;  %v1657_v6 = vsub.f32 0.0, %v4600_v53  ;;  %v4632_v29 = vadd.f32 %v4499_v5, %v1627_v2 }
 0x216   :  { %v4549_v52 = vpop.permute.xlu1 %1353  ;;  %2811 = vpow2.f32 %v1673_v28  ;;  %v4604_v32 = vpop.eup %2805  ;;  %v1683_v27 = vmul.f32 1.442695, %v1659_v46  ;;  %v1685_v40 = vmul.f32 1.442695, %v1660_v30  ;;  %v1177_v49 = vadd.f32 %v1161_v42, %v1144_v50 }
 0x217   :  { %v1371_v54 = vmul.f32 %v4549_v52, %v4366_v13  ;;  %2813 = vrcp.f32 %v1699_v56  ;;  %v1387_v52 = vmul.f32 %v3751_v55, %v1370_v3  ;;  %v1662_v28 = vsub.f32 0.0, %v4618_v14 }
 0x218   :  { %2815 = vrcp.f32 %v1700_v38  ;;  %v1679_v33 = vmul.f32 1.442695, %v1657_v6  ;;  %v1484_v18 = vmul.f32 %v4567_v7, %v5267_v35  ;;  %v1290_v2 = vadd.f32 %v1274_v45, %v1177_v49 }
 0x219   :  { %v1689_v46 = vmul.f32 1.442695, %v1662_v28 }
 0x21a   :  { %v1501_v7 = vmul.f32 %v3781_v21, %v1484_v18  ;;  %v1403_v30 = vadd.f32 %v1387_v52, %v1290_v2 }
 0x21c   :  { %v1548_v57 = vpop.permute.xlu2 %1547 }
 0x21f   :  { %v1540_v16 = vpop.permute.xlu1 %1539 }
 0x220   :  { %v1587_v59 = vmul.f32 %v1540_v16, %v3961_v22  ;;  %v1499_v22 = vmul.f32 %v3781_v21, %v1482_v61  ;;  %v1589_v61 = vmul.f32 %v1548_v57, %v5321_v48 }
 0x222   :  { %v1604_v10 = vmul.f32 %v4015_v41, %v1587_v59  ;;  %v1515_v36 = vadd.f32 %v1499_v22, %v5320_v23  ;;  %v1663_v22 = vsub.f32 0.0, %v4632_v29  ;;  %v1606_v19 = vmul.f32 %v4015_v41, %v1589_v61  ;;  %v1788_v41 = vld [vmem:[%s5033_s8 + $0x30] sm:$0xff] }
 0x223   :  { %1816 = vmatpush.msrb.mxu0 %v1788_v41 }
 0x224   :  { %v1620_v31 = vadd.f32 %v1604_v10, %v4520_v1  ;;  %v4613_v1 = vpop.eup %2807  ;;  %v1628_v17 = vadd.f32 %v1612_v26, %v1515_v36  ;;  %v1388_v10 = vmul.f32 %v3751_v55, %v1371_v54 }
 0x225   :  { %v4629_v58 = vpop.eup %2809 }
 0x226   :  { %v4609_v60 = vadd.f32 %v4499_v5, %v1620_v31  ;;  %v2812_v13 = vpop.eup %2811  ;;  %v5323_v31 = vld [vmem:[#allocation79_spill] sm:$0xff]  ;;  %v4648_v35 = vadd.f32 %v4499_v5, %v1628_v17 }
 0x227   :  { %v1483_v56 = vmul.f32 %v5323_v31, %v4237_v25  ;;  %v2814_v50 = vpop.eup %2813  ;;  %v1702_v57 = vadd.f32 1.0, %v2812_v13  ;;  %v1404_v25 = vadd.f32 %v1388_v10, %v4449_v37 }
 0x228   :  { %v1656_v39 = vsub.f32 0.0, %v4609_v60  ;;  %v1435_v12 = vpop.permute.xlu1 %1434  ;;  %v2816_v38 = vpop.eup %2815  ;;  %v4661_v63 = vmul.f32 %v2814_v50, %v4537_v43  ;;  %v1664_v37 = vsub.f32 0.0, %v4648_v35 }
 0x229   :  { %v1476_v16 = vmul.f32 %v1435_v12, %v5322_v8  ;;  %v1500_v3 = vmul.f32 %v3781_v21, %v1483_v56  ;;  %v1517_v36 = vadd.f32 %v1501_v7, %v1404_v25  ;;  %v4664_v6 = vmul.f32 %v2816_v38, %v4540_v20  ;;  %v1785_v56 = vld [vmem:[%s5033_s8 + $0x18] sm:$0xff]  ;;  %v1783_v25 = vld [vmem:[%s5033_s8 + $0x8] sm:$0xff] }
 0x22a   :  { %v1677_v59 = vmul.f32 1.442695, %v1656_v39  ;;  %v1709_v20 = vadd.f32 1.0, %v4613_v1 }
 0x22b   :  { %v1493_v44 = vmul.f32 %v3781_v21, %v1476_v16  ;;  %v1516_v21 = vadd.f32 %v1500_v3, %v1403_v30  ;;  %v1747_v16 = vadd.f32 %v4664_v6, %v4661_v63 }
 0x22c   :  { %2817 = vpow2.f32 %v1677_v59  ;;  %v4676_v59 = vmul.f32 %v4629_v58, %v4524_v24  ;;  %v1787_v24 = vld [vmem:[%s5033_s8 + $0x28] sm:$0xff]  ;;  %v1786_v58 = vld [vmem:[%s5033_s8 + $0x20] sm:$0xff] }
 0x22d   :  { %v1509_v0 = vadd.f32 %v1493_v44, %v4478_v62  ;;  %2819 = vpow2.f32 %v1685_v40  ;;  %v1691_v62 = vmul.f32 1.442695, %v1663_v22  ;;  %v1693_v40 = vmul.f32 1.442695, %v1664_v37  ;;  %1817 = vmatpush.msrb.mxu0 %v1787_v24 }
 0x22e   :  { %2821 = vpow2.f32 %v1679_v33  ;;  %v1748_v18 = vadd.f32 %v1747_v16, %v4676_v59 }
 0x22f   :  { %v1622_v55 = vadd.f32 %v1606_v19, %v1509_v0  ;;  %2823 = vpow2.f32 %v1683_v27  ;;  %1818 = vmatpush.msrb.mxu0 %v1786_v58 }
 0x230   :  { %2825 = vrcp.f32 %v1702_v57 }
 0x231   :  { %v4656_v45 = vadd.f32 %v4499_v5, %v1622_v55  ;;  %v1576_v42 = vpop.permute.xlu1 %1575  ;;  %2827 = vpow2.f32 %v1689_v46  ;;  %v1784_v46 = vld [vmem:[%s5033_s8 + $0x10] sm:$0xff]  ;;  %1819 = vmatpush.msrb.mxu0 %v1785_v56  ;;  %v1842_v56 = vld [vmem:[%s5035_s10 + $0x48] sm:$0xff] }
 0x232   :  { %v2818_v26 = vpop.eup %2817  ;;  %v1596_v23 = vmul.f32 %v1576_v42, %v4405_v4  ;;  %v2946_v4 = vld [vmem:[%s5031_s6 + $0x8] ss:$0 sm:$0xff]  ;;  %2829 = vpow2.f32 %v1691_v62  ;;  %v4711_v62 = vmul.f32 %v4604_v32, %v4509_v9 }
 0x233   :  { %v1704_v54 = vadd.f32 1.0, %v2818_v26  ;;  %v1658_v39 = vsub.f32 0.0, %v4656_v45  ;;  %v2820_v12 = vpop.eup %2819  ;;  %1820 = vmatpush.msrb.mxu0 %v1784_v46 }
 0x234   :  { %v1613_v48 = vmul.f32 %v2946_v4, %v1596_v23  ;;  %v2822_v61 = vpop.eup %2821  ;;  %v1708_v49 = vadd.f32 1.0, %v2820_v12 }
 0x235   :  { %v1681_v43 = vmul.f32 1.442695, %v1658_v39  ;;  %2831 = vrcp.f32 %v1704_v54  ;;  %v2824_v27 = vpop.eup %2823  ;;  %v1705_v28 = vadd.f32 1.0, %v2822_v61  ;;  %1821 = vmatpush.msrb.mxu0 %v1783_v25 }
 0x236   :  { %v1629_v8 = vadd.f32 %v1613_v48, %v1516_v21  ;;  %v2826_v52 = vpop.eup %2825  ;;  %v1707_v22 = vadd.f32 1.0, %v2824_v27  ;;  %v2981_v27 = vmov 64.0  }
 0x237   :  { %2833 = vpow2.f32 %v1681_v43  ;;  %v2828_v1 = vpop.eup %2827  ;;  %v4691_v0 = vmul.f32 %v2826_v52, %v4558_v15 }
 0x238   :  { %v4679_v13 = vadd.f32 %v4499_v5, %v1629_v8  ;;  %2835 = vrcp.f32 %v1709_v20  ;;  %v2830_v10 = vpop.eup %2829  ;;  %v1710_v2 = vadd.f32 1.0, %v2828_v1 }
 0x239   :  { %v1580_v17 = vpop.permute.xlu1 %1579  ;;  %2837 = vpow2.f32 %v1693_v40  ;;  %v1749_v15 = vadd.f32 %v1748_v18, %v4691_v0  ;;  %v1711_v55 = vadd.f32 1.0, %v2830_v10  ;;  %v1846_v40 = vld [vmem:[%s5035_s10 + $0x68] sm:$0xff]  ;;  %v1843_v10 = vld [vmem:[%s5035_s10 + $0x50] sm:$0xff] }
 0x23a   :  { %v1665_v44 = vsub.f32 0.0, %v4679_v13  ;;  %v1597_v33 = vmul.f32 %v1580_v17, %v5282_v34  ;;  %2839 = vrcp.f32 %v1708_v49  ;;  %v1845_v17 = vld [vmem:[%s5035_s10 + $0x60] sm:$0xff] }
 0x23b   :  { %v2832_v19 = vpop.eup %2831  ;;  %2841 = vrcp.f32 %v1705_v28 }
 0x23c   :  { %v1695_v34 = vmul.f32 1.442695, %v1665_v44  ;;  %v1614_v31 = vmul.f32 %v2946_v4, %v1597_v33  ;;  %v4701_v30 = vmul.f32 %v2832_v19, %v4609_v60  ;;  %v1782_v60 = vld [vmem:[%s5033_s8] sm:$0xff] }
 0x23d   :  { %v2834_v50 = vpop.eup %2833  ;;  %1822 = vmatpush.msrb.mxu0 %v1782_v60  ;;  %v1837_v60 = vld [vmem:[%s5035_s10 + $0x20] sm:$0xff] }
 0x23e   :  { %v1706_v38 = vadd.f32 1.0, %v2834_v50  ;;  %2843 = vpow2.f32 %v1695_v34  ;;  %v1630_v57 = vadd.f32 %v1614_v31, %v1517_v36  ;;  %v2836_v7 = vpop.eup %2835 }
 0x23f   :  { %2845 = vrcp.f32 %v1707_v22  ;;  %v2838_v42 = vpop.eup %2837  ;;  %v4729_v61 = vmul.f32 %v2836_v7, %v4545_v47  ;;  %v1839_v7 = vld [vmem:[%s5035_s10 + $0x30] sm:$0xff] }
 0x240   :  { %2847 = vrcp.f32 %v1706_v38  ;;  %v4704_v41 = vadd.f32 %v4499_v5, %v1630_v57  ;;  %v2840_v3 = vpop.eup %2839  ;;  %v1750_v5 = vadd.f32 %v1749_v15, %v4711_v62  ;;  %v1712_v37 = vadd.f32 1.0, %v2838_v42  ;;  %v1841_v38 = vld [vmem:[%s5035_s10 + $0x40] sm:$0xff]  ;;  %v1840_v15 = vld [vmem:[%s5035_s10 + $0x38] sm:$0xff] }
 0x241   :  { %2849 = vrcp.f32 %v1710_v2  ;;  %v2842_v23 = vpop.eup %2841  ;;  %v4723_v4 = vmul.f32 %v2840_v3, %v4591_v11  ;;  %v1848_v11 = vld [vmem:[%s5035_s10 + $0x78] sm:$0xff] }
 0x242   :  { %v1666_v26 = vsub.f32 0.0, %v4704_v41  ;;  %2851 = vrcp.f32 %v1711_v55  ;;  %v1751_v9 = vadd.f32 %v1750_v5, %v4701_v30  ;;  %v4720_v21 = vmul.f32 %v2842_v23, %v4600_v53  ;;  %v1847_v53 = vld [vmem:[%s5035_s10 + $0x70] sm:$0xff]  ;;  %1853 = vmatpush.msrb.mxu1 %v1848_v11 }
 0x243   :  { %v1835_v11 = vld [vmem:[%s5035_s10 + $0x10] sm:$0xff] }
 0x244   :  { %v2844_v36 = vpop.eup %2843  ;;  %v1697_v54 = vmul.f32 1.442695, %v1666_v26  ;;  %v1752_v8 = vadd.f32 %v1751_v9, %v4720_v21  ;;  %1854 = vmatpush.msrb.mxu1 %v1847_v53  ;;  %v1834_v53 = vld [vmem:[%s5035_s10 + $0x8] sm:$0xff] }
 0x245   :  { %v2846_v32 = vpop.eup %2845  ;;  %v1713_v39 = vadd.f32 1.0, %v2844_v36 }
 0x246   :  { %v2848_v12 = vpop.eup %2847  ;;  %2853 = vpow2.f32 %v1697_v54  ;;  %v4732_v20 = vmul.f32 %v2846_v32, %v4588_v51  ;;  %1855 = vmatpush.msrb.mxu1 %v1846_v40 }
 0x247   :  { %v2850_v48 = vpop.eup %2849  ;;  %v4726_v43 = vmul.f32 %v2848_v12, %v4656_v45  ;;  %2855 = vrcp.f32 %v1712_v37  ;;  %v1836_v37 = vld [vmem:[%s5035_s10 + $0x18] sm:$0xff] }
 0x248   :  { %v2852_v16 = vpop.eup %2851  ;;  %2857 = vrcp.f32 %v1713_v39  ;;  %v4742_v45 = vmul.f32 %v2850_v48, %v4618_v14  ;;  %v1760_v47 = vadd.f32 %v4723_v4, %v4732_v20  ;;  %1856 = vmatpush.msrb.mxu1 %v1845_v17 }
 0x249   :  { %v1753_v51 = vadd.f32 %v1752_v8, %v4726_v43  ;;  %2859 = vrcp.f32 %v2981_v27  ;;  %v4751_v52 = vmul.f32 %v2852_v16, %v4632_v29  ;;  %v1844_v29 = vld [vmem:[%s5035_s10 + $0x58] sm:$0xff]  ;;  %v2664_v27 = vld [vmem:[%s5034_s9] ss:$0 sm:$0xff] }
 0x24a   :  { %v1761_v28 = vadd.f32 %v1760_v47, %v4729_v61  ;;  %1857 = vmatpush.msrb.mxu1 %v1844_v29  ;;  %v1833_v47 = vld [vmem:[%s5035_s10] sm:$0xff]  ;;  %v2539_v29 = vld [vmem:[%s5037_s12 + $0x28] sm:$0xff] }
 0x24b   :  { %v1754_v33 = vrot.slane %v1753_v51, 4 }
 0x24c   :  { %v2854_v49 = vpop.eup %2853  ;;  %v1762_v44 = vadd.f32 %v1761_v28, %v4742_v45  ;;  %1858 = vmatpush.msrb.mxu1 %v1843_v10 }
 0x24d   :  { %v1714_v14 = vadd.f32 1.0, %v2854_v49  ;;  %v2856_v1 = vpop.eup %2855  ;;  %v1755_v34 = vadd.f32 %v1754_v33, %v1753_v51  ;;  %v2541_v51 = vld [vmem:[%s5037_s12 + $0x38] sm:$0xff] }
 0x24e   :  { %v2858_v18 = vpop.eup %2857  ;;  %v1763_v58 = vadd.f32 %v1762_v44, %v4751_v52  ;;  %v4766_v22 = vmul.f32 %v2856_v1, %v4648_v35  ;;  %1859 = vmatpush.msrb.mxu1 %v1842_v56  ;;  %1976 = vmatpush.bf16.msra.mxu2 %v2541_v51  ;;  %v2537_v56 = vld [vmem:[%s5037_s12 + $0x18] sm:$0xff] }
 0x24f   :  { %2861 = vrcp.f32 %v1714_v14  ;;  %v2860_v24 = vpop.eup %2859  ;;  %v4769_v19 = vmul.f32 %v2858_v18, %v4679_v13  ;;  %v1756_v57 = vrot.slane %v1755_v34, 2  ;;  %v2540_v18 = vld [vmem:[%s5037_s12 + $0x30] sm:$0xff] }
 0x250   :  { %v1774_v31 = vmul.f32 64.0, %v2860_v24  ;;  %v1764_v50 = vadd.f32 %v1763_v58, %v4766_v22  ;;  %1860 = vmatpush.msrb.mxu1 %v1841_v38  ;;  %vm1778_vm3 = vweird.f32 %v2860_v24  ;;  %v2538_v58 = vld [vmem:[%s5037_s12 + $0x20] sm:$0xff]  ;;  %v2535_v38 = vld [vmem:[%s5037_s12 + $0x8] sm:$0xff] }
 0x251   :  { %v1757_v42 = vadd.f32 %v1756_v57, %v1755_v34 }
 0x252   :  { %v1765_v35 = vadd.f32 %v1764_v50, %v4769_v19  ;;  %v1775_v46 = vsub.f32 1.0, %v1774_v31  ;;  %1861 = vmatpush.msrb.mxu1 %v1840_v15  ;;  %1977 = vmatpush.bf16.msra.mxu2 %v2540_v18 }
 0x253   :  { %v1758_v5 = vrot.slane %v1757_v42, 1 }
 0x254   :  { %v1776_v3 = vmul.f32 %v2860_v24, %v1775_v46  ;;  %1862 = vmatpush.msrb.mxu1 %v1839_v7  ;;  %v2534_v46 = vld [vmem:[%s5037_s12] sm:$0xff] }
 0x255   :  { %v2862_v2 = vpop.eup %2861  ;;  %v1759_v9 = vadd.f32 %v1758_v5, %v1757_v42 }
 0x256   :  { %v4780_v13 = vmul.f32 %v2862_v2, %v4704_v41  ;;  %v1838_v41 = vld [vmem:[%s5035_s10 + $0x28] sm:$0xff]  ;;  %v1777_v36 = vadd.f32 %v2860_v24, %v1776_v3  ;;  %1978 = vmatpush.bf16.msra.mxu2 %v2539_v29  ;;  %v2536_v2 = vld [vmem:[%s5037_s12 + $0x10] sm:$0xff] }
 0x257   :  { %1863 = vmatpush.msrb.mxu1 %v1838_v41 }
 0x258   :  { %v1766_v55 = vadd.f32 %v1765_v35, %v4780_v13  ;;  %v4798_v39 = vsel %vm1778_vm3, %v2860_v24, %v1777_v36  ;;  %v2665_v24 = vld [vmem:[%s5036_s11] ss:$0 sm:$0xff] }
 0x259   :  { %1864 = vmatpush.msrb.mxu1 %v1837_v60  ;;  %v1780_v48 = vmul.f32 %v4798_v39, %v1759_v9 }
 0x25a   :  { %v1767_v25 = vrot.slane %v1766_v55, 4  ;;  %1979 = vmatpush.bf16.msra.mxu2 %v2538_v58 }
 0x25b   :  { %1865 = vmatpush.msrb.mxu1 %v1836_v37 }
 0x25c   :  { %v1768_v26 = vadd.f32 %v1767_v25, %v1766_v55 }
 0x25d   :  { %1866 = vmatpush.msrb.mxu1 %v1835_v11  ;;  %v2543_v11 = vld [vmem:[%s5039_s14 + $0x8] sm:$0xff] }
 0x25e   :  { %v1769_v23 = vrot.slane %v1768_v26, 2  ;;  %1980 = vmatpush.bf16.msra.mxu2 %v2537_v56 }
 0x25f   :  { %1867 = vmatpush.msrb.mxu1 %v1834_v53  ;;  %v2542_v53 = vld [vmem:[%s5039_s14] sm:$0xff] }
 0x260   :  { %v1770_v54 = vadd.f32 %v1769_v23, %v1768_v26 }
 0x261   :  { %1868 = vmatpush.msrb.mxu1 %v1833_v47 }
 0x262   :  { %v1771_v32 = vrot.slane %v1770_v54, 1  ;;  %1981 = vmatpush.bf16.msra.mxu2 %v2536_v2 }
 0x264   :  { %v1772_v12 = vadd.f32 %v1771_v32, %v1770_v54 }
 0x266   :  { %v1781_v8 = vmul.f32 %v4798_v39, %v1772_v12  ;;  %1982 = vmatpush.bf16.msra.mxu2 %v2535_v38 }
 0x268   :  { %v1805_v16 = vsel %vm1804_vm4, %v1781_v8, %v1780_v48  ;;  %v2545_v48 = vld [vmem:[%s5039_s14 + $0x18] sm:$0xff]  ;;  %v2544_v8 = vld [vmem:[%s5039_s14 + $0x10] sm:$0xff] }
 0x269   :  { %1823 = vmatmul.f32.vlgmr.msrb.gmra.mxu0 %v1805_v16 }
 0x26a   :  { %1983 = vmatpush.bf16.msra.mxu2 %v2534_v46  ;;  %v5328_v46 = vld [vmem:[#allocation27_spill] sm:$0xff] }
 0x2e6   :  { %v1824_v40 = vpop.f32.mrf.mxu0 }
 0x2e7   :  { %v1825_v49 = vadd.f32 %v2664_v27, %v1824_v40  ;;  %v5324_v27 = vld [vmem:[#allocation16_spill] sm:$0xff] }
 0x2e8   :  { %v2025_v40 = vunpack.c.l.bf16 %v5324_v27 }
 0x2e9   :  { %v1827_v28 = vsub.f32 0.0, %v1825_v49 }
 0x2eb   :  { %v1828_v14 = vmul.f32 1.442695, %v1827_v28  ;;  %v5325_v28 = vld [vmem:[#allocation18_spill] sm:$0xff] }
 0x2ed   :  { %2863 = vpow2.f32 %v1828_v14  ;;  %v2026_v14 = vunpack.c.l.bf16 %v5325_v28 }
 0x2f3   :  { %v2864_v17 = vpop.eup %2863 }
 0x2f4   :  { %v1830_v1 = vadd.f32 1.0, %v2864_v17 }
 0x2f6   :  { %2865 = vrcp.f32 %v1830_v1 }
 0x2fc   :  { %v2866_v44 = vpop.eup %2865 }
 0x2fd   :  { %v1832_v33 = vmul.f32 %v2866_v44, %v1825_v49 }
 0x2ff   :  { %1869 = vmatmul.f32.vlgmr.msrb.gmra.mxu1 %v1832_v33 }
 0x37c   :  { %v1870_v10 = vpop.f32.mrf.mxu1 }
 0x37d   :  { %v1871_v34 = vadd.f32 %v2665_v24, %v1870_v10  ;;  %v5326_v24 = vld [vmem:[#allocation20_spill] sm:$0xff] }
 0x37e   :  { %v2027_v58 = vunpack.c.l.bf16 %v5326_v24 }
 0x37f   :  { %v1873_v31 = vsub.f32 0.0, %v1871_v34  ;;  %v5327_v34 = vld [vmem:[#allocation22_spill] sm:$0xff] }
 0x381   :  { %v1874_v50 = vmul.f32 1.442695, %v1873_v31  ;;  %v2028_v31 = vunpack.c.l.bf16 %v5327_v34 }
 0x383   :  { %2867 = vpow2.f32 %v1874_v50 }
 0x389   :  { %v2868_v35 = vpop.eup %2867 }
 0x38a   :  { %v1876_v57 = vadd.f32 1.0, %v2868_v35 }
 0x38c   :  { %2869 = vrcp.f32 %v1876_v57 }
 0x392   :  { %v2870_v15 = vpop.eup %2869 }
 0x393   :  { %v1880_v55 = vperm.slane %v2870_v15, 0 }
 0x395   :  { %v1884_v7 = vmul.f32 %v1880_v55, %v4661_v63  ;;  %v1885_v25 = vmul.f32 %v1880_v55, %v4664_v6  ;;  %v1886_v3 = vmul.f32 %v1880_v55, %v4676_v59  ;;  %v1887_v41 = vmul.f32 %v1880_v55, %v4691_v0 }
 0x396   :  { %v1888_v60 = vmul.f32 %v1880_v55, %v4711_v62  ;;  %v1889_v5 = vmul.f32 %v1880_v55, %v4701_v30  ;;  %v1890_v36 = vmul.f32 %v1880_v55, %v4720_v21  ;;  %v1891_v63 = vmul.f32 %v1880_v55, %v4726_v43  ;;  %v2549_v21 = vld [vmem:[%s5039_s14 + $0x38] sm:$0xff]  ;;  %v2548_v43 = vld [vmem:[%s5039_s14 + $0x30] sm:$0xff] }
 0x397   :  { %v1900_v42 = vpack.c.bf16 %v1885_v25, %v1884_v7  ;;  %v1901_v26 = vpack.c.bf16 %v1887_v41, %v1886_v3  ;;  %v1879_v6 = vrot.slane %v2870_v15, 1  ;;  %2133 = vmatpush.bf16.msra.mxu3 %v2549_v21  ;;  %v2029_v15 = vunpack.c.l.bf16 %v5328_v46  ;;  %v5329_v7 = vld [vmem:[#allocation29_spill] sm:$0xff] }
 0x398   :  { %v1902_v23 = vpack.c.bf16 %v1889_v5, %v1888_v60  ;;  %v1903_v37 = vpack.c.bf16 %v1891_v63, %v1890_v36  ;;  %v2030_v25 = vunpack.c.l.bf16 %v5329_v7 }
 0x399   :  { %1984 = vmatmul.bf16.vlgmr.msra.gmra.mxu2 %v1900_v42  ;;  %v1881_v54 = vperm.slane %v1879_v6, 0 }
 0x39b   :  { %v1892_v59 = vmul.f32 %v1881_v54, %v4732_v20  ;;  %v1893_v0 = vmul.f32 %v1881_v54, %v4723_v4  ;;  %v1894_v62 = vmul.f32 %v1881_v54, %v4729_v61  ;;  %v1895_v30 = vmul.f32 %v1881_v54, %v4742_v45  ;;  %2134 = vmatpush.bf16.msra.mxu3 %v2548_v43  ;;  %v2547_v4 = vld [vmem:[%s5039_s14 + $0x28] sm:$0xff]  ;;  %v2546_v45 = vld [vmem:[%s5039_s14 + $0x20] sm:$0xff] }
 0x39c   :  { %v1896_v61 = vmul.f32 %v1881_v54, %v4751_v52  ;;  %v1897_v20 = vmul.f32 %v1881_v54, %v4766_v22  ;;  %v1898_v52 = vmul.f32 %v1881_v54, %v4769_v19  ;;  %v1899_v22 = vmul.f32 %v1881_v54, %v4780_v13  ;;  %v4885_v19 = vld [vmem:[%s5038_s13] ss:$0 sm:$0xff] }
 0x39d   :  { %v1904_v9 = vpack.c.bf16 %v1893_v0, %v1892_v59  ;;  %v1905_v32 = vpack.c.bf16 %v1895_v30, %v1894_v62 }
 0x39e   :  { %v1906_v12 = vpack.c.bf16 %v1897_v20, %v1896_v61  ;;  %v1907_v16 = vpack.c.bf16 %v1899_v22, %v1898_v52  ;;  %v5334_v22 = vld [vmem:[#allocation43_spill] sm:$0xff] }
 0x39f   :  { %2135 = vmatpush.bf16.msra.mxu3 %v2547_v4  ;;  %v5333_v4 = vld [vmem:[#allocation40_spill] sm:$0xff] }
 0x3a0   :  { %v2034_v61 = vunpack.c.l.bf16 %v5333_v4 }
 0x3a3   :  { %2136 = vmatpush.bf16.msra.mxu3 %v2546_v45 }
 0x3a7   :  { %2137 = vmatpush.bf16.msra.mxu3 %v2545_v48 }
 0x3a9   :  { %1989 = vmatmul.bf16.gmra.mxu2 %v1901_v26 }
 0x3ab   :  { %2138 = vmatpush.bf16.msra.mxu3 %v2544_v8 }
 0x3af   :  { %2139 = vmatpush.bf16.msra.mxu3 %v2543_v11 }
 0x3b3   :  { %2140 = vmatpush.bf16.msra.mxu3 %v2542_v53  ;;  %v5335_v53 = vld [vmem:[#allocation44_spill] sm:$0xff] }
 0x3b9   :  { %1994 = vmatmul.bf16.gmra.mxu2 %v1902_v23  ;;  %v5330_v23 = vld [vmem:[#allocation32_spill] sm:$0xff] }
 0x3ba   :  { %v2031_v36 = vunpack.c.l.bf16 %v5330_v23 }
 0x3c9   :  { %1999 = vmatmul.bf16.gmra.mxu2 %v1903_v37  ;;  %v5331_v37 = vld [vmem:[#allocation33_spill] sm:$0xff] }
 0x3ca   :  { %v2032_v6 = vunpack.c.l.bf16 %v5331_v37 }
 0x3d9   :  { %2004 = vmatmul.bf16.gmra.mxu2 %v1904_v9 }
 0x3e9   :  { %2009 = vmatmul.bf16.gmra.mxu2 %v1905_v32  ;;  %v5332_v32 = vld [vmem:[#allocation38_spill] sm:$0xff] }
 0x3ea   :  { %v2033_v21 = vunpack.c.l.bf16 %v5332_v32 }
 0x3f9   :  { %2014 = vmatmul.bf16.gmra.mxu2 %v1906_v12 }
 0x409   :  { %2019 = vmatmul.bf16.gmra.mxu2 %v1907_v16  ;;  %v2035_v16 = vunpack.c.l.bf16 %v5334_v22 }
 0x41c   :  { %v1985_v47 = vpop.f32.mrf.mxu2 }
 0x41d   :  { %v1986_v13 = vadd.f32 %v4885_v19, %v1985_v47  ;;  %v2036_v47 = vunpack.c.l.bf16 %v5335_v53 }
 0x41f   :  { %v2041_v17 = vadd.f32 %v2025_v40, %v1986_v13 }
 0x424   :  { %v1987_v51 = vpop.f32.mrf.mxu2 }
 0x425   :  { %v1988_v49 = vadd.f32 %v4885_v19, %v1987_v51 }
 0x427   :  { %v2042_v1 = vadd.f32 %v2026_v14, %v1988_v49  ;;  %v5336_v14 = vld [vmem:[#allocation49_spill] sm:$0xff] }
 0x429   :  { %v2057_v44 = vpack.c.bf16 %v2042_v1, %v2041_v17  ;;  %v2037_v17 = vunpack.c.l.bf16 %v5336_v14 }
 0x42b   :  { %2141 = vmatmul.bf16.vlgmr.msra.gmra.mxu3 %v2057_v44  ;;  %v5337_v44 = vld [vmem:[#allocation51_spill] sm:$0xff] }
 0x42c   :  { %v1990_v33 = vpop.f32.mrf.mxu2 }
 0x42d   :  { %v1991_v18 = vadd.f32 %v4885_v19, %v1990_v33  ;;  %v2038_v33 = vunpack.c.l.bf16 %v5337_v44 }
 0x42f   :  { %v2043_v56 = vadd.f32 %v2027_v58, %v1991_v18 }
 0x434   :  { %v1992_v29 = vpop.f32.mrf.mxu2 }
 0x435   :  { %v1993_v10 = vadd.f32 %v4885_v19, %v1992_v29 }
 0x437   :  { %v2044_v50 = vadd.f32 %v2028_v31, %v1993_v10  ;;  %v5338_v31 = vld [vmem:[#allocation55_spill] sm:$0xff] }
 0x439   :  { %v2058_v2 = vpack.c.bf16 %v2044_v50, %v2043_v56  ;;  %v2039_v56 = vunpack.c.l.bf16 %v5338_v31 }
 0x43b   :  { %2146 = vmatmul.bf16.gmra.mxu3 %v2058_v2  ;;  %v5339_v2 = vld [vmem:[#allocation58_spill] sm:$0xff] }
 0x43c   :  { %v1995_v38 = vpop.f32.mrf.mxu2 }
 0x43d   :  { %v1996_v35 = vadd.f32 %v4885_v19, %v1995_v38  ;;  %v2040_v38 = vunpack.c.l.bf16 %v5339_v2 }
 0x43f   :  { %v2045_v42 = vadd.f32 %v2029_v15, %v1996_v35  ;;  %v4922_v15 = vld [vmem:[%s5040_s15] ss:$0 sm:$0xff] }
 0x444   :  { %v1997_v57 = vpop.f32.mrf.mxu2 }
 0x445   :  { %v1998_v55 = vadd.f32 %v4885_v19, %v1997_v57 }
 0x447   :  { %v2046_v3 = vadd.f32 %v2030_v25, %v1998_v55 }
 0x449   :  { %v2059_v41 = vpack.c.bf16 %v2046_v3, %v2045_v42 }
 0x44b   :  { %2151 = vmatmul.bf16.gmra.mxu3 %v2059_v41 }
 0x44c   :  { %v2000_v26 = vpop.f32.mrf.mxu2 }
 0x44d   :  { %v2001_v60 = vadd.f32 %v4885_v19, %v2000_v26 }
 0x44f   :  { %v2047_v54 = vadd.f32 %v2031_v36, %v2001_v60 }
 0x454   :  { %v2002_v5 = vpop.f32.mrf.mxu2 }
 0x455   :  { %v2003_v63 = vadd.f32 %v4885_v19, %v2002_v5 }
 0x457   :  { %v2048_v59 = vadd.f32 %v2032_v6, %v2003_v63 }
 0x459   :  { %v2060_v0 = vpack.c.bf16 %v2048_v59, %v2047_v54 }
 0x45b   :  { %2156 = vmatmul.bf16.gmra.mxu3 %v2060_v0 }
 0x45c   :  { %v2005_v9 = vpop.f32.mrf.mxu2 }
 0x45d   :  { %v2006_v62 = vadd.f32 %v4885_v19, %v2005_v9  ;;  %v2321_v9 = vld [vmem:[%s5041_s16 + $0x78] sm:$0xff] }
 0x45e   :  { %2330 = vmatpush.msrb.mxu2 %v2321_v9 }
 0x45f   :  { %v2049_v20 = vadd.f32 %v2033_v21, %v2006_v62 }
 0x464   :  { %v2007_v30 = vpop.f32.mrf.mxu2 }
 0x465   :  { %v2008_v43 = vadd.f32 %v4885_v19, %v2007_v30 }
 0x467   :  { %v2050_v45 = vadd.f32 %v2034_v61, %v2008_v43 }
 0x469   :  { %v2061_v12 = vpack.c.bf16 %v2050_v45, %v2049_v20 }
 0x46b   :  { %2161 = vmatmul.bf16.gmra.mxu3 %v2061_v12 }
 0x46c   :  { %v2010_v48 = vpop.f32.mrf.mxu2 }
 0x46d   :  { %v2011_v8 = vadd.f32 %v4885_v19, %v2010_v48 }
 0x46f   :  { %v2051_v13 = vadd.f32 %v2035_v16, %v2011_v8  ;;  %v2320_v8 = vld [vmem:[%s5041_s16 + $0x70] sm:$0xff] }
 0x470   :  { %2331 = vmatpush.msrb.mxu2 %v2320_v8 }
 0x474   :  { %v2012_v52 = vpop.f32.mrf.mxu2 }
 0x475   :  { %v2013_v11 = vadd.f32 %v4885_v19, %v2012_v52 }
 0x477   :  { %v2052_v51 = vadd.f32 %v2036_v47, %v2013_v11 }
 0x479   :  { %v2062_v27 = vpack.c.bf16 %v2052_v51, %v2051_v13 }
 0x47b   :  { %2166 = vmatmul.bf16.gmra.mxu3 %v2062_v27 }
 0x47c   :  { %v2015_v40 = vpop.f32.mrf.mxu2 }
 0x47d   :  { %v2016_v49 = vadd.f32 %v4885_v19, %v2015_v40  ;;  %v2319_v40 = vld [vmem:[%s5041_s16 + $0x68] sm:$0xff] }
 0x47e   :  { %2332 = vmatpush.msrb.mxu2 %v2319_v40 }
 0x47f   :  { %v2053_v18 = vadd.f32 %v2037_v17, %v2016_v49 }
 0x484   :  { %v2017_v28 = vpop.f32.mrf.mxu2 }
 0x485   :  { %v2018_v1 = vadd.f32 %v4885_v19, %v2017_v28 }
 0x487   :  { %v2054_v29 = vadd.f32 %v2038_v33, %v2018_v1 }
 0x489   :  { %v2063_v24 = vpack.c.bf16 %v2054_v29, %v2053_v18 }
 0x48b   :  { %2171 = vmatmul.bf16.gmra.mxu3 %v2063_v24 }
 0x48c   :  { %v2020_v58 = vpop.f32.mrf.mxu2 }
 0x48d   :  { %v2021_v10 = vadd.f32 %v4885_v19, %v2020_v58 }
 0x48f   :  { %v2055_v35 = vadd.f32 %v2039_v56, %v2021_v10 }
 0x494   :  { %v2022_v34 = vpop.f32.mrf.mxu2 }
 0x495   :  { %v2023_v50 = vadd.f32 %v4885_v19, %v2022_v34 }
 0x497   :  { %v2056_v57 = vadd.f32 %v2040_v38, %v2023_v50 }
 0x499   :  { %v2064_v46 = vpack.c.bf16 %v2056_v57, %v2055_v35  ;;  %v2318_v35 = vld [vmem:[%s5041_s16 + $0x60] sm:$0xff]  ;;  %v2317_v57 = vld [vmem:[%s5041_s16 + $0x58] sm:$0xff] }
 0x49a   :  { %2333 = vmatpush.msrb.mxu2 %v2318_v35 }
 0x49b   :  { %2176 = vmatmul.bf16.gmra.mxu3 %v2064_v46 }
 0x49c   :  { %2334 = vmatpush.msrb.mxu2 %v2317_v57  ;;  %v2310_v57 = vld [vmem:[%s5041_s16 + $0x20] sm:$0xff] }
 0x4ae   :  { %v2142_v55 = vpop.f32.mrf.mxu3 }
 0x4af   :  { %v2143_v7 = vadd.f32 %v4922_v15, %v2142_v55 }
 0x4b1   :  { %v2182_v25 = vsub.f32 0.0, %v2143_v7 }
 0x4b3   :  { %v2198_v42 = vmul.f32 1.442695, %v2182_v25 }
 0x4b5   :  { %2871 = vpow2.f32 %v2198_v42 }
 0x4b6   :  { %v2144_v3 = vpop.f32.mrf.mxu3 }
 0x4b7   :  { %v2145_v19 = vadd.f32 %v4922_v15, %v2144_v3 }
 0x4b9   :  { %v2183_v41 = vsub.f32 0.0, %v2145_v19 }
 0x4bb   :  { %v2200_v26 = vmul.f32 1.442695, %v2183_v41  ;;  %v2872_v60 = vpop.eup %2871 }
 0x4bc   :  { %v2230_v36 = vadd.f32 1.0, %v2872_v60 }
 0x4bd   :  { %2873 = vpow2.f32 %v2200_v26  ;;  %v2316_v26 = vld [vmem:[%s5041_s16 + $0x50] sm:$0xff] }
 0x4be   :  { %v2147_v5 = vpop.f32.mrf.mxu3  ;;  %2875 = vrcp.f32 %v2230_v36  ;;  %2335 = vmatpush.msrb.mxu2 %v2316_v26 }
 0x4bf   :  { %v2148_v23 = vadd.f32 %v4922_v15, %v2147_v5 }
 0x4c1   :  { %v2184_v63 = vsub.f32 0.0, %v2148_v23 }
 0x4c3   :  { %v2874_v37 = vpop.eup %2873  ;;  %v2202_v6 = vmul.f32 1.442695, %v2184_v63 }
 0x4c4   :  { %v2231_v54 = vadd.f32 1.0, %v2874_v37  ;;  %v2876_v30 = vpop.eup %2875 }
 0x4c5   :  { %2877 = vpow2.f32 %v2202_v6  ;;  %v2262_v61 = vmul.f32 %v2876_v30, %v2143_v7  ;;  %v2315_v6 = vld [vmem:[%s5041_s16 + $0x48] sm:$0xff] }
 0x4c6   :  { %2879 = vrcp.f32 %v2231_v54  ;;  %v2149_v59 = vpop.f32.mrf.mxu3  ;;  %2336 = vmatpush.msrb.mxu2 %v2315_v6 }
 0x4c7   :  { %v2150_v0 = vadd.f32 %v4922_v15, %v2149_v59 }
 0x4c9   :  { %v2185_v62 = vsub.f32 0.0, %v2150_v0 }
 0x4cb   :  { %v2878_v32 = vpop.eup %2877  ;;  %v2204_v21 = vmul.f32 1.442695, %v2185_v62  ;;  %v2314_v62 = vld [vmem:[%s5041_s16 + $0x40] sm:$0xff] }
 0x4cc   :  { %v2880_v43 = vpop.eup %2879  ;;  %v2232_v4 = vadd.f32 1.0, %v2878_v32  ;;  %2337 = vmatpush.msrb.mxu2 %v2314_v62  ;;  %v2313_v32 = vld [vmem:[%s5041_s16 + $0x38] sm:$0xff] }
 0x4cd   :  { %v2263_v20 = vmul.f32 %v2880_v43, %v2145_v19  ;;  %2881 = vpow2.f32 %v2204_v21 }
 0x4ce   :  { %2883 = vrcp.f32 %v2232_v4  ;;  %v2152_v45 = vpop.f32.mrf.mxu3  ;;  %2338 = vmatpush.msrb.mxu2 %v2313_v32 }
 0x4cf   :  { %v2278_v12 = vadd.f32 %v2263_v20, %v2262_v61  ;;  %v2153_v48 = vadd.f32 %v4922_v15, %v2152_v45  ;;  %v2312_v20 = vld [vmem:[%s5041_s16 + $0x30] sm:$0xff] }
 0x4d0   :  { %2339 = vmatpush.msrb.mxu2 %v2312_v20 }
 0x4d1   :  { %v2186_v52 = vsub.f32 0.0, %v2153_v48 }
 0x4d3   :  { %v2882_v22 = vpop.eup %2881  ;;  %v2206_v16 = vmul.f32 1.442695, %v2186_v52 }
 0x4d4   :  { %v2884_v11 = vpop.eup %2883  ;;  %v2233_v53 = vadd.f32 1.0, %v2882_v22 }
 0x4d5   :  { %v2264_v47 = vmul.f32 %v2884_v11, %v2148_v23  ;;  %2885 = vpow2.f32 %v2206_v16 }
 0x4d6   :  { %2887 = vrcp.f32 %v2233_v53  ;;  %v2154_v13 = vpop.f32.mrf.mxu3 }
 0x4d7   :  { %v2279_v51 = vadd.f32 %v2278_v12, %v2264_v47  ;;  %v2155_v27 = vadd.f32 %v4922_v15, %v2154_v13 }
 0x4d9   :  { %v2187_v49 = vsub.f32 0.0, %v2155_v27 }
 0x4db   :  { %v2886_v28 = vpop.eup %2885  ;;  %v2208_v14 = vmul.f32 1.442695, %v2187_v49 }
 0x4dc   :  { %v2888_v17 = vpop.eup %2887  ;;  %v2234_v1 = vadd.f32 1.0, %v2886_v28 }
 0x4dd   :  { %v2265_v44 = vmul.f32 %v2888_v17, %v2150_v0  ;;  %2889 = vpow2.f32 %v2208_v14 }
 0x4de   :  { %2891 = vrcp.f32 %v2234_v1  ;;  %v2157_v33 = vpop.f32.mrf.mxu3 }
 0x4df   :  { %v2280_v18 = vadd.f32 %v2279_v51, %v2265_v44  ;;  %v2158_v29 = vadd.f32 %v4922_v15, %v2157_v33 }
 0x4e1   :  { %v2188_v24 = vsub.f32 0.0, %v2158_v29 }
 0x4e3   :  { %v2890_v58 = vpop.eup %2889  ;;  %v2210_v10 = vmul.f32 1.442695, %v2188_v24 }
 0x4e4   :  { %v2892_v34 = vpop.eup %2891  ;;  %v2235_v31 = vadd.f32 1.0, %v2890_v58 }
 0x4e5   :  { %v2266_v56 = vmul.f32 %v2892_v34, %v2153_v48  ;;  %2893 = vpow2.f32 %v2210_v10 }
 0x4e6   :  { %2895 = vrcp.f32 %v2235_v31  ;;  %v2159_v50 = vpop.f32.mrf.mxu3 }
 0x4e7   :  { %v2281_v2 = vadd.f32 %v2280_v18, %v2266_v56  ;;  %v2160_v38 = vadd.f32 %v4922_v15, %v2159_v50 }
 0x4e9   :  { %v2189_v46 = vsub.f32 0.0, %v2160_v38 }
 0x4eb   :  { %v2894_v55 = vpop.eup %2893  ;;  %v2212_v7 = vmul.f32 1.442695, %v2189_v46  ;;  %v2309_v46 = vld [vmem:[%s5041_s16 + $0x18] sm:$0xff] }
 0x4ec   :  { %v2896_v25 = vpop.eup %2895  ;;  %v2236_v42 = vadd.f32 1.0, %v2894_v55 }
 0x4ed   :  { %v2267_v3 = vmul.f32 %v2896_v25, %v2155_v27  ;;  %2897 = vpow2.f32 %v2212_v7  ;;  %v2311_v27 = vld [vmem:[%s5041_s16 + $0x28] sm:$0xff]  ;;  %v2308_v25 = vld [vmem:[%s5041_s16 + $0x10] sm:$0xff] }
 0x4ee   :  { %2899 = vrcp.f32 %v2236_v42  ;;  %v2162_v19 = vpop.f32.mrf.mxu3  ;;  %2340 = vmatpush.msrb.mxu2 %v2311_v27 }
 0x4ef   :  { %v2282_v41 = vadd.f32 %v2281_v2, %v2267_v3  ;;  %v4965_v43 = vadd.f32 %v4922_v15, %v2162_v19  ;;  %v2307_v19 = vld [vmem:[%s5041_s16 + $0x8] sm:$0xff] }
 0x4f0   :  { %2341 = vmatpush.msrb.mxu2 %v2310_v57 }
 0x4f1   :  { %v2190_v48 = vsub.f32 0.0, %v4965_v43 }
 0x4f2   :  { %2342 = vmatpush.msrb.mxu2 %v2309_v46 }
 0x4f3   :  { %v2898_v60 = vpop.eup %2897  ;;  %v2214_v11 = vmul.f32 1.442695, %v2190_v48 }
 0x4f4   :  { %v2900_v5 = vpop.eup %2899  ;;  %v2237_v23 = vadd.f32 1.0, %v2898_v60  ;;  %2343 = vmatpush.msrb.mxu2 %v2308_v25 }
 0x4f5   :  { %v2268_v36 = vmul.f32 %v2900_v5, %v2158_v29  ;;  %v2306_v5 = vld [vmem:[%s5041_s16] sm:$0xff] }
 0x4f6   :  { %2901 = vrcp.f32 %v2237_v23  ;;  %v2164_v63 = vpop.f32.mrf.mxu3  ;;  %2344 = vmatpush.msrb.mxu2 %v2307_v19 }
 0x4f7   :  { %v2283_v37 = vadd.f32 %v2282_v41, %v2268_v36  ;;  %v4962_v21 = vadd.f32 %v4922_v15, %v2164_v63 }
 0x4f8   :  { %2345 = vmatpush.msrb.mxu2 %v2306_v5 }
 0x4f9   :  { %v2191_v45 = vsub.f32 0.0, %v4962_v21 }
 0x4fb   :  { %v2216_v22 = vmul.f32 1.442695, %v2191_v45 }
 0x4fc   :  { %v2902_v54 = vpop.eup %2901 }
 0x4fd   :  { %v2269_v59 = vmul.f32 %v2902_v54, %v2160_v38  ;;  %2903 = vpow2.f32 %v2216_v22 }
 0x4fe   :  { %v2167_v0 = vpop.f32.mrf.mxu3  ;;  %2905 = vpow2.f32 %v2214_v11 }
 0x4ff   :  { %v4953_v9 = vadd.f32 %v2283_v37, %v2269_v59  ;;  %v4968_v61 = vadd.f32 %v4922_v15, %v2167_v0 }
 0x501   :  { %v2192_v8 = vsub.f32 0.0, %v4968_v61 }
 0x503   :  { %v2218_v47 = vmul.f32 1.442695, %v2192_v8  ;;  %v2904_v1 = vpop.eup %2903 }
 0x504   :  { %v2906_v33 = vpop.eup %2905  ;;  %v2239_v24 = vadd.f32 1.0, %v2904_v1 }
 0x505   :  { %2907 = vpow2.f32 %v2218_v47  ;;  %v2238_v10 = vadd.f32 1.0, %v2906_v33 }
 0x506   :  { %v2169_v30 = vpop.f32.mrf.mxu3 }
 0x507   :  { %v4975_v12 = vadd.f32 %v4922_v15, %v2169_v30 }
 0x509   :  { %v2193_v16 = vsub.f32 0.0, %v4975_v12 }
 0x50b   :  { %v2220_v40 = vmul.f32 1.442695, %v2193_v16  ;;  %v2908_v18 = vpop.eup %2907 }
 0x50c   :  { %v2240_v31 = vadd.f32 1.0, %v2908_v18  ;;  %v2668_v18 = vld [vmem:[%s5042_s17] ss:$0 sm:$0xff] }
 0x50d   :  { %2909 = vpow2.f32 %v2220_v40 }
 0x50e   :  { %v2172_v4 = vpop.f32.mrf.mxu3 }
 0x50f   :  { %v4980_v52 = vadd.f32 %v4922_v15, %v2172_v4  ;;  %v2285_v4 = vrot.slane %v4953_v9, 4 }
 0x511   :  { %v2194_v13 = vsub.f32 0.0, %v4980_v52 }
 0x513   :  { %v2222_v28 = vmul.f32 1.442695, %v2194_v13  ;;  %v2910_v58 = vpop.eup %2909 }
 0x514   :  { %v2241_v50 = vadd.f32 1.0, %v2910_v58 }
 0x515   :  { %2911 = vpow2.f32 %v2222_v28 }
 0x516   :  { %v2174_v53 = vpop.f32.mrf.mxu3 }
 0x517   :  { %v4985_v51 = vadd.f32 %v4922_v15, %v2174_v53 }
 0x519   :  { %v2195_v49 = vsub.f32 0.0, %v4985_v51 }
 0x51b   :  { %v2224_v14 = vmul.f32 1.442695, %v2195_v49  ;;  %v2912_v56 = vpop.eup %2911 }
 0x51c   :  { %v2242_v55 = vadd.f32 1.0, %v2912_v56 }
 0x51d   :  { %2913 = vpow2.f32 %v2224_v14 }
 0x51e   :  { %v2177_v17 = vpop.f32.mrf.mxu3 }
 0x51f   :  { %v2178_v44 = vadd.f32 %v4922_v15, %v2177_v17 }
 0x521   :  { %v2196_v29 = vsub.f32 0.0, %v2178_v44 }
 0x523   :  { %v2226_v34 = vmul.f32 1.442695, %v2196_v29  ;;  %v2914_v38 = vpop.eup %2913 }
 0x524   :  { %v2243_v42 = vadd.f32 1.0, %v2914_v38 }
 0x525   :  { %2915 = vpow2.f32 %v2226_v34 }
 0x526   :  { %2917 = vrcp.f32 %v2239_v24  ;;  %v2179_v2 = vpop.f32.mrf.mxu3 }
 0x527   :  { %2919 = vrcp.f32 %v2238_v10  ;;  %v2180_v35 = vadd.f32 %v4922_v15, %v2179_v2 }
 0x528   :  { %2921 = vrcp.f32 %v2240_v31 }
 0x529   :  { %v2197_v7 = vsub.f32 0.0, %v2180_v35  ;;  %2923 = vrcp.f32 %v2241_v50 }
 0x52a   :  { %2925 = vrcp.f32 %v2242_v55 }
 0x52b   :  { %v2916_v15 = vpop.eup %2915  ;;  %v2228_v3 = vmul.f32 1.442695, %v2197_v7 }
 0x52c   :  { %v2918_v41 = vpop.eup %2917  ;;  %v2244_v26 = vadd.f32 1.0, %v2916_v15 }
 0x52d   :  { %v2920_v60 = vpop.eup %2919  ;;  %2927 = vpow2.f32 %v2228_v3  ;;  %v2271_v36 = vmul.f32 %v2918_v41, %v4962_v21 }
 0x52e   :  { %v2922_v23 = vpop.eup %2921  ;;  %2929 = vrcp.f32 %v2243_v42  ;;  %v2270_v37 = vmul.f32 %v2920_v60, %v4965_v43  ;;  %v2286_v43 = vadd.f32 %v2285_v4, %v4953_v9 }
 0x52f   :  { %v2924_v63 = vpop.eup %2923  ;;  %2931 = vrcp.f32 %v2244_v26  ;;  %v2272_v6 = vmul.f32 %v2922_v23, %v4968_v61 }
 0x530   :  { %v2926_v54 = vpop.eup %2925  ;;  %v2291_v0 = vadd.f32 %v2271_v36, %v2270_v37  ;;  %v2273_v62 = vmul.f32 %v2924_v63, %v4975_v12  ;;  %v2287_v53 = vrot.slane %v2286_v43, 2 }
 0x531   :  { %v2274_v45 = vmul.f32 %v2926_v54, %v4980_v52 }
 0x532   :  { %v2292_v20 = vadd.f32 %v2291_v0, %v2272_v6  ;;  %v2288_v27 = vadd.f32 %v2287_v53, %v2286_v43 }
 0x533   :  { %v2928_v59 = vpop.eup %2927 }
 0x534   :  { %v2930_v30 = vpop.eup %2929  ;;  %v2245_v32 = vadd.f32 1.0, %v2928_v59  ;;  %v2293_v48 = vadd.f32 %v2292_v20, %v2273_v62  ;;  %v2289_v52 = vrot.slane %v2288_v27, 1 }
 0x535   :  { %v2932_v21 = vpop.eup %2931  ;;  %v2275_v8 = vmul.f32 %v2930_v30, %v4985_v51 }
 0x536   :  { %2933 = vrcp.f32 %v2245_v32  ;;  %v2294_v61 = vadd.f32 %v2293_v48, %v2274_v45  ;;  %v2276_v22 = vmul.f32 %v2932_v21, %v2178_v44  ;;  %v2290_v17 = vadd.f32 %v2289_v52, %v2288_v27 }
 0x538   :  { %v2295_v16 = vadd.f32 %v2294_v61, %v2275_v8  ;;  %v2304_v51 = vmul.f32 %v2290_v17, %v4798_v39 }
 0x53a   :  { %v2296_v12 = vadd.f32 %v2295_v16, %v2276_v22 }
 0x53c   :  { %v2934_v11 = vpop.eup %2933 }
 0x53d   :  { %v2277_v47 = vmul.f32 %v2934_v11, %v2180_v35 }
 0x53f   :  { %v2297_v13 = vadd.f32 %v2296_v12, %v2277_v47 }
 0x541   :  { %v2298_v40 = vrot.slane %v2297_v13, 4 }
 0x543   :  { %v2299_v49 = vadd.f32 %v2298_v40, %v2297_v13 }
 0x545   :  { %v2300_v28 = vrot.slane %v2299_v49, 2 }
 0x547   :  { %v2301_v14 = vadd.f32 %v2300_v28, %v2299_v49 }
 0x549   :  { %v2302_v1 = vrot.slane %v2301_v14, 1 }
 0x54b   :  { %v2303_v33 = vadd.f32 %v2302_v1, %v2301_v14 }
 0x54d   :  { %v2305_v9 = vmul.f32 %v2303_v33, %v4798_v39 }
 0x54f   :  { %v2328_v44 = vsel %vm1804_vm4, %v2305_v9, %v2304_v51 }
 0x550   :  { %2346 = vmatmul.f32.vlgmr.msrb.gmra.mxu2 %v2328_v44 }
 0x5d3   :  { %v2347_v29 = vpop.f32.mrf.mxu2 }
 0x5d4   :  { %v2348_v24 = vadd.f32 %v2668_v18, %v2347_v29 }
 0x5d6   :  { %2350 = vst [vmem:[#allocation2] sm:$0x3] %v2348_v24 }
 0x5d7   :  { %2361 = dma.vmem_to_hbm [thread:$0]  %s2357_s27, 32, %s2359_s3, [#allocation3]  }
 0x5d8   :  { %2971 = dma.done.wait [#allocation3], 32  }
 0x5d9   :  { %2972 = vsyncadd [#allocation3], 4294967264 }
 0x5da   :  { %2366 = vsyncpa [#allocation3], 1 }

</bundles_post_ra>
